<compile_context>
chip_gen: v7x
topology: tpu7x:2x2x1
jax: 0.10.0
libtpu: 0.0.40
codegen_flags: <defaults>
</compile_context>

<pallas_src>
from functools import partial

import jax
import jax.numpy as jnp
from jax.experimental import pallas as pl
from jax.experimental.pallas import tpu as pltpu


# ----------------------------------------------------------------------------
# small helpers
# ----------------------------------------------------------------------------
def _round_up(x, m):
    return -(-x // m) * m


def _pick_tile(dim, target, align):
    """Full dim if it fits; else a divisor in (target/2, target] (aligned);
    else `target` (caller pads)."""
    if dim <= target:
        return dim
    t = target
    while t > target // 2:
        if dim % t == 0:
            return t
        t -= align
    return target


def _pad2d(a, rows, cols):
    r, c = a.shape
    if r == rows and c == cols:
        return a
    return jnp.pad(a, ((0, rows - r), (0, cols - c)))


# ----------------------------------------------------------------------------
# Pallas kernels
# ----------------------------------------------------------------------------
def _linear_kernel(*refs, act, has_residual):
    if has_residual:
        x_ref, w_ref, b_ref, r_ref, o_ref, acc_ref = refs
    else:
        x_ref, w_ref, b_ref, o_ref, acc_ref = refs
        r_ref = None

    @pl.when(pl.program_id(2) == 0)
    def _init():
        acc_ref[...] = jnp.zeros_like(acc_ref)

    acc_ref[...] += jnp.dot(x_ref[...], w_ref[...],
                            preferred_element_type=jnp.float32)

    @pl.when(pl.program_id(2) == pl.num_programs(2) - 1)
    def _writeback():
        y = acc_ref[...] + b_ref[...].astype(jnp.float32)
        if act == "gelu":
            # TODO(synk): exact-erf GELU (nn.GELU / HF "gelu") approximated
            # with the tanh form in-kernel (EUP-friendly); drift < ~1e-3.
            y = jax.nn.gelu(y, approximate=True)
        if has_residual:
            y = y + r_ref[...].astype(jnp.float32)
        o_ref[...] = y.astype(o_ref.dtype)


def linear(x, w, b, *, act=None, residual=None,
           tm_target=256, tn_target=512, tk_target=512):
    """(M,K) @ (K,N) + b, tiled + pipelined, bf16 operands / f32 accum.

    Optional fused epilogues: act="gelu", residual=(M,N) added after bias/act.
    Returns bf16 (M, N)."""
    M, K = x.shape
    N = w.shape[1]
    tm = _pick_tile(M, tm_target, 8)
    tn = _pick_tile(N, tn_target, 128)
    tk = _pick_tile(K, tk_target, 128)
    Mp, Kp, Np = _round_up(M, tm), _round_up(K, tk), _round_up(N, tn)

    xb = _pad2d(x.astype(jnp.bfloat16), Mp, Kp)
    wb = _pad2d(w.astype(jnp.bfloat16), Kp, Np)
    bb = _pad2d(b.reshape(1, N).astype(jnp.float32), 1, Np)

    args = [xb, wb, bb]
    in_specs = [
        pl.BlockSpec((tm, tk), lambda i, j, k: (i, k)),
        pl.BlockSpec((tk, tn), lambda i, j, k: (k, j)),
        pl.BlockSpec((1, tn), lambda i, j, k: (0, j)),
    ]
    if residual is not None:
        args.append(_pad2d(residual.astype(jnp.bfloat16), Mp, Np))
        in_specs.append(pl.BlockSpec((tm, tn), lambda i, j, k: (i, j)))

    out = pl.pallas_call(
        partial(_linear_kernel, act=act, has_residual=residual is not None),
        out_shape=jax.ShapeDtypeStruct((Mp, Np), jnp.bfloat16),
        grid=(Mp // tm, Np // tn, Kp // tk),
        in_specs=in_specs,
        out_specs=pl.BlockSpec((tm, tn), lambda i, j, k: (i, j)),
        scratch_shapes=[pltpu.VMEM((tm, tn), jnp.float32)],
        compiler_params=pltpu.CompilerParams(
            dimension_semantics=("parallel", "parallel", "arbitrary")),
    )(*args)
    if Mp != M or Np != N:
        out = out[:M, :N]
    return out


def _layernorm_kernel(*refs, eps, has_residual):
    if has_residual:
        x_ref, r_ref, g_ref, b_ref, o_ref = refs
    else:
        x_ref, g_ref, b_ref, o_ref = refs
        r_ref = None
    x = x_ref[...].astype(jnp.float32)
    if has_residual:
        x = x + r_ref[...].astype(jnp.float32)
    mu = jnp.mean(x, axis=-1, keepdims=True)
    xc = x - mu
    var = jnp.mean(xc * xc, axis=-1, keepdims=True)
    y = xc * jax.lax.rsqrt(var + eps)
    o_ref[...] = (y * g_ref[...].astype(jnp.float32)
                  + b_ref[...].astype(jnp.float32)).astype(o_ref.dtype)


def layer_norm(x, g, b, eps, residual=None, row_tile=512):
    """LayerNorm over last axis of (M, D); optional fused `x + residual`."""
    M, D = x.shape
    tm = _pick_tile(M, row_tile, 8)
    Mp = _round_up(M, tm)

    args = [_pad2d(x.astype(jnp.bfloat16), Mp, D)]
    in_specs = [pl.BlockSpec((tm, D), lambda i: (i, 0))]
    if residual is not None:
        args.append(_pad2d(residual.astype(jnp.bfloat16), Mp, D))
        in_specs.append(pl.BlockSpec((tm, D), lambda i: (i, 0)))
    args += [g.reshape(1, D).astype(jnp.float32),
             b.reshape(1, D).astype(jnp.float32)]
    in_specs += [pl.BlockSpec((1, D), lambda i: (0, 0)),
                 pl.BlockSpec((1, D), lambda i: (0, 0))]

    out = pl.pallas_call(
        partial(_layernorm_kernel, eps=eps, has_residual=residual is not None),
        out_shape=jax.ShapeDtypeStruct((Mp, D), jnp.bfloat16),
        grid=(Mp // tm,),
        in_specs=in_specs,
        out_specs=pl.BlockSpec((tm, D), lambda i: (i, 0)),
        compiler_params=pltpu.CompilerParams(
            dimension_semantics=("parallel",)),
    )(*args)
    return out[:M] if Mp != M else out


def _mha_kernel(*refs, n_heads, head_dim, scale, has_bias):
    if has_bias:
        q_ref, k_ref, v_ref, bias_ref, o_ref = refs
        bias = bias_ref[0].astype(jnp.float32)          # (1, Lk)
    else:
        q_ref, k_ref, v_ref, o_ref = refs
        bias = None

    # Pre-scale q once (Lq*H*Dh mults instead of Lq*Lk per head).
    q_all = q_ref[0] * jnp.asarray(scale, dtype=q_ref.dtype)   # (Lq, H*Dh)
    k_all = k_ref[0]                                           # (Lk, H*Dh)
    v_all = v_ref[0]

    outs = []
    for h in range(n_heads):
        lo = h * head_dim
        q = jax.lax.slice_in_dim(q_all, lo, lo + head_dim, axis=1)
        k = jax.lax.slice_in_dim(k_all, lo, lo + head_dim, axis=1)
        v = jax.lax.slice_in_dim(v_all, lo, lo + head_dim, axis=1)
        s = jax.lax.dot_general(q, k, (((1,), (1,)), ((), ())),
                                preferred_element_type=jnp.float32)  # (Lq, Lk)
        if bias is not None:
            s = s + bias
        s = s - jnp.max(s, axis=-1, keepdims=True)
        p = jnp.exp(s)
        p = p * pl.reciprocal(jnp.sum(p, axis=-1, keepdims=True), approx=True)
        o = jnp.dot(p.astype(v.dtype), v, preferred_element_type=jnp.float32)
        outs.append(o)
    # Merged-head, lane-dense output (last dim = H*Dh), written in one store.
    o_ref[0] = jnp.concatenate(outs, axis=-1).astype(o_ref.dtype)


def mha(q, k, v, bias, n_heads, scale):
    """q: (B,Lq,H*Dh), k/v: (B,Lk,H*Dh), bias: (B,1,Lk) or None -> (B,Lq,H*Dh)."""
    B, Lq, D = q.shape
    Lk = k.shape[1]
    Dh = D // n_heads
    q = q.astype(jnp.bfloat16)
    k = k.astype(jnp.bfloat16)
    v = v.astype(jnp.bfloat16)

    in_specs = [
        pl.BlockSpec((1, Lq, D), lambda b: (b, 0, 0)),
        pl.BlockSpec((1, Lk, D), lambda b: (b, 0, 0)),
        pl.BlockSpec((1, Lk, D), lambda b: (b, 0, 0)),
    ]
    args = [q, k, v]
    if bias is not None:
        in_specs.append(pl.BlockSpec((1, 1, Lk), lambda b: (b, 0, 0)))
        args.append(bias.astype(jnp.float32))

    return pl.pallas_call(
        partial(_mha_kernel, n_heads=n_heads, head_dim=Dh, scale=scale,
                has_bias=bias is not None),
        out_shape=jax.ShapeDtypeStruct((B, Lq, D), jnp.bfloat16),
        grid=(B,),
        in_specs=in_specs,
        out_specs=pl.BlockSpec((1, Lq, D), lambda b: (b, 0, 0)),
        compiler_params=pltpu.CompilerParams(
            dimension_semantics=("parallel",)),
    )(*args)


# ----------------------------------------------------------------------------
# Vision transformer (visual_encoder)
# ----------------------------------------------------------------------------
def vit_forward(image, p, cfg):
    B, C, Himg, Wimg = image.shape
    ps = cfg["patch"]
    D = cfg["vit_dim"]
    H = cfg["vit_heads"]
    Hn, Wn = Himg // ps, Wimg // ps
    Dh = D // H
    scale = Dh ** -0.5

    # patch-embed conv(stride=patch) as matmul
    patches = (
        image.reshape(B, C, Hn, ps, Wn, ps)
        .transpose(0, 2, 4, 1, 3, 5)
        .reshape(B * Hn * Wn, C * ps * ps)
    )
    x = linear(patches, p["patch_w"], p["patch_b"]).reshape(B, Hn * Wn, D)

    cls = jnp.broadcast_to(p["cls_token"].astype(jnp.bfloat16), (B, 1, D))
    x = jnp.concatenate([cls, x], axis=1)
    x = x + p["pos_embed"].astype(jnp.bfloat16)
    L = x.shape[1]

    for blk in p["blocks"]:
        # --- attention ---
        xf = x.reshape(B * L, D)
        h = layer_norm(xf, blk["ln1_g"], blk["ln1_b"], 1e-6)
        # Single fused QKV matmul (D -> 3D); output stays merged-head, so the
        # lane-contiguous slices below directly feed the attention kernel
        # (no 5-D qkv transpose in XLA).
        qkv = linear(h, blk["qkv_w"], blk["qkv_b"]).reshape(B, L, 3 * D)
        q = qkv[..., :D]
        k = qkv[..., D:2 * D]
        v = qkv[..., 2 * D:]
        ctx = mha(q, k, v, None, H, scale).reshape(B * L, D)
        x = linear(ctx, blk["proj_w"], blk["proj_b"],
                   residual=xf).reshape(B, L, D)
        # --- mlp ---
        xf = x.reshape(B * L, D)
        hh = layer_norm(xf, blk["ln2_g"], blk["ln2_b"], 1e-6)
        hh = linear(hh, blk["fc1_w"], blk["fc1_b"], act="gelu")
        x = linear(hh, blk["fc2_w"], blk["fc2_b"],
                   residual=xf).reshape(B, L, D)

    x = layer_norm(x.reshape(B * L, D), p["ln_g"], p["ln_b"], 1e-6).reshape(B, L, D)
    return x


# ----------------------------------------------------------------------------
# BERT text encoder with cross-attention to image embeds
# ----------------------------------------------------------------------------
def bert_forward(input_ids, attention_mask, enc_hidden, enc_mask, p, cfg):
    B, L = input_ids.shape
    D = cfg["bert_dim"]
    H = cfg["bert_heads"]
    Dh = D // H
    scale = Dh ** -0.5
    Lk = enc_hidden.shape[1]
    Dv = enc_hidden.shape[-1]

    # embeddings (gather + adds are plain-JAX glue; LN is a Pallas kernel)
    word = jnp.take(p["word_emb"], input_ids, axis=0)            # (B,L,D)
    pos = p["pos_emb"][:L][None, :, :]                           # (1,L,D)
    tok = p["type_emb"][0][None, None, :]                        # token_type_ids = 0
    emb = (word + pos + tok).astype(jnp.bfloat16)
    x = layer_norm(emb.reshape(B * L, D), p["emb_ln_g"], p["emb_ln_b"],
                   1e-12).reshape(B, L, D)

    # extended (additive) attention mask, per BERT convention; kept at
    # (B, 1, Lk) and broadcast across heads inside the attention kernel.
    self_bias = ((1.0 - attention_mask.astype(jnp.float32)) * -10000.0)[:, None, :]
    if enc_mask is not None:
        cross_bias = ((1.0 - enc_mask.astype(jnp.float32)) * -10000.0)[:, None, :]
    else:
        cross_bias = None   # all-ones image mask -> identically-zero bias

    enc_flat = enc_hidden.reshape(B * Lk, Dv)

    for lyr in p["layers"]:
        # --- self attention (fused QKV projection) ---
        xf = x.reshape(B * L, D)
        qkv = linear(xf, lyr["sa_qkv_w"], lyr["sa_qkv_b"]).reshape(B, L, 3 * D)
        q = qkv[..., :D]
        k = qkv[..., D:2 * D]
        v = qkv[..., 2 * D:]
        ctx = mha(q, k, v, self_bias, H, scale).reshape(B * L, D)
        a = linear(ctx, lyr["sa_o_w"], lyr["sa_o_b"])
        x = layer_norm(a, lyr["sa_ln_g"], lyr["sa_ln_b"], 1e-12,
                       residual=xf).reshape(B, L, D)

        # --- cross attention (keys/values from image embeds, fused KV) ---
        xf = x.reshape(B * L, D)
        q = linear(xf, lyr["ca_q_w"], lyr["ca_q_b"]).reshape(B, L, D)
        kv = linear(enc_flat, lyr["ca_kv_w"], lyr["ca_kv_b"]).reshape(B, Lk, 2 * D)
        k = kv[..., :D]
        v = kv[..., D:]
        ctx = mha(q, k, v, cross_bias, H, scale).reshape(B * L, D)
        a = linear(ctx, lyr["ca_o_w"], lyr["ca_o_b"])
        x = layer_norm(a, lyr["ca_ln_g"], lyr["ca_ln_b"], 1e-12,
                       residual=xf).reshape(B, L, D)

        # --- feed-forward ---
        xf = x.reshape(B * L, D)
        hh = linear(xf, lyr["ff1_w"], lyr["ff1_b"], act="gelu")
        hh = linear(hh, lyr["ff2_w"], lyr["ff2_b"])
        x = layer_norm(hh, lyr["ff_ln_g"], lyr["ff_ln_b"], 1e-12,
                       residual=xf).reshape(B, L, D)

    return x


# ----------------------------------------------------------------------------
# BSGEmbeddingModel.forward
# ----------------------------------------------------------------------------
def bsg_forward(image, input_ids, attention_mask, params, cfg):
    image_embeds = vit_forward(image, params["vit"], cfg)
    # image_atts = torch.ones(...) -> the encoder attention bias is identically
    # zero, so it is elided (enc_mask=None) with identical semantics.
    last_hidden = bert_forward(input_ids, attention_mask, image_embeds, None,
                               params["bert"], cfg)
    vl_embeddings = last_hidden[:, 0, :]  # CLS token
    return vl_embeddings.astype(jnp.float32)


# ----------------------------------------------------------------------------
# Deterministic parameter init (synthetic; no checkpoint loading)
# ----------------------------------------------------------------------------
def init_params(key, cfg):
    keys = iter(jax.random.split(key, 256))

    def nrm(shape, std=0.02):
        # matmul / embedding weights stored in bf16 (MXU fast path)
        return (jax.random.normal(next(keys), shape, jnp.float32) * std).astype(
            jnp.bfloat16)

    C, ps = cfg["in_chans"], cfg["patch"]
    Dv, Hv = cfg["vit_dim"], cfg["vit_heads"]
    Mv = cfg["vit_mlp"]
    n_patches = (cfg["img_size"] // ps) ** 2

    vit_blocks = []
    for _ in range(cfg["vit_depth"]):
        vit_blocks.append(
            dict(
                ln1_g=jnp.ones((Dv,), jnp.float32), ln1_b=jnp.zeros((Dv,), jnp.float32),
                qkv_w=nrm((Dv, 3 * Dv)), qkv_b=jnp.zeros((3 * Dv,), jnp.float32),
                proj_w=nrm((Dv, Dv)), proj_b=jnp.zeros((Dv,), jnp.float32),
                ln2_g=jnp.ones((Dv,), jnp.float32), ln2_b=jnp.zeros((Dv,), jnp.float32),
                fc1_w=nrm((Dv, Mv)), fc1_b=jnp.zeros((Mv,), jnp.float32),
                fc2_w=nrm((Mv, Dv)), fc2_b=jnp.zeros((Dv,), jnp.float32),
            )
        )
    vit = dict(
        patch_w=nrm((C * ps * ps, Dv)), patch_b=jnp.zeros((Dv,), jnp.float32),
        cls_token=nrm((1, 1, Dv)),
        pos_embed=nrm((1, 1 + n_patches, Dv)),
        blocks=vit_blocks,
        ln_g=jnp.ones((Dv,), jnp.float32), ln_b=jnp.zeros((Dv,), jnp.float32),
    )

    Dt, It = cfg["bert_dim"], cfg["bert_inter"]
    bert_layers = []
    for _ in range(cfg["bert_layers"]):
        bert_layers.append(
            dict(
                # self-attention q/k/v fused along the output dimension
                # (equivalent to separate nn.Linear q/k/v weights concatenated).
                sa_qkv_w=nrm((Dt, 3 * Dt)), sa_qkv_b=jnp.zeros((3 * Dt,), jnp.float32),
                sa_o_w=nrm((Dt, Dt)), sa_o_b=jnp.zeros((Dt,), jnp.float32),
                sa_ln_g=jnp.ones((Dt,), jnp.float32), sa_ln_b=jnp.zeros((Dt,), jnp.float32),
                ca_q_w=nrm((Dt, Dt)), ca_q_b=jnp.zeros((Dt,), jnp.float32),
                # cross-attention k/v fused (both project from the ViT dim).
                ca_kv_w=nrm((Dv, 2 * Dt)), ca_kv_b=jnp.zeros((2 * Dt,), jnp.float32),
                ca_o_w=nrm((Dt, Dt)), ca_o_b=jnp.zeros((Dt,), jnp.float32),
                ca_ln_g=jnp.ones((Dt,), jnp.float32), ca_ln_b=jnp.zeros((Dt,), jnp.float32),
                ff1_w=nrm((Dt, It)), ff1_b=jnp.zeros((It,), jnp.float32),
                ff2_w=nrm((It, Dt)), ff2_b=jnp.zeros((Dt,), jnp.float32),
                ff_ln_g=jnp.ones((Dt,), jnp.float32), ff_ln_b=jnp.zeros((Dt,), jnp.float32),
            )
        )
    bert = dict(
        word_emb=nrm((cfg["vocab"], Dt)),
        pos_emb=nrm((cfg["max_pos"], Dt)),
        type_emb=nrm((2, Dt)),
        emb_ln_g=jnp.ones((Dt,), jnp.float32), emb_ln_b=jnp.zeros((Dt,), jnp.float32),
        layers=bert_layers,
    )
    return dict(vit=vit, bert=bert)


# ----------------------------------------------------------------------------
if __name__ == "__main__":
    # Small config consistent with the module structure (ViT patch=16 + BERT w/
    # cross-attention). Real model uses img_size=384, dim=768, depth=12.
    cfg = dict(
        img_size=32, patch=16, in_chans=3,
        vit_dim=32, vit_depth=2, vit_heads=4, vit_mlp=128,
        bert_dim=32, bert_layers=2, bert_heads=4, bert_inter=128,
        vocab=100, max_pos=16,
    )
    B, L = 2, 8

    key = jax.random.PRNGKey(0)
    kp, ki, kt = jax.random.split(key, 3)
    params = init_params(kp, cfg)

    image = jax.random.normal(
        ki, (B, cfg["in_chans"], cfg["img_size"], cfg["img_size"]), jnp.float32)
    input_ids = jax.random.randint(kt, (B, L), 0, cfg["vocab"], dtype=jnp.int32)
    attention_mask = jnp.array([[1] * L, [1] * (L - 2) + [0] * 2], dtype=jnp.int32)

    # TODO(synk): pretrained-weight loading (BertModel.from_pretrained) has no
    # Pallas equivalent; parameters are synthetic deterministic init.
    fwd = jax.jit(lambda img, ids, mask, prm: bsg_forward(img, ids, mask, prm, cfg))
    vl_embeddings = fwd(image, input_ids, attention_mask, params)
    vl_embeddings = jax.block_until_ready(vl_embeddings)
    assert vl_embeddings.shape == (B, cfg["bert_dim"])
    assert vl_embeddings.dtype == jnp.float32
    print("KERNEL_OK")
</pallas_src>

<mosaic_0001>
module attributes {stable_mosaic.version = 11 : i64} {
  func.func @_linear_kernel(%arg0: i32, %arg1: i32, %arg2: i32, %arg3: memref<8x384xbf16, #tpu.memory_space<vmem>>, %arg4: memref<384x32xbf16, #tpu.memory_space<vmem>>, %arg5: memref<1x32xf32, #tpu.memory_space<vmem>>, %arg6: memref<8x32xbf16, #tpu.memory_space<vmem>>, %arg7: memref<8x32xf32, #tpu.memory_space<vmem>>) attributes {dimension_semantics = [#tpu.dimension_semantics<parallel>, #tpu.dimension_semantics<parallel>, #tpu.dimension_semantics<arbitrary>], iteration_bounds = array<i64: 1, 1, 2>, scalar_prefetch = 0 : i64, scratch_operands = 1 : i64, tpu.core_type = #tpu.core_type<tc>, window_params = [{transform_indices = @transform_0, window_bounds = array<i64: 8, 384>}, {transform_indices = @transform_1, window_bounds = array<i64: 384, 32>}, {transform_indices = @transform_2, window_bounds = array<i64: 1, 32>}, {transform_indices = @transform_3, window_bounds = array<i64: 8, 32>}]} {
    %c0_i32 = arith.constant 0 : i32
    %0 = arith.cmpi eq, %arg2, %c0_i32 : i32
    %1 = arith.extui %0 : i1 to i32
    %c0_i32_0 = arith.constant 0 : i32
    %2 = arith.cmpi ne, %1, %c0_i32_0 : i32
    scf.if %2 {
      %cst_9 = arith.constant 0.000000e+00 : f32
      %12 = vector.broadcast %cst_9 : f32 to vector<8x32xf32>
      %c0_10 = arith.constant 0 : index
      %c0_11 = arith.constant 0 : index
      %13 = vector.load %arg7[%c0_10, %c0_11] : memref<8x32xf32, #tpu.memory_space<vmem>>, vector<8x32xf32>
      tpu.vector_store %arg7[%c0_10, %c0_11], %12 {strides = array<i32>} : memref<8x32xf32, #tpu.memory_space<vmem>>, vector<8x32xf32>,
    } else {
    }
    %c0 = arith.constant 0 : index
    %c0_1 = arith.constant 0 : index
    %3 = vector.load %arg7[%c0, %c0_1] : memref<8x32xf32, #tpu.memory_space<vmem>>, vector<8x32xf32>
    %c0_2 = arith.constant 0 : index
    %c0_3 = arith.constant 0 : index
    %4 = vector.load %arg3[%c0_2, %c0_3] : memref<8x384xbf16, #tpu.memory_space<vmem>>, vector<8x384xbf16>
    %c0_4 = arith.constant 0 : index
    %c0_5 = arith.constant 0 : index
    %5 = vector.load %arg4[%c0_4, %c0_5] : memref<384x32xbf16, #tpu.memory_space<vmem>>, vector<384x32xbf16>
    %cst = arith.constant dense<0.000000e+00> : vector<8x32xf32>
    %6 = tpu.matmul %4, %5, %cst {dimension_numbers = #tpu.dot_dimension_numbers<[1], [0], [0], [1], [0, 0, 1, 1], [], []>} : vector<8x384xbf16>, vector<384x32xbf16>, vector<8x32xf32> -> vector<8x32xf32>
    %7 = arith.addf %3, %6 : vector<8x32xf32>
    %c0_6 = arith.constant 0 : index
    %c0_7 = arith.constant 0 : index
    %8 = vector.load %arg7[%c0_6, %c0_7] : memref<8x32xf32, #tpu.memory_space<vmem>>, vector<8x32xf32>
    tpu.vector_store %arg7[%c0_6, %c0_7], %7 {strides = array<i32>} : memref<8x32xf32, #tpu.memory_space<vmem>>, vector<8x32xf32>,
    %c1_i32 = arith.constant 1 : i32
    %9 = arith.cmpi eq, %arg2, %c1_i32 : i32
    %10 = arith.extui %9 : i1 to i32
    %c0_i32_8 = arith.constant 0 : i32
    %11 = arith.cmpi ne, %10, %c0_i32_8 : i32
    scf.if %11 {
      %c0_9 = arith.constant 0 : index
      %c0_10 = arith.constant 0 : index
      %12 = vector.load %arg7[%c0_9, %c0_10] : memref<8x32xf32, #tpu.memory_space<vmem>>, vector<8x32xf32>
      %c0_11 = arith.constant 0 : index
      %c0_12 = arith.constant 0 : index
      %13 = vector.load %arg5[%c0_11, %c0_12] : memref<1x32xf32, #tpu.memory_space<vmem>>, vector<1x32xf32>
      %14 = vector.broadcast %13 : vector<1x32xf32> to vector<8x32xf32>
      %15 = arith.addf %12, %14 : vector<8x32xf32>
      %16 = arith.truncf %15 : vector<8x32xf32> to vector<8x32xbf16>
      %c0_13 = arith.constant 0 : index
      %c0_14 = arith.constant 0 : index
      %17 = vector.load %arg6[%c0_13, %c0_14] : memref<8x32xbf16, #tpu.memory_space<vmem>>, vector<8x32xbf16>
      tpu.vector_store %arg6[%c0_13, %c0_14], %16 {strides = array<i32>} : memref<8x32xbf16, #tpu.memory_space<vmem>>, vector<8x32xbf16>,
    } else {
    }
    return
  }
  func.func @transform_0(%arg0: i32, %arg1: i32, %arg2: i32) -> (i32, i32) {
    %c0_i32 = arith.constant 0 : i32
    return %arg0, %arg2 : i32, i32
  }
  func.func @transform_1(%arg0: i32, %arg1: i32, %arg2: i32) -> (i32, i32) {
    %c0_i32 = arith.constant 0 : i32
    return %arg2, %arg1 : i32, i32
  }
  func.func @transform_2(%arg0: i32, %arg1: i32, %arg2: i32) -> (i32, i32) {
    %c0_i32 = arith.constant 0 : i32
    %c0_i32_0 = arith.constant 0 : i32
    return %c0_i32, %arg1 : i32, i32
  }
  func.func @transform_3(%arg0: i32, %arg1: i32, %arg2: i32) -> (i32, i32) {
    %c0_i32 = arith.constant 0 : i32
    return %arg0, %arg1 : i32, i32
  }
}

module attributes {stable_mosaic.version = 11 : i64} {
  func.func @_linear_kernel(%arg0: i32, %arg1: i32, %arg2: i32, %arg3: memref<10x32xbf16, #tpu.memory_space<vmem>>, %arg4: memref<32x96xbf16, #tpu.memory_space<vmem>>, %arg5: memref<1x96xf32, #tpu.memory_space<vmem>>, %arg6: memref<10x96xbf16, #tpu.memory_space<vmem>>, %arg7: memref<10x96xf32, #tpu.memory_space<vmem>>) attributes {dimension_semantics = [#tpu.dimension_semantics<parallel>, #tpu.dimension_semantics<parallel>, #tpu.dimension_semantics<arbitrary>], iteration_bounds = array<i64: 1, 1, 1>, scalar_prefetch = 0 : i64, scratch_operands = 1 : i64, tpu.core_type = #tpu.core_type<tc>, window_params = [{transform_indices = @transform_0, window_bounds = array<i64: 10, 32>}, {transform_indices = @transform_1, window_bounds = array<i64: 32, 96>}, {transform_indices = @transform_2, window_bounds = array<i64: 1, 96>}, {transform_indices = @transform_3, window_bounds = array<i64: 10, 96>}]} {
    %c0_i32 = arith.constant 0 : i32
    %0 = arith.cmpi eq, %arg2, %c0_i32 : i32
    %1 = arith.extui %0 : i1 to i32
    %c0_i32_0 = arith.constant 0 : i32
    %2 = arith.cmpi ne, %1, %c0_i32_0 : i32
    scf.if %2 {
      %cst_10 = arith.constant 0.000000e+00 : f32
      %12 = vector.broadcast %cst_10 : f32 to vector<10x96xf32>
      %c0_11 = arith.constant 0 : index
      %c0_12 = arith.constant 0 : index
      %13 = vector.load %arg7[%c0_11, %c0_12] : memref<10x96xf32, #tpu.memory_space<vmem>>, vector<10x96xf32>
      tpu.vector_store %arg7[%c0_11, %c0_12], %12 {strides = array<i32>} : memref<10x96xf32, #tpu.memory_space<vmem>>, vector<10x96xf32>,
    } else {
    }
    %c0 = arith.constant 0 : index
    %c0_1 = arith.constant 0 : index
    %3 = vector.load %arg7[%c0, %c0_1] : memref<10x96xf32, #tpu.memory_space<vmem>>, vector<10x96xf32>
    %c0_2 = arith.constant 0 : index
    %c0_3 = arith.constant 0 : index
    %4 = vector.load %arg3[%c0_2, %c0_3] : memref<10x32xbf16, #tpu.memory_space<vmem>>, vector<10x32xbf16>
    %c0_4 = arith.constant 0 : index
    %c0_5 = arith.constant 0 : index
    %5 = vector.load %arg4[%c0_4, %c0_5] : memref<32x96xbf16, #tpu.memory_space<vmem>>, vector<32x96xbf16>
    %cst = arith.constant dense<0.000000e+00> : vector<10x96xf32>
    %6 = tpu.matmul %4, %5, %cst {dimension_numbers = #tpu.dot_dimension_numbers<[1], [0], [0], [1], [0, 0, 1, 1], [], []>} : vector<10x32xbf16>, vector<32x96xbf16>, vector<10x96xf32> -> vector<10x96xf32>
    %7 = arith.addf %3, %6 : vector<10x96xf32>
    %c0_6 = arith.constant 0 : index
    %c0_7 = arith.constant 0 : index
    %8 = vector.load %arg7[%c0_6, %c0_7] : memref<10x96xf32, #tpu.memory_space<vmem>>, vector<10x96xf32>
    tpu.vector_store %arg7[%c0_6, %c0_7], %7 {strides = array<i32>} : memref<10x96xf32, #tpu.memory_space<vmem>>, vector<10x96xf32>,
    %c0_i32_8 = arith.constant 0 : i32
    %9 = arith.cmpi eq, %arg2, %c0_i32_8 : i32
    %10 = arith.extui %9 : i1 to i32
    %c0_i32_9 = arith.constant 0 : i32
    %11 = arith.cmpi ne, %10, %c0_i32_9 : i32
    scf.if %11 {
      %c0_10 = arith.constant 0 : index
      %c0_11 = arith.constant 0 : index
      %12 = vector.load %arg7[%c0_10, %c0_11] : memref<10x96xf32, #tpu.memory_space<vmem>>, vector<10x96xf32>
      %c0_12 = arith.constant 0 : index
      %c0_13 = arith.constant 0 : index
      %13 = vector.load %arg5[%c0_12, %c0_13] : memref<1x96xf32, #tpu.memory_space<vmem>>, vector<1x96xf32>
      %14 = vector.broadcast %13 : vector<1x96xf32> to vector<10x96xf32>
      %15 = arith.addf %12, %14 : vector<10x96xf32>
      %16 = arith.truncf %15 : vector<10x96xf32> to vector<10x96xbf16>
      %c0_14 = arith.constant 0 : index
      %c0_15 = arith.constant 0 : index
      %17 = vector.load %arg6[%c0_14, %c0_15] : memref<10x96xbf16, #tpu.memory_space<vmem>>, vector<10x96xbf16>
      tpu.vector_store %arg6[%c0_14, %c0_15], %16 {strides = array<i32>} : memref<10x96xbf16, #tpu.memory_space<vmem>>, vector<10x96xbf16>,
    } else {
    }
    return
  }
  func.func @transform_0(%arg0: i32, %arg1: i32, %arg2: i32) -> (i32, i32) {
    %c0_i32 = arith.constant 0 : i32
    return %arg0, %arg2 : i32, i32
  }
  func.func @transform_1(%arg0: i32, %arg1: i32, %arg2: i32) -> (i32, i32) {
    %c0_i32 = arith.constant 0 : i32
    return %arg2, %arg1 : i32, i32
  }
  func.func @transform_2(%arg0: i32, %arg1: i32, %arg2: i32) -> (i32, i32) {
    %c0_i32 = arith.constant 0 : i32
    %c0_i32_0 = arith.constant 0 : i32
    return %c0_i32, %arg1 : i32, i32
  }
  func.func @transform_3(%arg0: i32, %arg1: i32, %arg2: i32) -> (i32, i32) {
    %c0_i32 = arith.constant 0 : i32
    return %arg0, %arg1 : i32, i32
  }
}

module attributes {stable_mosaic.version = 11 : i64} {
  func.func @_layernorm_kernel(%arg0: i32, %arg1: memref<10x32xbf16, #tpu.memory_space<vmem>>, %arg2: memref<1x32xf32, #tpu.memory_space<vmem>>, %arg3: memref<1x32xf32, #tpu.memory_space<vmem>>, %arg4: memref<10x32xbf16, #tpu.memory_space<vmem>>) attributes {dimension_semantics = [#tpu.dimension_semantics<parallel>], iteration_bounds = array<i64: 1>, scalar_prefetch = 0 : i64, scratch_operands = 0 : i64, tpu.core_type = #tpu.core_type<tc>, window_params = [{transform_indices = @transform_0, window_bounds = array<i64: 10, 32>}, {pipeline_mode = #tpu.pipeline_mode<synchronous>, transform_indices = @transform_1, window_bounds = array<i64: 1, 32>}, {pipeline_mode = #tpu.pipeline_mode<synchronous>, transform_indices = @transform_2, window_bounds = array<i64: 1, 32>}, {transform_indices = @transform_3, window_bounds = array<i64: 10, 32>}]} {
    %c0 = arith.constant 0 : index
    %c0_0 = arith.constant 0 : index
    %0 = vector.load %arg1[%c0, %c0_0] : memref<10x32xbf16, #tpu.memory_space<vmem>>, vector<10x32xbf16>
    %1 = arith.extf %0 : vector<10x32xbf16> to vector<10x32xf32>
    %cst = arith.constant dense<0.000000e+00> : vector<10xf32>
    %2 = vector.multi_reduction <add>, %1, %cst [1] : vector<10x32xf32> to vector<10xf32>
    %3 = vector.shape_cast %2 : vector<10xf32> to vector<10x1xf32>
    %cst_1 = arith.constant 3.200000e+01 : f32
    %4 = vector.broadcast %cst_1 : f32 to vector<10x1xf32>
    %5 = arith.divf %3, %4 : vector<10x1xf32>
    %6 = vector.broadcast %5 : vector<10x1xf32> to vector<10x32xf32>
    %7 = arith.subf %1, %6 : vector<10x32xf32>
    %8 = arith.mulf %7, %7 : vector<10x32xf32>
    %cst_2 = arith.constant dense<0.000000e+00> : vector<10xf32>
    %9 = vector.multi_reduction <add>, %8, %cst_2 [1] : vector<10x32xf32> to vector<10xf32>
    %10 = vector.shape_cast %9 : vector<10xf32> to vector<10x1xf32>
    %cst_3 = arith.constant 3.200000e+01 : f32
    %11 = vector.broadcast %cst_3 : f32 to vector<10x1xf32>
    %12 = arith.divf %10, %11 : vector<10x1xf32>
    %cst_4 = arith.constant 9.99999997E-7 : f32
    %13 = vector.broadcast %cst_4 : f32 to vector<10x1xf32>
    %14 = arith.addf %12, %13 : vector<10x1xf32>
    %15 = math.rsqrt %14 : vector<10x1xf32>
    %16 = vector.broadcast %15 : vector<10x1xf32> to vector<10x32xf32>
    %17 = arith.mulf %7, %16 : vector<10x32xf32>
    %c0_5 = arith.constant 0 : index
    %c0_6 = arith.constant 0 : index
    %18 = vector.load %arg2[%c0_5, %c0_6] : memref<1x32xf32, #tpu.memory_space<vmem>>, vector<1x32xf32>
    %19 = vector.broadcast %18 : vector<1x32xf32> to vector<10x32xf32>
    %20 = arith.mulf %17, %19 : vector<10x32xf32>
    %c0_7 = arith.constant 0 : index
    %c0_8 = arith.constant 0 : index
    %21 = vector.load %arg3[%c0_7, %c0_8] : memref<1x32xf32, #tpu.memory_space<vmem>>, vector<1x32xf32>
    %22 = vector.broadcast %21 : vector<1x32xf32> to vector<10x32xf32>
    %23 = arith.addf %20, %22 : vector<10x32xf32>
    %24 = arith.truncf %23 : vector<10x32xf32> to vector<10x32xbf16>
    %c0_9 = arith.constant 0 : index
    %c0_10 = arith.constant 0 : index
    %25 = vector.load %arg4[%c0_9, %c0_10] : memref<10x32xbf16, #tpu.memory_space<vmem>>, vector<10x32xbf16>
    tpu.vector_store %arg4[%c0_9, %c0_10], %24 {strides = array<i32>} : memref<10x32xbf16, #tpu.memory_space<vmem>>, vector<10x32xbf16>,
    return
  }
  func.func @transform_0(%arg0: i32) -> (i32, i32) {
    %c0_i32 = arith.constant 0 : i32
    %c0_i32_0 = arith.constant 0 : i32
    return %arg0, %c0_i32 : i32, i32
  }
  func.func @transform_1(%arg0: i32) -> (i32, i32) {
    %c0_i32 = arith.constant 0 : i32
    %c0_i32_0 = arith.constant 0 : i32
    %c0_i32_1 = arith.constant 0 : i32
    return %c0_i32, %c0_i32_0 : i32, i32
  }
  func.func @transform_2(%arg0: i32) -> (i32, i32) {
    %c0_i32 = arith.constant 0 : i32
    %c0_i32_0 = arith.constant 0 : i32
    %c0_i32_1 = arith.constant 0 : i32
    return %c0_i32, %c0_i32_0 : i32, i32
  }
  func.func @transform_3(%arg0: i32) -> (i32, i32) {
    %c0_i32 = arith.constant 0 : i32
    %c0_i32_0 = arith.constant 0 : i32
    return %arg0, %c0_i32 : i32, i32
  }
}

module attributes {stable_mosaic.version = 11 : i64} {
  func.func @_mha_kernel(%arg0: i32, %arg1: memref<1x5x32xbf16, #tpu.memory_space<vmem>>, %arg2: memref<1x5x32xbf16, #tpu.memory_space<vmem>>, %arg3: memref<1x5x32xbf16, #tpu.memory_space<vmem>>, %arg4: memref<1x5x32xbf16, #tpu.memory_space<vmem>>) attributes {dimension_semantics = [#tpu.dimension_semantics<parallel>], iteration_bounds = array<i64: 2>, scalar_prefetch = 0 : i64, scratch_operands = 0 : i64, tpu.core_type = #tpu.core_type<tc>, window_params = [{transform_indices = @transform_0, window_bounds = array<i64: 1, 5, 32>}, {transform_indices = @transform_1, window_bounds = array<i64: 1, 5, 32>}, {transform_indices = @transform_2, window_bounds = array<i64: 1, 5, 32>}, {transform_indices = @transform_3, window_bounds = array<i64: 1, 5, 32>}]} {
    %c0 = arith.constant 0 : index
    %c0_0 = arith.constant 0 : index
    %c0_1 = arith.constant 0 : index
    %0 = vector.load %arg1[%c0, %c0_0, %c0_1] : memref<1x5x32xbf16, #tpu.memory_space<vmem>>, vector<1x5x32xbf16>
    %1 = vector.shape_cast %0 : vector<1x5x32xbf16> to vector<5x32xbf16>
    %cst = arith.constant 3.535160e-01 : bf16
    %2 = vector.broadcast %cst : bf16 to vector<5x32xbf16>
    %3 = arith.mulf %1, %2 : vector<5x32xbf16>
    %c0_2 = arith.constant 0 : index
    %c0_3 = arith.constant 0 : index
    %c0_4 = arith.constant 0 : index
    %4 = vector.load %arg2[%c0_2, %c0_3, %c0_4] : memref<1x5x32xbf16, #tpu.memory_space<vmem>>, vector<1x5x32xbf16>
    %5 = vector.shape_cast %4 : vector<1x5x32xbf16> to vector<5x32xbf16>
    %c0_5 = arith.constant 0 : index
    %c0_6 = arith.constant 0 : index
    %c0_7 = arith.constant 0 : index
    %6 = vector.load %arg3[%c0_5, %c0_6, %c0_7] : memref<1x5x32xbf16, #tpu.memory_space<vmem>>, vector<1x5x32xbf16>
    %7 = vector.shape_cast %6 : vector<1x5x32xbf16> to vector<5x32xbf16>
    %8 = vector.extract_strided_slice %3 {offsets = [0, 0], sizes = [5, 8], strides = [1, 1]} : vector<5x32xbf16> to vector<5x8xbf16>
    %9 = vector.extract_strided_slice %5 {offsets = [0, 0], sizes = [5, 8], strides = [1, 1]} : vector<5x32xbf16> to vector<5x8xbf16>
    %10 = vector.extract_strided_slice %7 {offsets = [0, 0], sizes = [5, 8], strides = [1, 1]} : vector<5x32xbf16> to vector<5x8xbf16>
    %cst_8 = arith.constant dense<0.000000e+00> : vector<5x5xf32>
    %11 = tpu.matmul %8, %9, %cst_8 {dimension_numbers = #tpu.dot_dimension_numbers<[1], [1], [0], [0], [0, 0, 1, 0], [], []>} : vector<5x8xbf16>, vector<5x8xbf16>, vector<5x5xf32> -> vector<5x5xf32>
    %cst_9 = arith.constant dense<0xFF800000> : vector<5xf32>
    %12 = vector.multi_reduction <maximumf>, %11, %cst_9 [1] : vector<5x5xf32> to vector<5xf32>
    %13 = vector.shape_cast %12 : vector<5xf32> to vector<5x1xf32>
    %14 = vector.broadcast %13 : vector<5x1xf32> to vector<5x5xf32>
    %15 = arith.subf %11, %14 : vector<5x5xf32>
    %16 = math.exp %15 : vector<5x5xf32>
    %cst_10 = arith.constant dense<0.000000e+00> : vector<5xf32>
    %17 = vector.multi_reduction <add>, %16, %cst_10 [1] : vector<5x5xf32> to vector<5xf32>
    %18 = vector.shape_cast %17 : vector<5xf32> to vector<5x1xf32>
    %19 = tpu.reciprocal %18 {approx = true} : vector<5x1xf32> -> vector<5x1xf32>
    %20 = vector.broadcast %19 : vector<5x1xf32> to vector<5x5xf32>
    %21 = arith.mulf %16, %20 : vector<5x5xf32>
    %22 = arith.truncf %21 : vector<5x5xf32> to vector<5x5xbf16>
    %cst_11 = arith.constant dense<0.000000e+00> : vector<5x8xf32>
    %23 = tpu.matmul %22, %10, %cst_11 {dimension_numbers = #tpu.dot_dimension_numbers<[1], [0], [0], [1], [0, 0, 1, 1], [], []>} : vector<5x5xbf16>, vector<5x8xbf16>, vector<5x8xf32> -> vector<5x8xf32>
    %24 = vector.extract_strided_slice %3 {offsets = [0, 8], sizes = [5, 8], strides = [1, 1]} : vector<5x32xbf16> to vector<5x8xbf16>
    %25 = vector.extract_strided_slice %5 {offsets = [0, 8], sizes = [5, 8], strides = [1, 1]} : vector<5x32xbf16> to vector<5x8xbf16>
    %26 = vector.extract_strided_slice %7 {offsets = [0, 8], sizes = [5, 8], strides = [1, 1]} : vector<5x32xbf16> to vector<5x8xbf16>
    %cst_12 = arith.constant dense<0.000000e+00> : vector<5x5xf32>
    %27 = tpu.matmul %24, %25, %cst_12 {dimension_numbers = #tpu.dot_dimension_numbers<[1], [1], [0], [0], [0, 0, 1, 0], [], []>} : vector<5x8xbf16>, vector<5x8xbf16>, vector<5x5xf32> -> vector<5x5xf32>
    %cst_13 = arith.constant dense<0xFF800000> : vector<5xf32>
    %28 = vector.multi_reduction <maximumf>, %27, %cst_13 [1] : vector<5x5xf32> to vector<5xf32>
    %29 = vector.shape_cast %28 : vector<5xf32> to vector<5x1xf32>
    %30 = vector.broadcast %29 : vector<5x1xf32> to vector<5x5xf32>
    %31 = arith.subf %27, %30 : vector<5x5xf32>
    %32 = math.exp %31 : vector<5x5xf32>
    %cst_14 = arith.constant dense<0.000000e+00> : vector<5xf32>
    %33 = vector.multi_reduction <add>, %32, %cst_14 [1] : vector<5x5xf32> to vector<5xf32>
    %34 = vector.shape_cast %33 : vector<5xf32> to vector<5x1xf32>
    %35 = tpu.reciprocal %34 {approx = true} : vector<5x1xf32> -> vector<5x1xf32>
    %36 = vector.broadcast %35 : vector<5x1xf32> to vector<5x5xf32>
    %37 = arith.mulf %32, %36 : vector<5x5xf32>
    %38 = arith.truncf %37 : vector<5x5xf32> to vector<5x5xbf16>
    %cst_15 = arith.constant dense<0.000000e+00> : vector<5x8xf32>
    %39 = tpu.matmul %38, %26, %cst_15 {dimension_numbers = #tpu.dot_dimension_numbers<[1], [0], [0], [1], [0, 0, 1, 1], [], []>} : vector<5x5xbf16>, vector<5x8xbf16>, vector<5x8xf32> -> vector<5x8xf32>
    %40 = vector.extract_strided_slice %3 {offsets = [0, 16], sizes = [5, 8], strides = [1, 1]} : vector<5x32xbf16> to vector<5x8xbf16>
    %41 = vector.extract_strided_slice %5 {offsets = [0, 16], sizes = [5, 8], strides = [1, 1]} : vector<5x32xbf16> to vector<5x8xbf16>
    %42 = vector.extract_strided_slice %7 {offsets = [0, 16], sizes = [5, 8], strides = [1, 1]} : vector<5x32xbf16> to vector<5x8xbf16>
    %cst_16 = arith.constant dense<0.000000e+00> : vector<5x5xf32>
    %43 = tpu.matmul %40, %41, %cst_16 {dimension_numbers = #tpu.dot_dimension_numbers<[1], [1], [0], [0], [0, 0, 1, 0], [], []>} : vector<5x8xbf16>, vector<5x8xbf16>, vector<5x5xf32> -> vector<5x5xf32>
    %cst_17 = arith.constant dense<0xFF800000> : vector<5xf32>
    %44 = vector.multi_reduction <maximumf>, %43, %cst_17 [1] : vector<5x5xf32> to vector<5xf32>
    %45 = vector.shape_cast %44 : vector<5xf32> to vector<5x1xf32>
    %46 = vector.broadcast %45 : vector<5x1xf32> to vector<5x5xf32>
    %47 = arith.subf %43, %46 : vector<5x5xf32>
    %48 = math.exp %47 : vector<5x5xf32>
    %cst_18 = arith.constant dense<0.000000e+00> : vector<5xf32>
    %49 = vector.multi_reduction <add>, %48, %cst_18 [1] : vector<5x5xf32> to vector<5xf32>
    %50 = vector.shape_cast %49 : vector<5xf32> to vector<5x1xf32>
    %51 = tpu.reciprocal %50 {approx = true} : vector<5x1xf32> -> vector<5x1xf32>
    %52 = vector.broadcast %51 : vector<5x1xf32> to vector<5x5xf32>
    %53 = arith.mulf %48, %52 : vector<5x5xf32>
    %54 = arith.truncf %53 : vector<5x5xf32> to vector<5x5xbf16>
    %cst_19 = arith.constant dense<0.000000e+00> : vector<5x8xf32>
    %55 = tpu.matmul %54, %42, %cst_19 {dimension_numbers = #tpu.dot_dimension_numbers<[1], [0], [0], [1], [0, 0, 1, 1], [], []>} : vector<5x5xbf16>, vector<5x8xbf16>, vector<5x8xf32> -> vector<5x8xf32>
    %56 = vector.extract_strided_slice %3 {offsets = [0, 24], sizes = [5, 8], strides = [1, 1]} : vector<5x32xbf16> to vector<5x8xbf16>
    %57 = vector.extract_strided_slice %5 {offsets = [0, 24], sizes = [5, 8], strides = [1, 1]} : vector<5x32xbf16> to vector<5x8xbf16>
    %58 = vector.extract_strided_slice %7 {offsets = [0, 24], sizes = [5, 8], strides = [1, 1]} : vector<5x32xbf16> to vector<5x8xbf16>
    %cst_20 = arith.constant dense<0.000000e+00> : vector<5x5xf32>
    %59 = tpu.matmul %56, %57, %cst_20 {dimension_numbers = #tpu.dot_dimension_numbers<[1], [1], [0], [0], [0, 0, 1, 0], [], []>} : vector<5x8xbf16>, vector<5x8xbf16>, vector<5x5xf32> -> vector<5x5xf32>
    %cst_21 = arith.constant dense<0xFF800000> : vector<5xf32>
    %60 = vector.multi_reduction <maximumf>, %59, %cst_21 [1] : vector<5x5xf32> to vector<5xf32>
    %61 = vector.shape_cast %60 : vector<5xf32> to vector<5x1xf32>
    %62 = vector.broadcast %61 : vector<5x1xf32> to vector<5x5xf32>
    %63 = arith.subf %59, %62 : vector<5x5xf32>
    %64 = math.exp %63 : vector<5x5xf32>
    %cst_22 = arith.constant dense<0.000000e+00> : vector<5xf32>
    %65 = vector.multi_reduction <add>, %64, %cst_22 [1] : vector<5x5xf32> to vector<5xf32>
    %66 = vector.shape_cast %65 : vector<5xf32> to vector<5x1xf32>
    %67 = tpu.reciprocal %66 {approx = true} : vector<5x1xf32> -> vector<5x1xf32>
    %68 = vector.broadcast %67 : vector<5x1xf32> to vector<5x5xf32>
    %69 = arith.mulf %64, %68 : vector<5x5xf32>
    %70 = arith.truncf %69 : vector<5x5xf32> to vector<5x5xbf16>
    %cst_23 = arith.constant dense<0.000000e+00> : vector<5x8xf32>
    %71 = tpu.matmul %70, %58, %cst_23 {dimension_numbers = #tpu.dot_dimension_numbers<[1], [0], [0], [1], [0, 0, 1, 1], [], []>} : vector<5x5xbf16>, vector<5x8xbf16>, vector<5x8xf32> -> vector<5x8xf32>
    %72 = tpu.concatenate %23, %39, %55, %71 in 1 : vector<5x8xf32>, vector<5x8xf32>, vector<5x8xf32>, vector<5x8xf32> -> vector<5x32xf32>
    %73 = arith.truncf %72 : vector<5x32xf32> to vector<5x32xbf16>
    %c0_24 = arith.constant 0 : index
    %c0_25 = arith.constant 0 : index
    %c0_26 = arith.constant 0 : index
    %74 = vector.load %arg4[%c0_24, %c0_25, %c0_26] : memref<1x5x32xbf16, #tpu.memory_space<vmem>>, vector<1x5x32xbf16>
    %75 = vector.shape_cast %74 : vector<1x5x32xbf16> to vector<5x32xbf16>
    %76 = vector.shape_cast %73 : vector<5x32xbf16> to vector<1x5x32xbf16>
    tpu.vector_store %arg4[%c0_24, %c0_25, %c0_26], %76 {strides = array<i32>} : memref<1x5x32xbf16, #tpu.memory_space<vmem>>, vector<1x5x32xbf16>,
    return
  }
  func.func @transform_0(%arg0: i32) -> (i32, i32, i32) {
    %c0_i32 = arith.constant 0 : i32
    %c0_i32_0 = arith.constant 0 : i32
    %c0_i32_1 = arith.constant 0 : i32
    return %arg0, %c0_i32, %c0_i32_0 : i32, i32, i32
  }
  func.func @transform_1(%arg0: i32) -> (i32, i32, i32) {
    %c0_i32 = arith.constant 0 : i32
    %c0_i32_0 = arith.constant 0 : i32
    %c0_i32_1 = arith.constant 0 : i32
    return %arg0, %c0_i32, %c0_i32_0 : i32, i32, i32
  }
  func.func @transform_2(%arg0: i32) -> (i32, i32, i32) {
    %c0_i32 = arith.constant 0 : i32
    %c0_i32_0 = arith.constant 0 : i32
    %c0_i32_1 = arith.constant 0 : i32
    return %arg0, %c0_i32, %c0_i32_0 : i32, i32, i32
  }
  func.func @transform_3(%arg0: i32) -> (i32, i32, i32) {
    %c0_i32 = arith.constant 0 : i32
    %c0_i32_0 = arith.constant 0 : i32
    %c0_i32_1 = arith.constant 0 : i32
    return %arg0, %c0_i32, %c0_i32_0 : i32, i32, i32
  }
}

module attributes {stable_mosaic.version = 11 : i64} {
  func.func @_linear_kernel(%arg0: i32, %arg1: i32, %arg2: i32, %arg3: memref<10x32xbf16, #tpu.memory_space<vmem>>, %arg4: memref<32x32xbf16, #tpu.memory_space<vmem>>, %arg5: memref<1x32xf32, #tpu.memory_space<vmem>>, %arg6: memref<10x32xbf16, #tpu.memory_space<vmem>>, %arg7: memref<10x32xbf16, #tpu.memory_space<vmem>>, %arg8: memref<10x32xf32, #tpu.memory_space<vmem>>) attributes {dimension_semantics = [#tpu.dimension_semantics<parallel>, #tpu.dimension_semantics<parallel>, #tpu.dimension_semantics<arbitrary>], iteration_bounds = array<i64: 1, 1, 1>, scalar_prefetch = 0 : i64, scratch_operands = 1 : i64, tpu.core_type = #tpu.core_type<tc>, window_params = [{transform_indices = @transform_0, window_bounds = array<i64: 10, 32>}, {transform_indices = @transform_1, window_bounds = array<i64: 32, 32>}, {transform_indices = @transform_2, window_bounds = array<i64: 1, 32>}, {transform_indices = @transform_3, window_bounds = array<i64: 10, 32>}, {transform_indices = @transform_4, window_bounds = array<i64: 10, 32>}]} {
    %c0_i32 = arith.constant 0 : i32
    %0 = arith.cmpi eq, %arg2, %c0_i32 : i32
    %1 = arith.extui %0 : i1 to i32
    %c0_i32_0 = arith.constant 0 : i32
    %2 = arith.cmpi ne, %1, %c0_i32_0 : i32
    scf.if %2 {
      %cst_10 = arith.constant 0.000000e+00 : f32
      %12 = vector.broadcast %cst_10 : f32 to vector<10x32xf32>
      %c0_11 = arith.constant 0 : index
      %c0_12 = arith.constant 0 : index
      %13 = vector.load %arg8[%c0_11, %c0_12] : memref<10x32xf32, #tpu.memory_space<vmem>>, vector<10x32xf32>
      tpu.vector_store %arg8[%c0_11, %c0_12], %12 {strides = array<i32>} : memref<10x32xf32, #tpu.memory_space<vmem>>, vector<10x32xf32>,
    } else {
    }
    %c0 = arith.constant 0 : index
    %c0_1 = arith.constant 0 : index
    %3 = vector.load %arg8[%c0, %c0_1] : memref<10x32xf32, #tpu.memory_space<vmem>>, vector<10x32xf32>
    %c0_2 = arith.constant 0 : index
    %c0_3 = arith.constant 0 : index
    %4 = vector.load %arg3[%c0_2, %c0_3] : memref<10x32xbf16, #tpu.memory_space<vmem>>, vector<10x32xbf16>
    %c0_4 = arith.constant 0 : index
    %c0_5 = arith.constant 0 : index
    %5 = vector.load %arg4[%c0_4, %c0_5] : memref<32x32xbf16, #tpu.memory_space<vmem>>, vector<32x32xbf16>
    %cst = arith.constant dense<0.000000e+00> : vector<10x32xf32>
    %6 = tpu.matmul %4, %5, %cst {dimension_numbers = #tpu.dot_dimension_numbers<[1], [0], [0], [1], [0, 0, 1, 1], [], []>} : vector<10x32xbf16>, vector<32x32xbf16>, vector<10x32xf32> -> vector<10x32xf32>
    %7 = arith.addf %3, %6 : vector<10x32xf32>
    %c0_6 = arith.constant 0 : index
    %c0_7 = arith.constant 0 : index
    %8 = vector.load %arg8[%c0_6, %c0_7] : memref<10x32xf32, #tpu.memory_space<vmem>>, vector<10x32xf32>
    tpu.vector_store %arg8[%c0_6, %c0_7], %7 {strides = array<i32>} : memref<10x32xf32, #tpu.memory_space<vmem>>, vector<10x32xf32>,
    %c0_i32_8 = arith.constant 0 : i32
    %9 = arith.cmpi eq, %arg2, %c0_i32_8 : i32
    %10 = arith.extui %9 : i1 to i32
    %c0_i32_9 = arith.constant 0 : i32
    %11 = arith.cmpi ne, %10, %c0_i32_9 : i32
    scf.if %11 {
      %c0_10 = arith.constant 0 : index
      %c0_11 = arith.constant 0 : index
      %12 = vector.load %arg8[%c0_10, %c0_11] : memref<10x32xf32, #tpu.memory_space<vmem>>, vector<10x32xf32>
      %c0_12 = arith.constant 0 : index
      %c0_13 = arith.constant 0 : index
      %13 = vector.load %arg5[%c0_12, %c0_13] : memref<1x32xf32, #tpu.memory_space<vmem>>, vector<1x32xf32>
      %14 = vector.broadcast %13 : vector<1x32xf32> to vector<10x32xf32>
      %15 = arith.addf %12, %14 : vector<10x32xf32>
      %c0_14 = arith.constant 0 : index
      %c0_15 = arith.constant 0 : index
      %16 = vector.load %arg6[%c0_14, %c0_15] : memref<10x32xbf16, #tpu.memory_space<vmem>>, vector<10x32xbf16>
      %17 = arith.extf %16 : vector<10x32xbf16> to vector<10x32xf32>
      %18 = arith.addf %15, %17 : vector<10x32xf32>
      %19 = arith.truncf %18 : vector<10x32xf32> to vector<10x32xbf16>
      %c0_16 = arith.constant 0 : index
      %c0_17 = arith.constant 0 : index
      %20 = vector.load %arg7[%c0_16, %c0_17] : memref<10x32xbf16, #tpu.memory_space<vmem>>, vector<10x32xbf16>
      tpu.vector_store %arg7[%c0_16, %c0_17], %19 {strides = array<i32>} : memref<10x32xbf16, #tpu.memory_space<vmem>>, vector<10x32xbf16>,
    } else {
    }
    return
  }
  func.func @transform_0(%arg0: i32, %arg1: i32, %arg2: i32) -> (i32, i32) {
    %c0_i32 = arith.constant 0 : i32
    return %arg0, %arg2 : i32, i32
  }
  func.func @transform_1(%arg0: i32, %arg1: i32, %arg2: i32) -> (i32, i32) {
    %c0_i32 = arith.constant 0 : i32
    return %arg2, %arg1 : i32, i32
  }
  func.func @transform_2(%arg0: i32, %arg1: i32, %arg2: i32) -> (i32, i32) {
    %c0_i32 = arith.constant 0 : i32
    %c0_i32_0 = arith.constant 0 : i32
    return %c0_i32, %arg1 : i32, i32
  }
  func.func @transform_3(%arg0: i32, %arg1: i32, %arg2: i32) -> (i32, i32) {
    %c0_i32 = arith.constant 0 : i32
    return %arg0, %arg1 : i32, i32
  }
  func.func @transform_4(%arg0: i32, %arg1: i32, %arg2: i32) -> (i32, i32) {
    %c0_i32 = arith.constant 0 : i32
    return %arg0, %arg1 : i32, i32
  }
}

module attributes {stable_mosaic.version = 11 : i64} {
  func.func @_linear_kernel(%arg0: i32, %arg1: i32, %arg2: i32, %arg3: memref<10x32xbf16, #tpu.memory_space<vmem>>, %arg4: memref<32x128xbf16, #tpu.memory_space<vmem>>, %arg5: memref<1x128xf32, #tpu.memory_space<vmem>>, %arg6: memref<10x128xbf16, #tpu.memory_space<vmem>>, %arg7: memref<10x128xf32, #tpu.memory_space<vmem>>) attributes {dimension_semantics = [#tpu.dimension_semantics<parallel>, #tpu.dimension_semantics<parallel>, #tpu.dimension_semantics<arbitrary>], iteration_bounds = array<i64: 1, 1, 1>, scalar_prefetch = 0 : i64, scratch_operands = 1 : i64, tpu.core_type = #tpu.core_type<tc>, window_params = [{transform_indices = @transform_0, window_bounds = array<i64: 10, 32>}, {transform_indices = @transform_1, window_bounds = array<i64: 32, 128>}, {transform_indices = @transform_2, window_bounds = array<i64: 1, 128>}, {transform_indices = @transform_3, window_bounds = array<i64: 10, 128>}]} {
    %c0_i32 = arith.constant 0 : i32
    %0 = arith.cmpi eq, %arg2, %c0_i32 : i32
    %1 = arith.extui %0 : i1 to i32
    %c0_i32_0 = arith.constant 0 : i32
    %2 = arith.cmpi ne, %1, %c0_i32_0 : i32
    scf.if %2 {
      %cst_10 = arith.constant 0.000000e+00 : f32
      %12 = vector.broadcast %cst_10 : f32 to vector<10x128xf32>
      %c0_11 = arith.constant 0 : index
      %c0_12 = arith.constant 0 : index
      %13 = vector.load %arg7[%c0_11, %c0_12] : memref<10x128xf32, #tpu.memory_space<vmem>>, vector<10x128xf32>
      tpu.vector_store %arg7[%c0_11, %c0_12], %12 {strides = array<i32>} : memref<10x128xf32, #tpu.memory_space<vmem>>, vector<10x128xf32>,
    } else {
    }
    %c0 = arith.constant 0 : index
    %c0_1 = arith.constant 0 : index
    %3 = vector.load %arg7[%c0, %c0_1] : memref<10x128xf32, #tpu.memory_space<vmem>>, vector<10x128xf32>
    %c0_2 = arith.constant 0 : index
    %c0_3 = arith.constant 0 : index
    %4 = vector.load %arg3[%c0_2, %c0_3] : memref<10x32xbf16, #tpu.memory_space<vmem>>, vector<10x32xbf16>
    %c0_4 = arith.constant 0 : index
    %c0_5 = arith.constant 0 : index
    %5 = vector.load %arg4[%c0_4, %c0_5] : memref<32x128xbf16, #tpu.memory_space<vmem>>, vector<32x128xbf16>
    %cst = arith.constant dense<0.000000e+00> : vector<10x128xf32>
    %6 = tpu.matmul %4, %5, %cst {dimension_numbers = #tpu.dot_dimension_numbers<[1], [0], [0], [1], [0, 0, 1, 1], [], []>} : vector<10x32xbf16>, vector<32x128xbf16>, vector<10x128xf32> -> vector<10x128xf32>
    %7 = arith.addf %3, %6 : vector<10x128xf32>
    %c0_6 = arith.constant 0 : index
    %c0_7 = arith.constant 0 : index
    %8 = vector.load %arg7[%c0_6, %c0_7] : memref<10x128xf32, #tpu.memory_space<vmem>>, vector<10x128xf32>
    tpu.vector_store %arg7[%c0_6, %c0_7], %7 {strides = array<i32>} : memref<10x128xf32, #tpu.memory_space<vmem>>, vector<10x128xf32>,
    %c0_i32_8 = arith.constant 0 : i32
    %9 = arith.cmpi eq, %arg2, %c0_i32_8 : i32
    %10 = arith.extui %9 : i1 to i32
    %c0_i32_9 = arith.constant 0 : i32
    %11 = arith.cmpi ne, %10, %c0_i32_9 : i32
    scf.if %11 {
      %c0_10 = arith.constant 0 : index
      %c0_11 = arith.constant 0 : index
      %12 = vector.load %arg7[%c0_10, %c0_11] : memref<10x128xf32, #tpu.memory_space<vmem>>, vector<10x128xf32>
      %c0_12 = arith.constant 0 : index
      %c0_13 = arith.constant 0 : index
      %13 = vector.load %arg5[%c0_12, %c0_13] : memref<1x128xf32, #tpu.memory_space<vmem>>, vector<1x128xf32>
      %14 = vector.broadcast %13 : vector<1x128xf32> to vector<10x128xf32>
      %15 = arith.addf %12, %14 : vector<10x128xf32>
      %16 = arith.mulf %15, %15 : vector<10x128xf32>
      %17 = arith.mulf %15, %16 : vector<10x128xf32>
      %cst_14 = arith.constant 4.471500e-02 : f32
      %18 = vector.broadcast %cst_14 : f32 to vector<10x128xf32>
      %19 = arith.mulf %18, %17 : vector<10x128xf32>
      %20 = arith.addf %15, %19 : vector<10x128xf32>
      %cst_15 = arith.constant 0.797884583 : f32
      %21 = vector.broadcast %cst_15 : f32 to vector<10x128xf32>
      %22 = arith.mulf %21, %20 : vector<10x128xf32>
      %23 = math.tanh %22 : vector<10x128xf32>
      %cst_16 = arith.constant 1.000000e+00 : f32
      %24 = vector.broadcast %cst_16 : f32 to vector<10x128xf32>
      %25 = arith.addf %24, %23 : vector<10x128xf32>
      %cst_17 = arith.constant 5.000000e-01 : f32
      %26 = vector.broadcast %cst_17 : f32 to vector<10x128xf32>
      %27 = arith.mulf %26, %25 : vector<10x128xf32>
      %28 = arith.mulf %15, %27 : vector<10x128xf32>
      %29 = arith.truncf %28 : vector<10x128xf32> to vector<10x128xbf16>
      %c0_18 = arith.constant 0 : index
      %c0_19 = arith.constant 0 : index
      %30 = vector.load %arg6[%c0_18, %c0_19] : memref<10x128xbf16, #tpu.memory_space<vmem>>, vector<10x128xbf16>
      tpu.vector_store %arg6[%c0_18, %c0_19], %29 {strides = array<i32>} : memref<10x128xbf16, #tpu.memory_space<vmem>>, vector<10x128xbf16>,
    } else {
    }
    return
  }
  func.func @transform_0(%arg0: i32, %arg1: i32, %arg2: i32) -> (i32, i32) {
    %c0_i32 = arith.constant 0 : i32
    return %arg0, %arg2 : i32, i32
  }
  func.func @transform_1(%arg0: i32, %arg1: i32, %arg2: i32) -> (i32, i32) {
    %c0_i32 = arith.constant 0 : i32
    return %arg2, %arg1 : i32, i32
  }
  func.func @transform_2(%arg0: i32, %arg1: i32, %arg2: i32) -> (i32, i32) {
    %c0_i32 = arith.constant 0 : i32
    %c0_i32_0 = arith.constant 0 : i32
    return %c0_i32, %arg1 : i32, i32
  }
  func.func @transform_3(%arg0: i32, %arg1: i32, %arg2: i32) -> (i32, i32) {
    %c0_i32 = arith.constant 0 : i32
    return %arg0, %arg1 : i32, i32
  }
}

module attributes {stable_mosaic.version = 11 : i64} {
  func.func @_linear_kernel(%arg0: i32, %arg1: i32, %arg2: i32, %arg3: memref<10x128xbf16, #tpu.memory_space<vmem>>, %arg4: memref<128x32xbf16, #tpu.memory_space<vmem>>, %arg5: memref<1x32xf32, #tpu.memory_space<vmem>>, %arg6: memref<10x32xbf16, #tpu.memory_space<vmem>>, %arg7: memref<10x32xbf16, #tpu.memory_space<vmem>>, %arg8: memref<10x32xf32, #tpu.memory_space<vmem>>) attributes {dimension_semantics = [#tpu.dimension_semantics<parallel>, #tpu.dimension_semantics<parallel>, #tpu.dimension_semantics<arbitrary>], iteration_bounds = array<i64: 1, 1, 1>, scalar_prefetch = 0 : i64, scratch_operands = 1 : i64, tpu.core_type = #tpu.core_type<tc>, window_params = [{transform_indices = @transform_0, window_bounds = array<i64: 10, 128>}, {transform_indices = @transform_1, window_bounds = array<i64: 128, 32>}, {transform_indices = @transform_2, window_bounds = array<i64: 1, 32>}, {transform_indices = @transform_3, window_bounds = array<i64: 10, 32>}, {transform_indices = @transform_4, window_bounds = array<i64: 10, 32>}]} {
    %c0_i32 = arith.constant 0 : i32
    %0 = arith.cmpi eq, %arg2, %c0_i32 : i32
    %1 = arith.extui %0 : i1 to i32
    %c0_i32_0 = arith.constant 0 : i32
    %2 = arith.cmpi ne, %1, %c0_i32_0 : i32
    scf.if %2 {
      %cst_10 = arith.constant 0.000000e+00 : f32
      %12 = vector.broadcast %cst_10 : f32 to vector<10x32xf32>
      %c0_11 = arith.constant 0 : index
      %c0_12 = arith.constant 0 : index
      %13 = vector.load %arg8[%c0_11, %c0_12] : memref<10x32xf32, #tpu.memory_space<vmem>>, vector<10x32xf32>
      tpu.vector_store %arg8[%c0_11, %c0_12], %12 {strides = array<i32>} : memref<10x32xf32, #tpu.memory_space<vmem>>, vector<10x32xf32>,
    } else {
    }
    %c0 = arith.constant 0 : index
    %c0_1 = arith.constant 0 : index
    %3 = vector.load %arg8[%c0, %c0_1] : memref<10x32xf32, #tpu.memory_space<vmem>>, vector<10x32xf32>
    %c0_2 = arith.constant 0 : index
    %c0_3 = arith.constant 0 : index
    %4 = vector.load %arg3[%c0_2, %c0_3] : memref<10x128xbf16, #tpu.memory_space<vmem>>, vector<10x128xbf16>
    %c0_4 = arith.constant 0 : index
    %c0_5 = arith.constant 0 : index
    %5 = vector.load %arg4[%c0_4, %c0_5] : memref<128x32xbf16, #tpu.memory_space<vmem>>, vector<128x32xbf16>
    %cst = arith.constant dense<0.000000e+00> : vector<10x32xf32>
    %6 = tpu.matmul %4, %5, %cst {dimension_numbers = #tpu.dot_dimension_numbers<[1], [0], [0], [1], [0, 0, 1, 1], [], []>} : vector<10x128xbf16>, vector<128x32xbf16>, vector<10x32xf32> -> vector<10x32xf32>
    %7 = arith.addf %3, %6 : vector<10x32xf32>
    %c0_6 = arith.constant 0 : index
    %c0_7 = arith.constant 0 : index
    %8 = vector.load %arg8[%c0_6, %c0_7] : memref<10x32xf32, #tpu.memory_space<vmem>>, vector<10x32xf32>
    tpu.vector_store %arg8[%c0_6, %c0_7], %7 {strides = array<i32>} : memref<10x32xf32, #tpu.memory_space<vmem>>, vector<10x32xf32>,
    %c0_i32_8 = arith.constant 0 : i32
    %9 = arith.cmpi eq, %arg2, %c0_i32_8 : i32
    %10 = arith.extui %9 : i1 to i32
    %c0_i32_9 = arith.constant 0 : i32
    %11 = arith.cmpi ne, %10, %c0_i32_9 : i32
    scf.if %11 {
      %c0_10 = arith.constant 0 : index
      %c0_11 = arith.constant 0 : index
      %12 = vector.load %arg8[%c0_10, %c0_11] : memref<10x32xf32, #tpu.memory_space<vmem>>, vector<10x32xf32>
      %c0_12 = arith.constant 0 : index
      %c0_13 = arith.constant 0 : index
      %13 = vector.load %arg5[%c0_12, %c0_13] : memref<1x32xf32, #tpu.memory_space<vmem>>, vector<1x32xf32>
      %14 = vector.broadcast %13 : vector<1x32xf32> to vector<10x32xf32>
      %15 = arith.addf %12, %14 : vector<10x32xf32>
      %c0_14 = arith.constant 0 : index
      %c0_15 = arith.constant 0 : index
      %16 = vector.load %arg6[%c0_14, %c0_15] : memref<10x32xbf16, #tpu.memory_space<vmem>>, vector<10x32xbf16>
      %17 = arith.extf %16 : vector<10x32xbf16> to vector<10x32xf32>
      %18 = arith.addf %15, %17 : vector<10x32xf32>
      %19 = arith.truncf %18 : vector<10x32xf32> to vector<10x32xbf16>
      %c0_16 = arith.constant 0 : index
      %c0_17 = arith.constant 0 : index
      %20 = vector.load %arg7[%c0_16, %c0_17] : memref<10x32xbf16, #tpu.memory_space<vmem>>, vector<10x32xbf16>
      tpu.vector_store %arg7[%c0_16, %c0_17], %19 {strides = array<i32>} : memref<10x32xbf16, #tpu.memory_space<vmem>>, vector<10x32xbf16>,
    } else {
    }
    return
  }
  func.func @transform_0(%arg0: i32, %arg1: i32, %arg2: i32) -> (i32, i32) {
    %c0_i32 = arith.constant 0 : i32
    return %arg0, %arg2 : i32, i32
  }
  func.func @transform_1(%arg0: i32, %arg1: i32, %arg2: i32) -> (i32, i32) {
    %c0_i32 = arith.constant 0 : i32
    return %arg2, %arg1 : i32, i32
  }
  func.func @transform_2(%arg0: i32, %arg1: i32, %arg2: i32) -> (i32, i32) {
    %c0_i32 = arith.constant 0 : i32
    %c0_i32_0 = arith.constant 0 : i32
    return %c0_i32, %arg1 : i32, i32
  }
  func.func @transform_3(%arg0: i32, %arg1: i32, %arg2: i32) -> (i32, i32) {
    %c0_i32 = arith.constant 0 : i32
    return %arg0, %arg1 : i32, i32
  }
  func.func @transform_4(%arg0: i32, %arg1: i32, %arg2: i32) -> (i32, i32) {
    %c0_i32 = arith.constant 0 : i32
    return %arg0, %arg1 : i32, i32
  }
}

module attributes {stable_mosaic.version = 11 : i64} {
  func.func @_linear_kernel(%arg0: i32, %arg1: i32, %arg2: i32, %arg3: memref<10x32xbf16, #tpu.memory_space<vmem>>, %arg4: memref<32x64xbf16, #tpu.memory_space<vmem>>, %arg5: memref<1x64xf32, #tpu.memory_space<vmem>>, %arg6: memref<10x64xbf16, #tpu.memory_space<vmem>>, %arg7: memref<10x64xf32, #tpu.memory_space<vmem>>) attributes {dimension_semantics = [#tpu.dimension_semantics<parallel>, #tpu.dimension_semantics<parallel>, #tpu.dimension_semantics<arbitrary>], iteration_bounds = array<i64: 1, 1, 1>, scalar_prefetch = 0 : i64, scratch_operands = 1 : i64, tpu.core_type = #tpu.core_type<tc>, window_params = [{transform_indices = @transform_0, window_bounds = array<i64: 10, 32>}, {transform_indices = @transform_1, window_bounds = array<i64: 32, 64>}, {transform_indices = @transform_2, window_bounds = array<i64: 1, 64>}, {transform_indices = @transform_3, window_bounds = array<i64: 10, 64>}]} {
    %c0_i32 = arith.constant 0 : i32
    %0 = arith.cmpi eq, %arg2, %c0_i32 : i32
    %1 = arith.extui %0 : i1 to i32
    %c0_i32_0 = arith.constant 0 : i32
    %2 = arith.cmpi ne, %1, %c0_i32_0 : i32
    scf.if %2 {
      %cst_10 = arith.constant 0.000000e+00 : f32
      %12 = vector.broadcast %cst_10 : f32 to vector<10x64xf32>
      %c0_11 = arith.constant 0 : index
      %c0_12 = arith.constant 0 : index
      %13 = vector.load %arg7[%c0_11, %c0_12] : memref<10x64xf32, #tpu.memory_space<vmem>>, vector<10x64xf32>
      tpu.vector_store %arg7[%c0_11, %c0_12], %12 {strides = array<i32>} : memref<10x64xf32, #tpu.memory_space<vmem>>, vector<10x64xf32>,
    } else {
    }
    %c0 = arith.constant 0 : index
    %c0_1 = arith.constant 0 : index
    %3 = vector.load %arg7[%c0, %c0_1] : memref<10x64xf32, #tpu.memory_space<vmem>>, vector<10x64xf32>
    %c0_2 = arith.constant 0 : index
    %c0_3 = arith.constant 0 : index
    %4 = vector.load %arg3[%c0_2, %c0_3] : memref<10x32xbf16, #tpu.memory_space<vmem>>, vector<10x32xbf16>
    %c0_4 = arith.constant 0 : index
    %c0_5 = arith.constant 0 : index
    %5 = vector.load %arg4[%c0_4, %c0_5] : memref<32x64xbf16, #tpu.memory_space<vmem>>, vector<32x64xbf16>
    %cst = arith.constant dense<0.000000e+00> : vector<10x64xf32>
    %6 = tpu.matmul %4, %5, %cst {dimension_numbers = #tpu.dot_dimension_numbers<[1], [0], [0], [1], [0, 0, 1, 1], [], []>} : vector<10x32xbf16>, vector<32x64xbf16>, vector<10x64xf32> -> vector<10x64xf32>
    %7 = arith.addf %3, %6 : vector<10x64xf32>
    %c0_6 = arith.constant 0 : index
    %c0_7 = arith.constant 0 : index
    %8 = vector.load %arg7[%c0_6, %c0_7] : memref<10x64xf32, #tpu.memory_space<vmem>>, vector<10x64xf32>
    tpu.vector_store %arg7[%c0_6, %c0_7], %7 {strides = array<i32>} : memref<10x64xf32, #tpu.memory_space<vmem>>, vector<10x64xf32>,
    %c0_i32_8 = arith.constant 0 : i32
    %9 = arith.cmpi eq, %arg2, %c0_i32_8 : i32
    %10 = arith.extui %9 : i1 to i32
    %c0_i32_9 = arith.constant 0 : i32
    %11 = arith.cmpi ne, %10, %c0_i32_9 : i32
    scf.if %11 {
      %c0_10 = arith.constant 0 : index
      %c0_11 = arith.constant 0 : index
      %12 = vector.load %arg7[%c0_10, %c0_11] : memref<10x64xf32, #tpu.memory_space<vmem>>, vector<10x64xf32>
      %c0_12 = arith.constant 0 : index
      %c0_13 = arith.constant 0 : index
      %13 = vector.load %arg5[%c0_12, %c0_13] : memref<1x64xf32, #tpu.memory_space<vmem>>, vector<1x64xf32>
      %14 = vector.broadcast %13 : vector<1x64xf32> to vector<10x64xf32>
      %15 = arith.addf %12, %14 : vector<10x64xf32>
      %16 = arith.truncf %15 : vector<10x64xf32> to vector<10x64xbf16>
      %c0_14 = arith.constant 0 : index
      %c0_15 = arith.constant 0 : index
      %17 = vector.load %arg6[%c0_14, %c0_15] : memref<10x64xbf16, #tpu.memory_space<vmem>>, vector<10x64xbf16>
      tpu.vector_store %arg6[%c0_14, %c0_15], %16 {strides = array<i32>} : memref<10x64xbf16, #tpu.memory_space<vmem>>, vector<10x64xbf16>,
    } else {
    }
    return
  }
  func.func @transform_0(%arg0: i32, %arg1: i32, %arg2: i32) -> (i32, i32) {
    %c0_i32 = arith.constant 0 : i32
    return %arg0, %arg2 : i32, i32
  }
  func.func @transform_1(%arg0: i32, %arg1: i32, %arg2: i32) -> (i32, i32) {
    %c0_i32 = arith.constant 0 : i32
    return %arg2, %arg1 : i32, i32
  }
  func.func @transform_2(%arg0: i32, %arg1: i32, %arg2: i32) -> (i32, i32) {
    %c0_i32 = arith.constant 0 : i32
    %c0_i32_0 = arith.constant 0 : i32
    return %c0_i32, %arg1 : i32, i32
  }
  func.func @transform_3(%arg0: i32, %arg1: i32, %arg2: i32) -> (i32, i32) {
    %c0_i32 = arith.constant 0 : i32
    return %arg0, %arg1 : i32, i32
  }
}

module attributes {stable_mosaic.version = 11 : i64} {
  func.func @_linear_kernel(%arg0: i32, %arg1: i32, %arg2: i32, %arg3: memref<16x32xbf16, #tpu.memory_space<vmem>>, %arg4: memref<32x96xbf16, #tpu.memory_space<vmem>>, %arg5: memref<1x96xf32, #tpu.memory_space<vmem>>, %arg6: memref<16x96xbf16, #tpu.memory_space<vmem>>, %arg7: memref<16x96xf32, #tpu.memory_space<vmem>>) attributes {dimension_semantics = [#tpu.dimension_semantics<parallel>, #tpu.dimension_semantics<parallel>, #tpu.dimension_semantics<arbitrary>], iteration_bounds = array<i64: 1, 1, 1>, scalar_prefetch = 0 : i64, scratch_operands = 1 : i64, tpu.core_type = #tpu.core_type<tc>, window_params = [{transform_indices = @transform_0, window_bounds = array<i64: 16, 32>}, {transform_indices = @transform_1, window_bounds = array<i64: 32, 96>}, {transform_indices = @transform_2, window_bounds = array<i64: 1, 96>}, {transform_indices = @transform_3, window_bounds = array<i64: 16, 96>}]} {
    %c0_i32 = arith.constant 0 : i32
    %0 = arith.cmpi eq, %arg2, %c0_i32 : i32
    %1 = arith.extui %0 : i1 to i32
    %c0_i32_0 = arith.constant 0 : i32
    %2 = arith.cmpi ne, %1, %c0_i32_0 : i32
    scf.if %2 {
      %cst_10 = arith.constant 0.000000e+00 : f32
      %12 = vector.broadcast %cst_10 : f32 to vector<16x96xf32>
      %c0_11 = arith.constant 0 : index
      %c0_12 = arith.constant 0 : index
      %13 = vector.load %arg7[%c0_11, %c0_12] : memref<16x96xf32, #tpu.memory_space<vmem>>, vector<16x96xf32>
      tpu.vector_store %arg7[%c0_11, %c0_12], %12 {strides = array<i32>} : memref<16x96xf32, #tpu.memory_space<vmem>>, vector<16x96xf32>,
    } else {
    }
    %c0 = arith.constant 0 : index
    %c0_1 = arith.constant 0 : index
    %3 = vector.load %arg7[%c0, %c0_1] : memref<16x96xf32, #tpu.memory_space<vmem>>, vector<16x96xf32>
    %c0_2 = arith.constant 0 : index
    %c0_3 = arith.constant 0 : index
    %4 = vector.load %arg3[%c0_2, %c0_3] : memref<16x32xbf16, #tpu.memory_space<vmem>>, vector<16x32xbf16>
    %c0_4 = arith.constant 0 : index
    %c0_5 = arith.constant 0 : index
    %5 = vector.load %arg4[%c0_4, %c0_5] : memref<32x96xbf16, #tpu.memory_space<vmem>>, vector<32x96xbf16>
    %cst = arith.constant dense<0.000000e+00> : vector<16x96xf32>
    %6 = tpu.matmul %4, %5, %cst {dimension_numbers = #tpu.dot_dimension_numbers<[1], [0], [0], [1], [0, 0, 1, 1], [], []>} : vector<16x32xbf16>, vector<32x96xbf16>, vector<16x96xf32> -> vector<16x96xf32>
    %7 = arith.addf %3, %6 : vector<16x96xf32>
    %c0_6 = arith.constant 0 : index
    %c0_7 = arith.constant 0 : index
    %8 = vector.load %arg7[%c0_6, %c0_7] : memref<16x96xf32, #tpu.memory_space<vmem>>, vector<16x96xf32>
    tpu.vector_store %arg7[%c0_6, %c0_7], %7 {strides = array<i32>} : memref<16x96xf32, #tpu.memory_space<vmem>>, vector<16x96xf32>,
    %c0_i32_8 = arith.constant 0 : i32
    %9 = arith.cmpi eq, %arg2, %c0_i32_8 : i32
    %10 = arith.extui %9 : i1 to i32
    %c0_i32_9 = arith.constant 0 : i32
    %11 = arith.cmpi ne, %10, %c0_i32_9 : i32
    scf.if %11 {
      %c0_10 = arith.constant 0 : index
      %c0_11 = arith.constant 0 : index
      %12 = vector.load %arg7[%c0_10, %c0_11] : memref<16x96xf32, #tpu.memory_space<vmem>>, vector<16x96xf32>
      %c0_12 = arith.constant 0 : index
      %c0_13 = arith.constant 0 : index
      %13 = vector.load %arg5[%c0_12, %c0_13] : memref<1x96xf32, #tpu.memory_space<vmem>>, vector<1x96xf32>
      %14 = vector.broadcast %13 : vector<1x96xf32> to vector<16x96xf32>
      %15 = arith.addf %12, %14 : vector<16x96xf32>
      %16 = arith.truncf %15 : vector<16x96xf32> to vector<16x96xbf16>
      %c0_14 = arith.constant 0 : index
      %c0_15 = arith.constant 0 : index
      %17 = vector.load %arg6[%c0_14, %c0_15] : memref<16x96xbf16, #tpu.memory_space<vmem>>, vector<16x96xbf16>
      tpu.vector_store %arg6[%c0_14, %c0_15], %16 {strides = array<i32>} : memref<16x96xbf16, #tpu.memory_space<vmem>>, vector<16x96xbf16>,
    } else {
    }
    return
  }
  func.func @transform_0(%arg0: i32, %arg1: i32, %arg2: i32) -> (i32, i32) {
    %c0_i32 = arith.constant 0 : i32
    return %arg0, %arg2 : i32, i32
  }
  func.func @transform_1(%arg0: i32, %arg1: i32, %arg2: i32) -> (i32, i32) {
    %c0_i32 = arith.constant 0 : i32
    return %arg2, %arg1 : i32, i32
  }
  func.func @transform_2(%arg0: i32, %arg1: i32, %arg2: i32) -> (i32, i32) {
    %c0_i32 = arith.constant 0 : i32
    %c0_i32_0 = arith.constant 0 : i32
    return %c0_i32, %arg1 : i32, i32
  }
  func.func @transform_3(%arg0: i32, %arg1: i32, %arg2: i32) -> (i32, i32) {
    %c0_i32 = arith.constant 0 : i32
    return %arg0, %arg1 : i32, i32
  }
}

module attributes {stable_mosaic.version = 11 : i64} {
  func.func @_layernorm_kernel(%arg0: i32, %arg1: memref<16x32xbf16, #tpu.memory_space<vmem>>, %arg2: memref<1x32xf32, #tpu.memory_space<vmem>>, %arg3: memref<1x32xf32, #tpu.memory_space<vmem>>, %arg4: memref<16x32xbf16, #tpu.memory_space<vmem>>) attributes {dimension_semantics = [#tpu.dimension_semantics<parallel>], iteration_bounds = array<i64: 1>, scalar_prefetch = 0 : i64, scratch_operands = 0 : i64, tpu.core_type = #tpu.core_type<tc>, window_params = [{transform_indices = @transform_0, window_bounds = array<i64: 16, 32>}, {pipeline_mode = #tpu.pipeline_mode<synchronous>, transform_indices = @transform_1, window_bounds = array<i64: 1, 32>}, {pipeline_mode = #tpu.pipeline_mode<synchronous>, transform_indices = @transform_2, window_bounds = array<i64: 1, 32>}, {transform_indices = @transform_3, window_bounds = array<i64: 16, 32>}]} {
    %c0 = arith.constant 0 : index
    %c0_0 = arith.constant 0 : index
    %0 = vector.load %arg1[%c0, %c0_0] : memref<16x32xbf16, #tpu.memory_space<vmem>>, vector<16x32xbf16>
    %1 = arith.extf %0 : vector<16x32xbf16> to vector<16x32xf32>
    %cst = arith.constant dense<0.000000e+00> : vector<16xf32>
    %2 = vector.multi_reduction <add>, %1, %cst [1] : vector<16x32xf32> to vector<16xf32>
    %3 = vector.shape_cast %2 : vector<16xf32> to vector<16x1xf32>
    %cst_1 = arith.constant 3.200000e+01 : f32
    %4 = vector.broadcast %cst_1 : f32 to vector<16x1xf32>
    %5 = arith.divf %3, %4 : vector<16x1xf32>
    %6 = vector.broadcast %5 : vector<16x1xf32> to vector<16x32xf32>
    %7 = arith.subf %1, %6 : vector<16x32xf32>
    %8 = arith.mulf %7, %7 : vector<16x32xf32>
    %cst_2 = arith.constant dense<0.000000e+00> : vector<16xf32>
    %9 = vector.multi_reduction <add>, %8, %cst_2 [1] : vector<16x32xf32> to vector<16xf32>
    %10 = vector.shape_cast %9 : vector<16xf32> to vector<16x1xf32>
    %cst_3 = arith.constant 3.200000e+01 : f32
    %11 = vector.broadcast %cst_3 : f32 to vector<16x1xf32>
    %12 = arith.divf %10, %11 : vector<16x1xf32>
    %cst_4 = arith.constant 9.99999996E-13 : f32
    %13 = vector.broadcast %cst_4 : f32 to vector<16x1xf32>
    %14 = arith.addf %12, %13 : vector<16x1xf32>
    %15 = math.rsqrt %14 : vector<16x1xf32>
    %16 = vector.broadcast %15 : vector<16x1xf32> to vector<16x32xf32>
    %17 = arith.mulf %7, %16 : vector<16x32xf32>
    %c0_5 = arith.constant 0 : index
    %c0_6 = arith.constant 0 : index
    %18 = vector.load %arg2[%c0_5, %c0_6] : memref<1x32xf32, #tpu.memory_space<vmem>>, vector<1x32xf32>
    %19 = vector.broadcast %18 : vector<1x32xf32> to vector<16x32xf32>
    %20 = arith.mulf %17, %19 : vector<16x32xf32>
    %c0_7 = arith.constant 0 : index
    %c0_8 = arith.constant 0 : index
    %21 = vector.load %arg3[%c0_7, %c0_8] : memref<1x32xf32, #tpu.memory_space<vmem>>, vector<1x32xf32>
    %22 = vector.broadcast %21 : vector<1x32xf32> to vector<16x32xf32>
    %23 = arith.addf %20, %22 : vector<16x32xf32>
    %24 = arith.truncf %23 : vector<16x32xf32> to vector<16x32xbf16>
    %c0_9 = arith.constant 0 : index
    %c0_10 = arith.constant 0 : index
    %25 = vector.load %arg4[%c0_9, %c0_10] : memref<16x32xbf16, #tpu.memory_space<vmem>>, vector<16x32xbf16>
    tpu.vector_store %arg4[%c0_9, %c0_10], %24 {strides = array<i32>} : memref<16x32xbf16, #tpu.memory_space<vmem>>, vector<16x32xbf16>,
    return
  }
  func.func @transform_0(%arg0: i32) -> (i32, i32) {
    %c0_i32 = arith.constant 0 : i32
    %c0_i32_0 = arith.constant 0 : i32
    return %arg0, %c0_i32 : i32, i32
  }
  func.func @transform_1(%arg0: i32) -> (i32, i32) {
    %c0_i32 = arith.constant 0 : i32
    %c0_i32_0 = arith.constant 0 : i32
    %c0_i32_1 = arith.constant 0 : i32
    return %c0_i32, %c0_i32_0 : i32, i32
  }
  func.func @transform_2(%arg0: i32) -> (i32, i32) {
    %c0_i32 = arith.constant 0 : i32
    %c0_i32_0 = arith.constant 0 : i32
    %c0_i32_1 = arith.constant 0 : i32
    return %c0_i32, %c0_i32_0 : i32, i32
  }
  func.func @transform_3(%arg0: i32) -> (i32, i32) {
    %c0_i32 = arith.constant 0 : i32
    %c0_i32_0 = arith.constant 0 : i32
    return %arg0, %c0_i32 : i32, i32
  }
}

module attributes {stable_mosaic.version = 11 : i64} {
  func.func @_linear_kernel(%arg0: i32, %arg1: i32, %arg2: i32, %arg3: memref<16x32xbf16, #tpu.memory_space<vmem>>, %arg4: memref<32x32xbf16, #tpu.memory_space<vmem>>, %arg5: memref<1x32xf32, #tpu.memory_space<vmem>>, %arg6: memref<16x32xbf16, #tpu.memory_space<vmem>>, %arg7: memref<16x32xf32, #tpu.memory_space<vmem>>) attributes {dimension_semantics = [#tpu.dimension_semantics<parallel>, #tpu.dimension_semantics<parallel>, #tpu.dimension_semantics<arbitrary>], iteration_bounds = array<i64: 1, 1, 1>, scalar_prefetch = 0 : i64, scratch_operands = 1 : i64, tpu.core_type = #tpu.core_type<tc>, window_params = [{transform_indices = @transform_0, window_bounds = array<i64: 16, 32>}, {transform_indices = @transform_1, window_bounds = array<i64: 32, 32>}, {transform_indices = @transform_2, window_bounds = array<i64: 1, 32>}, {transform_indices = @transform_3, window_bounds = array<i64: 16, 32>}]} {
    %c0_i32 = arith.constant 0 : i32
    %0 = arith.cmpi eq, %arg2, %c0_i32 : i32
    %1 = arith.extui %0 : i1 to i32
    %c0_i32_0 = arith.constant 0 : i32
    %2 = arith.cmpi ne, %1, %c0_i32_0 : i32
    scf.if %2 {
      %cst_10 = arith.constant 0.000000e+00 : f32
      %12 = vector.broadcast %cst_10 : f32 to vector<16x32xf32>
      %c0_11 = arith.constant 0 : index
      %c0_12 = arith.constant 0 : index
      %13 = vector.load %arg7[%c0_11, %c0_12] : memref<16x32xf32, #tpu.memory_space<vmem>>, vector<16x32xf32>
      tpu.vector_store %arg7[%c0_11, %c0_12], %12 {strides = array<i32>} : memref<16x32xf32, #tpu.memory_space<vmem>>, vector<16x32xf32>,
    } else {
    }
    %c0 = arith.constant 0 : index
    %c0_1 = arith.constant 0 : index
    %3 = vector.load %arg7[%c0, %c0_1] : memref<16x32xf32, #tpu.memory_space<vmem>>, vector<16x32xf32>
    %c0_2 = arith.constant 0 : index
    %c0_3 = arith.constant 0 : index
    %4 = vector.load %arg3[%c0_2, %c0_3] : memref<16x32xbf16, #tpu.memory_space<vmem>>, vector<16x32xbf16>
    %c0_4 = arith.constant 0 : index
    %c0_5 = arith.constant 0 : index
    %5 = vector.load %arg4[%c0_4, %c0_5] : memref<32x32xbf16, #tpu.memory_space<vmem>>, vector<32x32xbf16>
    %cst = arith.constant dense<0.000000e+00> : vector<16x32xf32>
    %6 = tpu.matmul %4, %5, %cst {dimension_numbers = #tpu.dot_dimension_numbers<[1], [0], [0], [1], [0, 0, 1, 1], [], []>} : vector<16x32xbf16>, vector<32x32xbf16>, vector<16x32xf32> -> vector<16x32xf32>
    %7 = arith.addf %3, %6 : vector<16x32xf32>
    %c0_6 = arith.constant 0 : index
    %c0_7 = arith.constant 0 : index
    %8 = vector.load %arg7[%c0_6, %c0_7] : memref<16x32xf32, #tpu.memory_space<vmem>>, vector<16x32xf32>
    tpu.vector_store %arg7[%c0_6, %c0_7], %7 {strides = array<i32>} : memref<16x32xf32, #tpu.memory_space<vmem>>, vector<16x32xf32>,
    %c0_i32_8 = arith.constant 0 : i32
    %9 = arith.cmpi eq, %arg2, %c0_i32_8 : i32
    %10 = arith.extui %9 : i1 to i32
    %c0_i32_9 = arith.constant 0 : i32
    %11 = arith.cmpi ne, %10, %c0_i32_9 : i32
    scf.if %11 {
      %c0_10 = arith.constant 0 : index
      %c0_11 = arith.constant 0 : index
      %12 = vector.load %arg7[%c0_10, %c0_11] : memref<16x32xf32, #tpu.memory_space<vmem>>, vector<16x32xf32>
      %c0_12 = arith.constant 0 : index
      %c0_13 = arith.constant 0 : index
      %13 = vector.load %arg5[%c0_12, %c0_13] : memref<1x32xf32, #tpu.memory_space<vmem>>, vector<1x32xf32>
      %14 = vector.broadcast %13 : vector<1x32xf32> to vector<16x32xf32>
      %15 = arith.addf %12, %14 : vector<16x32xf32>
      %16 = arith.truncf %15 : vector<16x32xf32> to vector<16x32xbf16>
      %c0_14 = arith.constant 0 : index
      %c0_15 = arith.constant 0 : index
      %17 = vector.load %arg6[%c0_14, %c0_15] : memref<16x32xbf16, #tpu.memory_space<vmem>>, vector<16x32xbf16>
      tpu.vector_store %arg6[%c0_14, %c0_15], %16 {strides = array<i32>} : memref<16x32xbf16, #tpu.memory_space<vmem>>, vector<16x32xbf16>,
    } else {
    }
    return
  }
  func.func @transform_0(%arg0: i32, %arg1: i32, %arg2: i32) -> (i32, i32) {
    %c0_i32 = arith.constant 0 : i32
    return %arg0, %arg2 : i32, i32
  }
  func.func @transform_1(%arg0: i32, %arg1: i32, %arg2: i32) -> (i32, i32) {
    %c0_i32 = arith.constant 0 : i32
    return %arg2, %arg1 : i32, i32
  }
  func.func @transform_2(%arg0: i32, %arg1: i32, %arg2: i32) -> (i32, i32) {
    %c0_i32 = arith.constant 0 : i32
    %c0_i32_0 = arith.constant 0 : i32
    return %c0_i32, %arg1 : i32, i32
  }
  func.func @transform_3(%arg0: i32, %arg1: i32, %arg2: i32) -> (i32, i32) {
    %c0_i32 = arith.constant 0 : i32
    return %arg0, %arg1 : i32, i32
  }
}

module attributes {stable_mosaic.version = 11 : i64} {
  func.func @_mha_kernel(%arg0: i32, %arg1: memref<1x8x32xbf16, #tpu.memory_space<vmem>>, %arg2: memref<1x8x32xbf16, #tpu.memory_space<vmem>>, %arg3: memref<1x8x32xbf16, #tpu.memory_space<vmem>>, %arg4: memref<1x1x8xf32, #tpu.memory_space<vmem>>, %arg5: memref<1x8x32xbf16, #tpu.memory_space<vmem>>) attributes {dimension_semantics = [#tpu.dimension_semantics<parallel>], iteration_bounds = array<i64: 2>, scalar_prefetch = 0 : i64, scratch_operands = 0 : i64, tpu.core_type = #tpu.core_type<tc>, window_params = [{transform_indices = @transform_0, window_bounds = array<i64: 1, 8, 32>}, {transform_indices = @transform_1, window_bounds = array<i64: 1, 8, 32>}, {transform_indices = @transform_2, window_bounds = array<i64: 1, 8, 32>}, {transform_indices = @transform_3, window_bounds = array<i64: 1, 1, 8>}, {transform_indices = @transform_4, window_bounds = array<i64: 1, 8, 32>}]} {
    %c0 = arith.constant 0 : index
    %c0_0 = arith.constant 0 : index
    %c0_1 = arith.constant 0 : index
    %0 = vector.load %arg4[%c0, %c0_0, %c0_1] : memref<1x1x8xf32, #tpu.memory_space<vmem>>, vector<1x1x8xf32>
    %1 = vector.shape_cast %0 : vector<1x1x8xf32> to vector<1x8xf32>
    %c0_2 = arith.constant 0 : index
    %c0_3 = arith.constant 0 : index
    %c0_4 = arith.constant 0 : index
    %2 = vector.load %arg1[%c0_2, %c0_3, %c0_4] : memref<1x8x32xbf16, #tpu.memory_space<vmem>>, vector<1x8x32xbf16>
    %3 = vector.shape_cast %2 : vector<1x8x32xbf16> to vector<8x32xbf16>
    %cst = arith.constant 3.535160e-01 : bf16
    %4 = vector.broadcast %cst : bf16 to vector<8x32xbf16>
    %5 = arith.mulf %3, %4 : vector<8x32xbf16>
    %c0_5 = arith.constant 0 : index
    %c0_6 = arith.constant 0 : index
    %c0_7 = arith.constant 0 : index
    %6 = vector.load %arg2[%c0_5, %c0_6, %c0_7] : memref<1x8x32xbf16, #tpu.memory_space<vmem>>, vector<1x8x32xbf16>
    %7 = vector.shape_cast %6 : vector<1x8x32xbf16> to vector<8x32xbf16>
    %c0_8 = arith.constant 0 : index
    %c0_9 = arith.constant 0 : index
    %c0_10 = arith.constant 0 : index
    %8 = vector.load %arg3[%c0_8, %c0_9, %c0_10] : memref<1x8x32xbf16, #tpu.memory_space<vmem>>, vector<1x8x32xbf16>
    %9 = vector.shape_cast %8 : vector<1x8x32xbf16> to vector<8x32xbf16>
    %10 = vector.extract_strided_slice %5 {offsets = [0, 0], sizes = [8, 8], strides = [1, 1]} : vector<8x32xbf16> to vector<8x8xbf16>
    %11 = vector.extract_strided_slice %7 {offsets = [0, 0], sizes = [8, 8], strides = [1, 1]} : vector<8x32xbf16> to vector<8x8xbf16>
    %12 = vector.extract_strided_slice %9 {offsets = [0, 0], sizes = [8, 8], strides = [1, 1]} : vector<8x32xbf16> to vector<8x8xbf16>
    %cst_11 = arith.constant dense<0.000000e+00> : vector<8x8xf32>
    %13 = tpu.matmul %10, %11, %cst_11 {dimension_numbers = #tpu.dot_dimension_numbers<[1], [1], [0], [0], [0, 0, 1, 0], [], []>} : vector<8x8xbf16>, vector<8x8xbf16>, vector<8x8xf32> -> vector<8x8xf32>
    %14 = vector.broadcast %1 : vector<1x8xf32> to vector<8x8xf32>
    %15 = arith.addf %13, %14 : vector<8x8xf32>
    %cst_12 = arith.constant dense<0xFF800000> : vector<8xf32>
    %16 = vector.multi_reduction <maximumf>, %15, %cst_12 [1] : vector<8x8xf32> to vector<8xf32>
    %17 = vector.shape_cast %16 : vector<8xf32> to vector<8x1xf32>
    %18 = vector.broadcast %17 : vector<8x1xf32> to vector<8x8xf32>
    %19 = arith.subf %15, %18 : vector<8x8xf32>
    %20 = math.exp %19 : vector<8x8xf32>
    %cst_13 = arith.constant dense<0.000000e+00> : vector<8xf32>
    %21 = vector.multi_reduction <add>, %20, %cst_13 [1] : vector<8x8xf32> to vector<8xf32>
    %22 = vector.shape_cast %21 : vector<8xf32> to vector<8x1xf32>
    %23 = tpu.reciprocal %22 {approx = true} : vector<8x1xf32> -> vector<8x1xf32>
    %24 = vector.broadcast %23 : vector<8x1xf32> to vector<8x8xf32>
    %25 = arith.mulf %20, %24 : vector<8x8xf32>
    %26 = arith.truncf %25 : vector<8x8xf32> to vector<8x8xbf16>
    %cst_14 = arith.constant dense<0.000000e+00> : vector<8x8xf32>
    %27 = tpu.matmul %26, %12, %cst_14 {dimension_numbers = #tpu.dot_dimension_numbers<[1], [0], [0], [1], [0, 0, 1, 1], [], []>} : vector<8x8xbf16>, vector<8x8xbf16>, vector<8x8xf32> -> vector<8x8xf32>
    %28 = vector.extract_strided_slice %5 {offsets = [0, 8], sizes = [8, 8], strides = [1, 1]} : vector<8x32xbf16> to vector<8x8xbf16>
    %29 = vector.extract_strided_slice %7 {offsets = [0, 8], sizes = [8, 8], strides = [1, 1]} : vector<8x32xbf16> to vector<8x8xbf16>
    %30 = vector.extract_strided_slice %9 {offsets = [0, 8], sizes = [8, 8], strides = [1, 1]} : vector<8x32xbf16> to vector<8x8xbf16>
    %cst_15 = arith.constant dense<0.000000e+00> : vector<8x8xf32>
    %31 = tpu.matmul %28, %29, %cst_15 {dimension_numbers = #tpu.dot_dimension_numbers<[1], [1], [0], [0], [0, 0, 1, 0], [], []>} : vector<8x8xbf16>, vector<8x8xbf16>, vector<8x8xf32> -> vector<8x8xf32>
    %32 = vector.broadcast %1 : vector<1x8xf32> to vector<8x8xf32>
    %33 = arith.addf %31, %32 : vector<8x8xf32>
    %cst_16 = arith.constant dense<0xFF800000> : vector<8xf32>
    %34 = vector.multi_reduction <maximumf>, %33, %cst_16 [1] : vector<8x8xf32> to vector<8xf32>
    %35 = vector.shape_cast %34 : vector<8xf32> to vector<8x1xf32>
    %36 = vector.broadcast %35 : vector<8x1xf32> to vector<8x8xf32>
    %37 = arith.subf %33, %36 : vector<8x8xf32>
    %38 = math.exp %37 : vector<8x8xf32>
    %cst_17 = arith.constant dense<0.000000e+00> : vector<8xf32>
    %39 = vector.multi_reduction <add>, %38, %cst_17 [1] : vector<8x8xf32> to vector<8xf32>
    %40 = vector.shape_cast %39 : vector<8xf32> to vector<8x1xf32>
    %41 = tpu.reciprocal %40 {approx = true} : vector<8x1xf32> -> vector<8x1xf32>
    %42 = vector.broadcast %41 : vector<8x1xf32> to vector<8x8xf32>
    %43 = arith.mulf %38, %42 : vector<8x8xf32>
    %44 = arith.truncf %43 : vector<8x8xf32> to vector<8x8xbf16>
    %cst_18 = arith.constant dense<0.000000e+00> : vector<8x8xf32>
    %45 = tpu.matmul %44, %30, %cst_18 {dimension_numbers = #tpu.dot_dimension_numbers<[1], [0], [0], [1], [0, 0, 1, 1], [], []>} : vector<8x8xbf16>, vector<8x8xbf16>, vector<8x8xf32> -> vector<8x8xf32>
    %46 = vector.extract_strided_slice %5 {offsets = [0, 16], sizes = [8, 8], strides = [1, 1]} : vector<8x32xbf16> to vector<8x8xbf16>
    %47 = vector.extract_strided_slice %7 {offsets = [0, 16], sizes = [8, 8], strides = [1, 1]} : vector<8x32xbf16> to vector<8x8xbf16>
    %48 = vector.extract_strided_slice %9 {offsets = [0, 16], sizes = [8, 8], strides = [1, 1]} : vector<8x32xbf16> to vector<8x8xbf16>
    %cst_19 = arith.constant dense<0.000000e+00> : vector<8x8xf32>
    %49 = tpu.matmul %46, %47, %cst_19 {dimension_numbers = #tpu.dot_dimension_numbers<[1], [1], [0], [0], [0, 0, 1, 0], [], []>} : vector<8x8xbf16>, vector<8x8xbf16>, vector<8x8xf32> -> vector<8x8xf32>
    %50 = vector.broadcast %1 : vector<1x8xf32> to vector<8x8xf32>
    %51 = arith.addf %49, %50 : vector<8x8xf32>
    %cst_20 = arith.constant dense<0xFF800000> : vector<8xf32>
    %52 = vector.multi_reduction <maximumf>, %51, %cst_20 [1] : vector<8x8xf32> to vector<8xf32>
    %53 = vector.shape_cast %52 : vector<8xf32> to vector<8x1xf32>
    %54 = vector.broadcast %53 : vector<8x1xf32> to vector<8x8xf32>
    %55 = arith.subf %51, %54 : vector<8x8xf32>
    %56 = math.exp %55 : vector<8x8xf32>
    %cst_21 = arith.constant dense<0.000000e+00> : vector<8xf32>
    %57 = vector.multi_reduction <add>, %56, %cst_21 [1] : vector<8x8xf32> to vector<8xf32>
    %58 = vector.shape_cast %57 : vector<8xf32> to vector<8x1xf32>
    %59 = tpu.reciprocal %58 {approx = true} : vector<8x1xf32> -> vector<8x1xf32>
    %60 = vector.broadcast %59 : vector<8x1xf32> to vector<8x8xf32>
    %61 = arith.mulf %56, %60 : vector<8x8xf32>
    %62 = arith.truncf %61 : vector<8x8xf32> to vector<8x8xbf16>
    %cst_22 = arith.constant dense<0.000000e+00> : vector<8x8xf32>
    %63 = tpu.matmul %62, %48, %cst_22 {dimension_numbers = #tpu.dot_dimension_numbers<[1], [0], [0], [1], [0, 0, 1, 1], [], []>} : vector<8x8xbf16>, vector<8x8xbf16>, vector<8x8xf32> -> vector<8x8xf32>
    %64 = vector.extract_strided_slice %5 {offsets = [0, 24], sizes = [8, 8], strides = [1, 1]} : vector<8x32xbf16> to vector<8x8xbf16>
    %65 = vector.extract_strided_slice %7 {offsets = [0, 24], sizes = [8, 8], strides = [1, 1]} : vector<8x32xbf16> to vector<8x8xbf16>
    %66 = vector.extract_strided_slice %9 {offsets = [0, 24], sizes = [8, 8], strides = [1, 1]} : vector<8x32xbf16> to vector<8x8xbf16>
    %cst_23 = arith.constant dense<0.000000e+00> : vector<8x8xf32>
    %67 = tpu.matmul %64, %65, %cst_23 {dimension_numbers = #tpu.dot_dimension_numbers<[1], [1], [0], [0], [0, 0, 1, 0], [], []>} : vector<8x8xbf16>, vector<8x8xbf16>, vector<8x8xf32> -> vector<8x8xf32>
    %68 = vector.broadcast %1 : vector<1x8xf32> to vector<8x8xf32>
    %69 = arith.addf %67, %68 : vector<8x8xf32>
    %cst_24 = arith.constant dense<0xFF800000> : vector<8xf32>
    %70 = vector.multi_reduction <maximumf>, %69, %cst_24 [1] : vector<8x8xf32> to vector<8xf32>
    %71 = vector.shape_cast %70 : vector<8xf32> to vector<8x1xf32>
    %72 = vector.broadcast %71 : vector<8x1xf32> to vector<8x8xf32>
    %73 = arith.subf %69, %72 : vector<8x8xf32>
    %74 = math.exp %73 : vector<8x8xf32>
    %cst_25 = arith.constant dense<0.000000e+00> : vector<8xf32>
    %75 = vector.multi_reduction <add>, %74, %cst_25 [1] : vector<8x8xf32> to vector<8xf32>
    %76 = vector.shape_cast %75 : vector<8xf32> to vector<8x1xf32>
    %77 = tpu.reciprocal %76 {approx = true} : vector<8x1xf32> -> vector<8x1xf32>
    %78 = vector.broadcast %77 : vector<8x1xf32> to vector<8x8xf32>
    %79 = arith.mulf %74, %78 : vector<8x8xf32>
    %80 = arith.truncf %79 : vector<8x8xf32> to vector<8x8xbf16>
    %cst_26 = arith.constant dense<0.000000e+00> : vector<8x8xf32>
    %81 = tpu.matmul %80, %66, %cst_26 {dimension_numbers = #tpu.dot_dimension_numbers<[1], [0], [0], [1], [0, 0, 1, 1], [], []>} : vector<8x8xbf16>, vector<8x8xbf16>, vector<8x8xf32> -> vector<8x8xf32>
    %82 = tpu.concatenate %27, %45, %63, %81 in 1 : vector<8x8xf32>, vector<8x8xf32>, vector<8x8xf32>, vector<8x8xf32> -> vector<8x32xf32>
    %83 = arith.truncf %82 : vector<8x32xf32> to vector<8x32xbf16>
    %c0_27 = arith.constant 0 : index
    %c0_28 = arith.constant 0 : index
    %c0_29 = arith.constant 0 : index
    %84 = vector.load %arg5[%c0_27, %c0_28, %c0_29] : memref<1x8x32xbf16, #tpu.memory_space<vmem>>, vector<1x8x32xbf16>
    %85 = vector.shape_cast %84 : vector<1x8x32xbf16> to vector<8x32xbf16>
    %86 = vector.shape_cast %83 : vector<8x32xbf16> to vector<1x8x32xbf16>
    tpu.vector_store %arg5[%c0_27, %c0_28, %c0_29], %86 {strides = array<i32>} : memref<1x8x32xbf16, #tpu.memory_space<vmem>>, vector<1x8x32xbf16>,
    return
  }
  func.func @transform_0(%arg0: i32) -> (i32, i32, i32) {
    %c0_i32 = arith.constant 0 : i32
    %c0_i32_0 = arith.constant 0 : i32
    %c0_i32_1 = arith.constant 0 : i32
    return %arg0, %c0_i32, %c0_i32_0 : i32, i32, i32
  }
  func.func @transform_1(%arg0: i32) -> (i32, i32, i32) {
    %c0_i32 = arith.constant 0 : i32
    %c0_i32_0 = arith.constant 0 : i32
    %c0_i32_1 = arith.constant 0 : i32
    return %arg0, %c0_i32, %c0_i32_0 : i32, i32, i32
  }
  func.func @transform_2(%arg0: i32) -> (i32, i32, i32) {
    %c0_i32 = arith.constant 0 : i32
    %c0_i32_0 = arith.constant 0 : i32
    %c0_i32_1 = arith.constant 0 : i32
    return %arg0, %c0_i32, %c0_i32_0 : i32, i32, i32
  }
  func.func @transform_3(%arg0: i32) -> (i32, i32, i32) {
    %c0_i32 = arith.constant 0 : i32
    %c0_i32_0 = arith.constant 0 : i32
    %c0_i32_1 = arith.constant 0 : i32
    return %arg0, %c0_i32, %c0_i32_0 : i32, i32, i32
  }
  func.func @transform_4(%arg0: i32) -> (i32, i32, i32) {
    %c0_i32 = arith.constant 0 : i32
    %c0_i32_0 = arith.constant 0 : i32
    %c0_i32_1 = arith.constant 0 : i32
    return %arg0, %c0_i32, %c0_i32_0 : i32, i32, i32
  }
}

module attributes {stable_mosaic.version = 11 : i64} {
  func.func @_mha_kernel(%arg0: i32, %arg1: memref<1x8x32xbf16, #tpu.memory_space<vmem>>, %arg2: memref<1x5x32xbf16, #tpu.memory_space<vmem>>, %arg3: memref<1x5x32xbf16, #tpu.memory_space<vmem>>, %arg4: memref<1x8x32xbf16, #tpu.memory_space<vmem>>) attributes {dimension_semantics = [#tpu.dimension_semantics<parallel>], iteration_bounds = array<i64: 2>, scalar_prefetch = 0 : i64, scratch_operands = 0 : i64, tpu.core_type = #tpu.core_type<tc>, window_params = [{transform_indices = @transform_0, window_bounds = array<i64: 1, 8, 32>}, {transform_indices = @transform_1, window_bounds = array<i64: 1, 5, 32>}, {transform_indices = @transform_2, window_bounds = array<i64: 1, 5, 32>}, {transform_indices = @transform_3, window_bounds = array<i64: 1, 8, 32>}]} {
    %c0 = arith.constant 0 : index
    %c0_0 = arith.constant 0 : index
    %c0_1 = arith.constant 0 : index
    %0 = vector.load %arg1[%c0, %c0_0, %c0_1] : memref<1x8x32xbf16, #tpu.memory_space<vmem>>, vector<1x8x32xbf16>
    %1 = vector.shape_cast %0 : vector<1x8x32xbf16> to vector<8x32xbf16>
    %cst = arith.constant 3.535160e-01 : bf16
    %2 = vector.broadcast %cst : bf16 to vector<8x32xbf16>
    %3 = arith.mulf %1, %2 : vector<8x32xbf16>
    %c0_2 = arith.constant 0 : index
    %c0_3 = arith.constant 0 : index
    %c0_4 = arith.constant 0 : index
    %4 = vector.load %arg2[%c0_2, %c0_3, %c0_4] : memref<1x5x32xbf16, #tpu.memory_space<vmem>>, vector<1x5x32xbf16>
    %5 = vector.shape_cast %4 : vector<1x5x32xbf16> to vector<5x32xbf16>
    %c0_5 = arith.constant 0 : index
    %c0_6 = arith.constant 0 : index
    %c0_7 = arith.constant 0 : index
    %6 = vector.load %arg3[%c0_5, %c0_6, %c0_7] : memref<1x5x32xbf16, #tpu.memory_space<vmem>>, vector<1x5x32xbf16>
    %7 = vector.shape_cast %6 : vector<1x5x32xbf16> to vector<5x32xbf16>
    %8 = vector.extract_strided_slice %3 {offsets = [0, 0], sizes = [8, 8], strides = [1, 1]} : vector<8x32xbf16> to vector<8x8xbf16>
    %9 = vector.extract_strided_slice %5 {offsets = [0, 0], sizes = [5, 8], strides = [1, 1]} : vector<5x32xbf16> to vector<5x8xbf16>
    %10 = vector.extract_strided_slice %7 {offsets = [0, 0], sizes = [5, 8], strides = [1, 1]} : vector<5x32xbf16> to vector<5x8xbf16>
    %cst_8 = arith.constant dense<0.000000e+00> : vector<8x5xf32>
    %11 = tpu.matmul %8, %9, %cst_8 {dimension_numbers = #tpu.dot_dimension_numbers<[1], [1], [0], [0], [0, 0, 1, 0], [], []>} : vector<8x8xbf16>, vector<5x8xbf16>, vector<8x5xf32> -> vector<8x5xf32>
    %cst_9 = arith.constant dense<0xFF800000> : vector<8xf32>
    %12 = vector.multi_reduction <maximumf>, %11, %cst_9 [1] : vector<8x5xf32> to vector<8xf32>
    %13 = vector.shape_cast %12 : vector<8xf32> to vector<8x1xf32>
    %14 = vector.broadcast %13 : vector<8x1xf32> to vector<8x5xf32>
    %15 = arith.subf %11, %14 : vector<8x5xf32>
    %16 = math.exp %15 : vector<8x5xf32>
    %cst_10 = arith.constant dense<0.000000e+00> : vector<8xf32>
    %17 = vector.multi_reduction <add>, %16, %cst_10 [1] : vector<8x5xf32> to vector<8xf32>
    %18 = vector.shape_cast %17 : vector<8xf32> to vector<8x1xf32>
    %19 = tpu.reciprocal %18 {approx = true} : vector<8x1xf32> -> vector<8x1xf32>
    %20 = vector.broadcast %19 : vector<8x1xf32> to vector<8x5xf32>
    %21 = arith.mulf %16, %20 : vector<8x5xf32>
    %22 = arith.truncf %21 : vector<8x5xf32> to vector<8x5xbf16>
    %cst_11 = arith.constant dense<0.000000e+00> : vector<8x8xf32>
    %23 = tpu.matmul %22, %10, %cst_11 {dimension_numbers = #tpu.dot_dimension_numbers<[1], [0], [0], [1], [0, 0, 1, 1], [], []>} : vector<8x5xbf16>, vector<5x8xbf16>, vector<8x8xf32> -> vector<8x8xf32>
    %24 = vector.extract_strided_slice %3 {offsets = [0, 8], sizes = [8, 8], strides = [1, 1]} : vector<8x32xbf16> to vector<8x8xbf16>
    %25 = vector.extract_strided_slice %5 {offsets = [0, 8], sizes = [5, 8], strides = [1, 1]} : vector<5x32xbf16> to vector<5x8xbf16>
    %26 = vector.extract_strided_slice %7 {offsets = [0, 8], sizes = [5, 8], strides = [1, 1]} : vector<5x32xbf16> to vector<5x8xbf16>
    %cst_12 = arith.constant dense<0.000000e+00> : vector<8x5xf32>
    %27 = tpu.matmul %24, %25, %cst_12 {dimension_numbers = #tpu.dot_dimension_numbers<[1], [1], [0], [0], [0, 0, 1, 0], [], []>} : vector<8x8xbf16>, vector<5x8xbf16>, vector<8x5xf32> -> vector<8x5xf32>
    %cst_13 = arith.constant dense<0xFF800000> : vector<8xf32>
    %28 = vector.multi_reduction <maximumf>, %27, %cst_13 [1] : vector<8x5xf32> to vector<8xf32>
    %29 = vector.shape_cast %28 : vector<8xf32> to vector<8x1xf32>
    %30 = vector.broadcast %29 : vector<8x1xf32> to vector<8x5xf32>
    %31 = arith.subf %27, %30 : vector<8x5xf32>
    %32 = math.exp %31 : vector<8x5xf32>
    %cst_14 = arith.constant dense<0.000000e+00> : vector<8xf32>
    %33 = vector.multi_reduction <add>, %32, %cst_14 [1] : vector<8x5xf32> to vector<8xf32>
    %34 = vector.shape_cast %33 : vector<8xf32> to vector<8x1xf32>
    %35 = tpu.reciprocal %34 {approx = true} : vector<8x1xf32> -> vector<8x1xf32>
    %36 = vector.broadcast %35 : vector<8x1xf32> to vector<8x5xf32>
    %37 = arith.mulf %32, %36 : vector<8x5xf32>
    %38 = arith.truncf %37 : vector<8x5xf32> to vector<8x5xbf16>
    %cst_15 = arith.constant dense<0.000000e+00> : vector<8x8xf32>
    %39 = tpu.matmul %38, %26, %cst_15 {dimension_numbers = #tpu.dot_dimension_numbers<[1], [0], [0], [1], [0, 0, 1, 1], [], []>} : vector<8x5xbf16>, vector<5x8xbf16>, vector<8x8xf32> -> vector<8x8xf32>
    %40 = vector.extract_strided_slice %3 {offsets = [0, 16], sizes = [8, 8], strides = [1, 1]} : vector<8x32xbf16> to vector<8x8xbf16>
    %41 = vector.extract_strided_slice %5 {offsets = [0, 16], sizes = [5, 8], strides = [1, 1]} : vector<5x32xbf16> to vector<5x8xbf16>
    %42 = vector.extract_strided_slice %7 {offsets = [0, 16], sizes = [5, 8], strides = [1, 1]} : vector<5x32xbf16> to vector<5x8xbf16>
    %cst_16 = arith.constant dense<0.000000e+00> : vector<8x5xf32>
    %43 = tpu.matmul %40, %41, %cst_16 {dimension_numbers = #tpu.dot_dimension_numbers<[1], [1], [0], [0], [0, 0, 1, 0], [], []>} : vector<8x8xbf16>, vector<5x8xbf16>, vector<8x5xf32> -> vector<8x5xf32>
    %cst_17 = arith.constant dense<0xFF800000> : vector<8xf32>
    %44 = vector.multi_reduction <maximumf>, %43, %cst_17 [1] : vector<8x5xf32> to vector<8xf32>
    %45 = vector.shape_cast %44 : vector<8xf32> to vector<8x1xf32>
    %46 = vector.broadcast %45 : vector<8x1xf32> to vector<8x5xf32>
    %47 = arith.subf %43, %46 : vector<8x5xf32>
    %48 = math.exp %47 : vector<8x5xf32>
    %cst_18 = arith.constant dense<0.000000e+00> : vector<8xf32>
    %49 = vector.multi_reduction <add>, %48, %cst_18 [1] : vector<8x5xf32> to vector<8xf32>
    %50 = vector.shape_cast %49 : vector<8xf32> to vector<8x1xf32>
    %51 = tpu.reciprocal %50 {approx = true} : vector<8x1xf32> -> vector<8x1xf32>
    %52 = vector.broadcast %51 : vector<8x1xf32> to vector<8x5xf32>
    %53 = arith.mulf %48, %52 : vector<8x5xf32>
    %54 = arith.truncf %53 : vector<8x5xf32> to vector<8x5xbf16>
    %cst_19 = arith.constant dense<0.000000e+00> : vector<8x8xf32>
    %55 = tpu.matmul %54, %42, %cst_19 {dimension_numbers = #tpu.dot_dimension_numbers<[1], [0], [0], [1], [0, 0, 1, 1], [], []>} : vector<8x5xbf16>, vector<5x8xbf16>, vector<8x8xf32> -> vector<8x8xf32>
    %56 = vector.extract_strided_slice %3 {offsets = [0, 24], sizes = [8, 8], strides = [1, 1]} : vector<8x32xbf16> to vector<8x8xbf16>
    %57 = vector.extract_strided_slice %5 {offsets = [0, 24], sizes = [5, 8], strides = [1, 1]} : vector<5x32xbf16> to vector<5x8xbf16>
    %58 = vector.extract_strided_slice %7 {offsets = [0, 24], sizes = [5, 8], strides = [1, 1]} : vector<5x32xbf16> to vector<5x8xbf16>
    %cst_20 = arith.constant dense<0.000000e+00> : vector<8x5xf32>
    %59 = tpu.matmul %56, %57, %cst_20 {dimension_numbers = #tpu.dot_dimension_numbers<[1], [1], [0], [0], [0, 0, 1, 0], [], []>} : vector<8x8xbf16>, vector<5x8xbf16>, vector<8x5xf32> -> vector<8x5xf32>
    %cst_21 = arith.constant dense<0xFF800000> : vector<8xf32>
    %60 = vector.multi_reduction <maximumf>, %59, %cst_21 [1] : vector<8x5xf32> to vector<8xf32>
    %61 = vector.shape_cast %60 : vector<8xf32> to vector<8x1xf32>
    %62 = vector.broadcast %61 : vector<8x1xf32> to vector<8x5xf32>
    %63 = arith.subf %59, %62 : vector<8x5xf32>
    %64 = math.exp %63 : vector<8x5xf32>
    %cst_22 = arith.constant dense<0.000000e+00> : vector<8xf32>
    %65 = vector.multi_reduction <add>, %64, %cst_22 [1] : vector<8x5xf32> to vector<8xf32>
    %66 = vector.shape_cast %65 : vector<8xf32> to vector<8x1xf32>
    %67 = tpu.reciprocal %66 {approx = true} : vector<8x1xf32> -> vector<8x1xf32>
    %68 = vector.broadcast %67 : vector<8x1xf32> to vector<8x5xf32>
    %69 = arith.mulf %64, %68 : vector<8x5xf32>
    %70 = arith.truncf %69 : vector<8x5xf32> to vector<8x5xbf16>
    %cst_23 = arith.constant dense<0.000000e+00> : vector<8x8xf32>
    %71 = tpu.matmul %70, %58, %cst_23 {dimension_numbers = #tpu.dot_dimension_numbers<[1], [0], [0], [1], [0, 0, 1, 1], [], []>} : vector<8x5xbf16>, vector<5x8xbf16>, vector<8x8xf32> -> vector<8x8xf32>
    %72 = tpu.concatenate %23, %39, %55, %71 in 1 : vector<8x8xf32>, vector<8x8xf32>, vector<8x8xf32>, vector<8x8xf32> -> vector<8x32xf32>
    %73 = arith.truncf %72 : vector<8x32xf32> to vector<8x32xbf16>
    %c0_24 = arith.constant 0 : index
    %c0_25 = arith.constant 0 : index
    %c0_26 = arith.constant 0 : index
    %74 = vector.load %arg4[%c0_24, %c0_25, %c0_26] : memref<1x8x32xbf16, #tpu.memory_space<vmem>>, vector<1x8x32xbf16>
    %75 = vector.shape_cast %74 : vector<1x8x32xbf16> to vector<8x32xbf16>
    %76 = vector.shape_cast %73 : vector<8x32xbf16> to vector<1x8x32xbf16>
    tpu.vector_store %arg4[%c0_24, %c0_25, %c0_26], %76 {strides = array<i32>} : memref<1x8x32xbf16, #tpu.memory_space<vmem>>, vector<1x8x32xbf16>,
    return
  }
  func.func @transform_0(%arg0: i32) -> (i32, i32, i32) {
    %c0_i32 = arith.constant 0 : i32
    %c0_i32_0 = arith.constant 0 : i32
    %c0_i32_1 = arith.constant 0 : i32
    return %arg0, %c0_i32, %c0_i32_0 : i32, i32, i32
  }
  func.func @transform_1(%arg0: i32) -> (i32, i32, i32) {
    %c0_i32 = arith.constant 0 : i32
    %c0_i32_0 = arith.constant 0 : i32
    %c0_i32_1 = arith.constant 0 : i32
    return %arg0, %c0_i32, %c0_i32_0 : i32, i32, i32
  }
  func.func @transform_2(%arg0: i32) -> (i32, i32, i32) {
    %c0_i32 = arith.constant 0 : i32
    %c0_i32_0 = arith.constant 0 : i32
    %c0_i32_1 = arith.constant 0 : i32
    return %arg0, %c0_i32, %c0_i32_0 : i32, i32, i32
  }
  func.func @transform_3(%arg0: i32) -> (i32, i32, i32) {
    %c0_i32 = arith.constant 0 : i32
    %c0_i32_0 = arith.constant 0 : i32
    %c0_i32_1 = arith.constant 0 : i32
    return %arg0, %c0_i32, %c0_i32_0 : i32, i32, i32
  }
}

module attributes {stable_mosaic.version = 11 : i64} {
  func.func @_layernorm_kernel(%arg0: i32, %arg1: memref<16x32xbf16, #tpu.memory_space<vmem>>, %arg2: memref<16x32xbf16, #tpu.memory_space<vmem>>, %arg3: memref<1x32xf32, #tpu.memory_space<vmem>>, %arg4: memref<1x32xf32, #tpu.memory_space<vmem>>, %arg5: memref<16x32xbf16, #tpu.memory_space<vmem>>) attributes {dimension_semantics = [#tpu.dimension_semantics<parallel>], iteration_bounds = array<i64: 1>, scalar_prefetch = 0 : i64, scratch_operands = 0 : i64, tpu.core_type = #tpu.core_type<tc>, window_params = [{transform_indices = @transform_0, window_bounds = array<i64: 16, 32>}, {transform_indices = @transform_1, window_bounds = array<i64: 16, 32>}, {pipeline_mode = #tpu.pipeline_mode<synchronous>, transform_indices = @transform_2, window_bounds = array<i64: 1, 32>}, {pipeline_mode = #tpu.pipeline_mode<synchronous>, transform_indices = @transform_3, window_bounds = array<i64: 1, 32>}, {transform_indices = @transform_4, window_bounds = array<i64: 16, 32>}]} {
    %c0 = arith.constant 0 : index
    %c0_0 = arith.constant 0 : index
    %0 = vector.load %arg1[%c0, %c0_0] : memref<16x32xbf16, #tpu.memory_space<vmem>>, vector<16x32xbf16>
    %1 = arith.extf %0 : vector<16x32xbf16> to vector<16x32xf32>
    %c0_1 = arith.constant 0 : index
    %c0_2 = arith.constant 0 : index
    %2 = vector.load %arg2[%c0_1, %c0_2] : memref<16x32xbf16, #tpu.memory_space<vmem>>, vector<16x32xbf16>
    %3 = arith.extf %2 : vector<16x32xbf16> to vector<16x32xf32>
    %4 = arith.addf %1, %3 : vector<16x32xf32>
    %cst = arith.constant dense<0.000000e+00> : vector<16xf32>
    %5 = vector.multi_reduction <add>, %4, %cst [1] : vector<16x32xf32> to vector<16xf32>
    %6 = vector.shape_cast %5 : vector<16xf32> to vector<16x1xf32>
    %cst_3 = arith.constant 3.200000e+01 : f32
    %7 = vector.broadcast %cst_3 : f32 to vector<16x1xf32>
    %8 = arith.divf %6, %7 : vector<16x1xf32>
    %9 = vector.broadcast %8 : vector<16x1xf32> to vector<16x32xf32>
    %10 = arith.subf %4, %9 : vector<16x32xf32>
    %11 = arith.mulf %10, %10 : vector<16x32xf32>
    %cst_4 = arith.constant dense<0.000000e+00> : vector<16xf32>
    %12 = vector.multi_reduction <add>, %11, %cst_4 [1] : vector<16x32xf32> to vector<16xf32>
    %13 = vector.shape_cast %12 : vector<16xf32> to vector<16x1xf32>
    %cst_5 = arith.constant 3.200000e+01 : f32
    %14 = vector.broadcast %cst_5 : f32 to vector<16x1xf32>
    %15 = arith.divf %13, %14 : vector<16x1xf32>
    %cst_6 = arith.constant 9.99999996E-13 : f32
    %16 = vector.broadcast %cst_6 : f32 to vector<16x1xf32>
    %17 = arith.addf %15, %16 : vector<16x1xf32>
    %18 = math.rsqrt %17 : vector<16x1xf32>
    %19 = vector.broadcast %18 : vector<16x1xf32> to vector<16x32xf32>
    %20 = arith.mulf %10, %19 : vector<16x32xf32>
    %c0_7 = arith.constant 0 : index
    %c0_8 = arith.constant 0 : index
    %21 = vector.load %arg3[%c0_7, %c0_8] : memref<1x32xf32, #tpu.memory_space<vmem>>, vector<1x32xf32>
    %22 = vector.broadcast %21 : vector<1x32xf32> to vector<16x32xf32>
    %23 = arith.mulf %20, %22 : vector<16x32xf32>
    %c0_9 = arith.constant 0 : index
    %c0_10 = arith.constant 0 : index
    %24 = vector.load %arg4[%c0_9, %c0_10] : memref<1x32xf32, #tpu.memory_space<vmem>>, vector<1x32xf32>
    %25 = vector.broadcast %24 : vector<1x32xf32> to vector<16x32xf32>
    %26 = arith.addf %23, %25 : vector<16x32xf32>
    %27 = arith.truncf %26 : vector<16x32xf32> to vector<16x32xbf16>
    %c0_11 = arith.constant 0 : index
    %c0_12 = arith.constant 0 : index
    %28 = vector.load %arg5[%c0_11, %c0_12] : memref<16x32xbf16, #tpu.memory_space<vmem>>, vector<16x32xbf16>
    tpu.vector_store %arg5[%c0_11, %c0_12], %27 {strides = array<i32>} : memref<16x32xbf16, #tpu.memory_space<vmem>>, vector<16x32xbf16>,
    return
  }
  func.func @transform_0(%arg0: i32) -> (i32, i32) {
    %c0_i32 = arith.constant 0 : i32
    %c0_i32_0 = arith.constant 0 : i32
    return %arg0, %c0_i32 : i32, i32
  }
  func.func @transform_1(%arg0: i32) -> (i32, i32) {
    %c0_i32 = arith.constant 0 : i32
    %c0_i32_0 = arith.constant 0 : i32
    return %arg0, %c0_i32 : i32, i32
  }
  func.func @transform_2(%arg0: i32) -> (i32, i32) {
    %c0_i32 = arith.constant 0 : i32
    %c0_i32_0 = arith.constant 0 : i32
    %c0_i32_1 = arith.constant 0 : i32
    return %c0_i32, %c0_i32_0 : i32, i32
  }
  func.func @transform_3(%arg0: i32) -> (i32, i32) {
    %c0_i32 = arith.constant 0 : i32
    %c0_i32_0 = arith.constant 0 : i32
    %c0_i32_1 = arith.constant 0 : i32
    return %c0_i32, %c0_i32_0 : i32, i32
  }
  func.func @transform_4(%arg0: i32) -> (i32, i32) {
    %c0_i32 = arith.constant 0 : i32
    %c0_i32_0 = arith.constant 0 : i32
    return %arg0, %c0_i32 : i32, i32
  }
}

module attributes {stable_mosaic.version = 11 : i64} {
  func.func @_linear_kernel(%arg0: i32, %arg1: i32, %arg2: i32, %arg3: memref<16x32xbf16, #tpu.memory_space<vmem>>, %arg4: memref<32x128xbf16, #tpu.memory_space<vmem>>, %arg5: memref<1x128xf32, #tpu.memory_space<vmem>>, %arg6: memref<16x128xbf16, #tpu.memory_space<vmem>>, %arg7: memref<16x128xf32, #tpu.memory_space<vmem>>) attributes {dimension_semantics = [#tpu.dimension_semantics<parallel>, #tpu.dimension_semantics<parallel>, #tpu.dimension_semantics<arbitrary>], iteration_bounds = array<i64: 1, 1, 1>, scalar_prefetch = 0 : i64, scratch_operands = 1 : i64, tpu.core_type = #tpu.core_type<tc>, window_params = [{transform_indices = @transform_0, window_bounds = array<i64: 16, 32>}, {transform_indices = @transform_1, window_bounds = array<i64: 32, 128>}, {transform_indices = @transform_2, window_bounds = array<i64: 1, 128>}, {transform_indices = @transform_3, window_bounds = array<i64: 16, 128>}]} {
    %c0_i32 = arith.constant 0 : i32
    %0 = arith.cmpi eq, %arg2, %c0_i32 : i32
    %1 = arith.extui %0 : i1 to i32
    %c0_i32_0 = arith.constant 0 : i32
    %2 = arith.cmpi ne, %1, %c0_i32_0 : i32
    scf.if %2 {
      %cst_10 = arith.constant 0.000000e+00 : f32
      %12 = vector.broadcast %cst_10 : f32 to vector<16x128xf32>
      %c0_11 = arith.constant 0 : index
      %c0_12 = arith.constant 0 : index
      %13 = vector.load %arg7[%c0_11, %c0_12] : memref<16x128xf32, #tpu.memory_space<vmem>>, vector<16x128xf32>
      tpu.vector_store %arg7[%c0_11, %c0_12], %12 {strides = array<i32>} : memref<16x128xf32, #tpu.memory_space<vmem>>, vector<16x128xf32>,
    } else {
    }
    %c0 = arith.constant 0 : index
    %c0_1 = arith.constant 0 : index
    %3 = vector.load %arg7[%c0, %c0_1] : memref<16x128xf32, #tpu.memory_space<vmem>>, vector<16x128xf32>
    %c0_2 = arith.constant 0 : index
    %c0_3 = arith.constant 0 : index
    %4 = vector.load %arg3[%c0_2, %c0_3] : memref<16x32xbf16, #tpu.memory_space<vmem>>, vector<16x32xbf16>
    %c0_4 = arith.constant 0 : index
    %c0_5 = arith.constant 0 : index
    %5 = vector.load %arg4[%c0_4, %c0_5] : memref<32x128xbf16, #tpu.memory_space<vmem>>, vector<32x128xbf16>
    %cst = arith.constant dense<0.000000e+00> : vector<16x128xf32>
    %6 = tpu.matmul %4, %5, %cst {dimension_numbers = #tpu.dot_dimension_numbers<[1], [0], [0], [1], [0, 0, 1, 1], [], []>} : vector<16x32xbf16>, vector<32x128xbf16>, vector<16x128xf32> -> vector<16x128xf32>
    %7 = arith.addf %3, %6 : vector<16x128xf32>
    %c0_6 = arith.constant 0 : index
    %c0_7 = arith.constant 0 : index
    %8 = vector.load %arg7[%c0_6, %c0_7] : memref<16x128xf32, #tpu.memory_space<vmem>>, vector<16x128xf32>
    tpu.vector_store %arg7[%c0_6, %c0_7], %7 {strides = array<i32>} : memref<16x128xf32, #tpu.memory_space<vmem>>, vector<16x128xf32>,
    %c0_i32_8 = arith.constant 0 : i32
    %9 = arith.cmpi eq, %arg2, %c0_i32_8 : i32
    %10 = arith.extui %9 : i1 to i32
    %c0_i32_9 = arith.constant 0 : i32
    %11 = arith.cmpi ne, %10, %c0_i32_9 : i32
    scf.if %11 {
      %c0_10 = arith.constant 0 : index
      %c0_11 = arith.constant 0 : index
      %12 = vector.load %arg7[%c0_10, %c0_11] : memref<16x128xf32, #tpu.memory_space<vmem>>, vector<16x128xf32>
      %c0_12 = arith.constant 0 : index
      %c0_13 = arith.constant 0 : index
      %13 = vector.load %arg5[%c0_12, %c0_13] : memref<1x128xf32, #tpu.memory_space<vmem>>, vector<1x128xf32>
      %14 = vector.broadcast %13 : vector<1x128xf32> to vector<16x128xf32>
      %15 = arith.addf %12, %14 : vector<16x128xf32>
      %16 = arith.mulf %15, %15 : vector<16x128xf32>
      %17 = arith.mulf %15, %16 : vector<16x128xf32>
      %cst_14 = arith.constant 4.471500e-02 : f32
      %18 = vector.broadcast %cst_14 : f32 to vector<16x128xf32>
      %19 = arith.mulf %18, %17 : vector<16x128xf32>
      %20 = arith.addf %15, %19 : vector<16x128xf32>
      %cst_15 = arith.constant 0.797884583 : f32
      %21 = vector.broadcast %cst_15 : f32 to vector<16x128xf32>
      %22 = arith.mulf %21, %20 : vector<16x128xf32>
      %23 = math.tanh %22 : vector<16x128xf32>
      %cst_16 = arith.constant 1.000000e+00 : f32
      %24 = vector.broadcast %cst_16 : f32 to vector<16x128xf32>
      %25 = arith.addf %24, %23 : vector<16x128xf32>
      %cst_17 = arith.constant 5.000000e-01 : f32
      %26 = vector.broadcast %cst_17 : f32 to vector<16x128xf32>
      %27 = arith.mulf %26, %25 : vector<16x128xf32>
      %28 = arith.mulf %15, %27 : vector<16x128xf32>
      %29 = arith.truncf %28 : vector<16x128xf32> to vector<16x128xbf16>
      %c0_18 = arith.constant 0 : index
      %c0_19 = arith.constant 0 : index
      %30 = vector.load %arg6[%c0_18, %c0_19] : memref<16x128xbf16, #tpu.memory_space<vmem>>, vector<16x128xbf16>
      tpu.vector_store %arg6[%c0_18, %c0_19], %29 {strides = array<i32>} : memref<16x128xbf16, #tpu.memory_space<vmem>>, vector<16x128xbf16>,
    } else {
    }
    return
  }
  func.func @transform_0(%arg0: i32, %arg1: i32, %arg2: i32) -> (i32, i32) {
    %c0_i32 = arith.constant 0 : i32
    return %arg0, %arg2 : i32, i32
  }
  func.func @transform_1(%arg0: i32, %arg1: i32, %arg2: i32) -> (i32, i32) {
    %c0_i32 = arith.constant 0 : i32
    return %arg2, %arg1 : i32, i32
  }
  func.func @transform_2(%arg0: i32, %arg1: i32, %arg2: i32) -> (i32, i32) {
    %c0_i32 = arith.constant 0 : i32
    %c0_i32_0 = arith.constant 0 : i32
    return %c0_i32, %arg1 : i32, i32
  }
  func.func @transform_3(%arg0: i32, %arg1: i32, %arg2: i32) -> (i32, i32) {
    %c0_i32 = arith.constant 0 : i32
    return %arg0, %arg1 : i32, i32
  }
}

module attributes {stable_mosaic.version = 11 : i64} {
  func.func @_linear_kernel(%arg0: i32, %arg1: i32, %arg2: i32, %arg3: memref<16x128xbf16, #tpu.memory_space<vmem>>, %arg4: memref<128x32xbf16, #tpu.memory_space<vmem>>, %arg5: memref<1x32xf32, #tpu.memory_space<vmem>>, %arg6: memref<16x32xbf16, #tpu.memory_space<vmem>>, %arg7: memref<16x32xf32, #tpu.memory_space<vmem>>) attributes {dimension_semantics = [#tpu.dimension_semantics<parallel>, #tpu.dimension_semantics<parallel>, #tpu.dimension_semantics<arbitrary>], iteration_bounds = array<i64: 1, 1, 1>, scalar_prefetch = 0 : i64, scratch_operands = 1 : i64, tpu.core_type = #tpu.core_type<tc>, window_params = [{transform_indices = @transform_0, window_bounds = array<i64: 16, 128>}, {transform_indices = @transform_1, window_bounds = array<i64: 128, 32>}, {transform_indices = @transform_2, window_bounds = array<i64: 1, 32>}, {transform_indices = @transform_3, window_bounds = array<i64: 16, 32>}]} {
    %c0_i32 = arith.constant 0 : i32
    %0 = arith.cmpi eq, %arg2, %c0_i32 : i32
    %1 = arith.extui %0 : i1 to i32
    %c0_i32_0 = arith.constant 0 : i32
    %2 = arith.cmpi ne, %1, %c0_i32_0 : i32
    scf.if %2 {
      %cst_10 = arith.constant 0.000000e+00 : f32
      %12 = vector.broadcast %cst_10 : f32 to vector<16x32xf32>
      %c0_11 = arith.constant 0 : index
      %c0_12 = arith.constant 0 : index
      %13 = vector.load %arg7[%c0_11, %c0_12] : memref<16x32xf32, #tpu.memory_space<vmem>>, vector<16x32xf32>
      tpu.vector_store %arg7[%c0_11, %c0_12], %12 {strides = array<i32>} : memref<16x32xf32, #tpu.memory_space<vmem>>, vector<16x32xf32>,
    } else {
    }
    %c0 = arith.constant 0 : index
    %c0_1 = arith.constant 0 : index
    %3 = vector.load %arg7[%c0, %c0_1] : memref<16x32xf32, #tpu.memory_space<vmem>>, vector<16x32xf32>
    %c0_2 = arith.constant 0 : index
    %c0_3 = arith.constant 0 : index
    %4 = vector.load %arg3[%c0_2, %c0_3] : memref<16x128xbf16, #tpu.memory_space<vmem>>, vector<16x128xbf16>
    %c0_4 = arith.constant 0 : index
    %c0_5 = arith.constant 0 : index
    %5 = vector.load %arg4[%c0_4, %c0_5] : memref<128x32xbf16, #tpu.memory_space<vmem>>, vector<128x32xbf16>
    %cst = arith.constant dense<0.000000e+00> : vector<16x32xf32>
    %6 = tpu.matmul %4, %5, %cst {dimension_numbers = #tpu.dot_dimension_numbers<[1], [0], [0], [1], [0, 0, 1, 1], [], []>} : vector<16x128xbf16>, vector<128x32xbf16>, vector<16x32xf32> -> vector<16x32xf32>
    %7 = arith.addf %3, %6 : vector<16x32xf32>
    %c0_6 = arith.constant 0 : index
    %c0_7 = arith.constant 0 : index
    %8 = vector.load %arg7[%c0_6, %c0_7] : memref<16x32xf32, #tpu.memory_space<vmem>>, vector<16x32xf32>
    tpu.vector_store %arg7[%c0_6, %c0_7], %7 {strides = array<i32>} : memref<16x32xf32, #tpu.memory_space<vmem>>, vector<16x32xf32>,
    %c0_i32_8 = arith.constant 0 : i32
    %9 = arith.cmpi eq, %arg2, %c0_i32_8 : i32
    %10 = arith.extui %9 : i1 to i32
    %c0_i32_9 = arith.constant 0 : i32
    %11 = arith.cmpi ne, %10, %c0_i32_9 : i32
    scf.if %11 {
      %c0_10 = arith.constant 0 : index
      %c0_11 = arith.constant 0 : index
      %12 = vector.load %arg7[%c0_10, %c0_11] : memref<16x32xf32, #tpu.memory_space<vmem>>, vector<16x32xf32>
      %c0_12 = arith.constant 0 : index
      %c0_13 = arith.constant 0 : index
      %13 = vector.load %arg5[%c0_12, %c0_13] : memref<1x32xf32, #tpu.memory_space<vmem>>, vector<1x32xf32>
      %14 = vector.broadcast %13 : vector<1x32xf32> to vector<16x32xf32>
      %15 = arith.addf %12, %14 : vector<16x32xf32>
      %16 = arith.truncf %15 : vector<16x32xf32> to vector<16x32xbf16>
      %c0_14 = arith.constant 0 : index
      %c0_15 = arith.constant 0 : index
      %17 = vector.load %arg6[%c0_14, %c0_15] : memref<16x32xbf16, #tpu.memory_space<vmem>>, vector<16x32xbf16>
      tpu.vector_store %arg6[%c0_14, %c0_15], %16 {strides = array<i32>} : memref<16x32xbf16, #tpu.memory_space<vmem>>, vector<16x32xbf16>,
    } else {
    }
    return
  }
  func.func @transform_0(%arg0: i32, %arg1: i32, %arg2: i32) -> (i32, i32) {
    %c0_i32 = arith.constant 0 : i32
    return %arg0, %arg2 : i32, i32
  }
  func.func @transform_1(%arg0: i32, %arg1: i32, %arg2: i32) -> (i32, i32) {
    %c0_i32 = arith.constant 0 : i32
    return %arg2, %arg1 : i32, i32
  }
  func.func @transform_2(%arg0: i32, %arg1: i32, %arg2: i32) -> (i32, i32) {
    %c0_i32 = arith.constant 0 : i32
    %c0_i32_0 = arith.constant 0 : i32
    return %c0_i32, %arg1 : i32, i32
  }
  func.func @transform_3(%arg0: i32, %arg1: i32, %arg2: i32) -> (i32, i32) {
    %c0_i32 = arith.constant 0 : i32
    return %arg0, %arg1 : i32, i32
  }
}

</mosaic_0001>

<bundles_post_ra>
// kernel: _lambda_.42
= control target key start
LH: loop header
LB: loop body
LE: loop exit
PB: predicated region body
PF: predicated region fallthrough
CT: control target
= control target key end

     0   :  { %vm18_vm0 = vcmask 261120   ;;  %vm22_vm1 = vcmask 254976   ;;  %vm73_vm2 = vcmask 257024   ;;  %vm75_vm3 = vcmask 253952   ;;  %s131_s0 = inlined_call_operand.vmem [shape: bf16[10,32], index: 0, kind: input, shape index: {}]   ;;  %s132_s1 = inlined_call_operand.vmem [shape: f32[1,32], index: 1, kind: input, shape index: {}]   ;;  %s133_s2 = inlined_call_operand.vmem [shape: f32[1,32], index: 2, kind: input, shape index: {}]   ;;  %s134_s3 = inlined_call_operand.vmem [shape: bf16[10,32], index: 3, kind: output, shape index: {}]  }
   0x1   :  { %v14_v0 = vld [vmem:[%s131_s0] sm:$0xf]  ;;  %v15_v1 = vld [vmem:[%s131_s0 + $0x4] sm:$0x1] }
   0x2   :  { %v16_v2 = vunpack.c.l.bf16 %v14_v0  ;;  %v17_v3 = vunpack.c.l.bf16 %v15_v1  ;;  %v81_v23 = vld [vmem:[%s132_s1] ss:$0 sm:$0xff] }
   0x3   :  { %v82_v25 = vld [vmem:[%s133_s2] ss:$0 sm:$0xff] }
   0x4   :  { %v19_v4 = vsel %vm18_vm0, %v16_v2, 0.0  ;;  %v23_v5 = vsel %vm22_vm1, %v17_v3, 0.0 }
   0x5   :  { %20 = vadd.xlane.f32.xlu0 %v19_v4 }
   0x9   :  { %24 = vadd.xlane.f32.xlu0 %v23_v5 }
  0x92   :  { %v21_v6 = vpop.xlane.xlu0 %20 }
  0x93   :  { %v27_v7 = vmul.f32 0.03125, %v21_v6 }
  0x95   :  { %v29_v8 = vsub.f32 %v16_v2, %v27_v7 }
  0x96   :  { %v25_v9 = vpop.xlane.xlu0 %24 }
  0x97   :  { %v28_v10 = vmul.f32 0.03125, %v25_v9  ;;  %v31_v11 = vmul.f32 %v29_v8, %v29_v8 }
  0x99   :  { %v30_v12 = vsub.f32 %v17_v3, %v28_v10  ;;  %v33_v13 = vsel %vm18_vm0, %v31_v11, 0.0 }
  0x9a   :  { %34 = vadd.xlane.f32.xlu1 %v33_v13 }
  0x9b   :  { %v32_v14 = vmul.f32 %v30_v12, %v30_v12 }
  0x9d   :  { %v36_v15 = vsel %vm22_vm1, %v32_v14, 0.0 }
  0x9e   :  { %37 = vadd.xlane.f32.xlu1 %v36_v15 }
 0x127   :  { %v35_v16 = vpop.xlane.xlu1 %34 }
 0x128   :  { %v39_v17 = vmul.f32 0.03125, %v35_v16 }
 0x12a   :  { %v41_v18 = vadd.f32 1e-06, %v39_v17 }
 0x12b   :  { %v38_v19 = vpop.xlane.xlu1 %37 }
 0x12c   :  { %87 = vrsqrt.f32 %v41_v18  ;;  %v40_v20 = vmul.f32 0.03125, %v38_v19 }
 0x12e   :  { %v42_v21 = vadd.f32 1e-06, %v40_v20 }
 0x130   :  { %89 = vrsqrt.f32 %v42_v21 }
 0x136   :  { %v88_v22 = vpop.eup %87 }
 0x137   :  { %v45_v24 = vmul.f32 %v88_v22, %v29_v8 }
 0x139   :  { %v54_v26 = vmul.f32 %v81_v23, %v45_v24 }
 0x13a   :  { %v90_v27 = vpop.eup %89 }
 0x13b   :  { %v63_v28 = vadd.f32 %v82_v25, %v54_v26  ;;  %v46_v29 = vmul.f32 %v90_v27, %v30_v12 }
 0x13d   :  { %v85_v30 = vpack.c.bf16 %v63_v28, %v63_v28  ;;  %v55_v31 = vmul.f32 %v81_v23, %v46_v29 }
 0x13f   :  { %74 = vst.msk [vmem:[%s134_s3] sm:$0xf] %vm73_vm2, %v85_v30  ;;  %v64_v32 = vadd.f32 %v82_v25, %v55_v31 }
 0x141   :  { %v86_v33 = vpack.c.bf16 %v64_v32, %v64_v32 }
 0x143   :  { %76 = vst.msk [vmem:[%s134_s3 + $0x4] sm:$0x1] %vm75_vm3, %v86_v33 }

// kernel: _lambda_.43
= control target key start
LH: loop header
LB: loop body
LE: loop exit
PB: predicated region body
PF: predicated region fallthrough
CT: control target
= control target key end

     0   :  { %vm19_vm0 = vcmask 785408   ;;  %v154_v0 = vmov 0.0   ;;  %vm155_vm1 = vmmov 0   ;;  %vm48_vm2 = vcmask 261120   ;;  %s196_s1 = inlined_call_operand.vmem [shape: bf16[32,96], index: 1, kind: input, shape index: {}]   ;;  %s197_s0 = inlined_call_operand.vmem [shape: bf16[10,32], index: 0, kind: input, shape index: {}]   ;;  %s198_s2 = inlined_call_operand.vmem [shape: f32[1,96], index: 2, kind: input, shape index: {}]   ;;  %s199_s3 = inlined_call_operand.vmem [shape: bf16[10,96], index: 3, kind: output, shape index: {}]  }
   0x1   :  { %141 = vmatprep.subr.bf16.mxu0 %v154_v0  ;;  %v151_v1 = vld [vmem:[%s196_s1] sm:$0xff]   ;;  %145 = vmatprep.mubr.msk.bf16.mxu0 %vm155_vm1, %v154_v0  ;;  %20 = vst.msk [vmem:[#allocation2] sm:$0xff] %vm19_vm0, %v154_v0  ;;  %v152_v2 = vld [vmem:[%s196_s1 + $0x8] sm:$0xff]   ;;  %vm21_vm3 = vcmask 779264   ;;  %vm121_vm4 = vcmask 781312   ;;  %vm123_vm5 = vcmask 778240  }
   0x2   :  { %142 = vmatpush3.bf16.msra.mxu0 %v151_v1  ;;  %v153_v3 = vld [vmem:[%s197_s0] sm:$0x1f]   ;;  %22 = vst.msk [vmem:[#allocation2 + $0x8] sm:$0x3] %vm21_vm3, %v154_v0 }
   0x3   :  { %143 = vmatprep.subr.bf16.mxu0 %v154_v0  ;;  %v133_v12 = vld [vmem:[%s198_s2] ss:$0 sm:$0xff] }
   0x6   :  { %144 = vmatpush3.bf16.msra.mxu0 %v152_v2 }
   0x8   :  { %v23_v4 = vld [vmem:[#allocation2] sm:$0xff] }
   0x9   :  { %146 = vmatmul.mubr.msk.bf16.vlgmr.msra.gmra.mrb[0].mxu0 %vm48_vm2, %v153_v3  ;;  %v24_v6 = vld [vmem:[#allocation2 + $0x8] sm:$0x3] }
  0xdc   :  { %v86_v5 = vpop.f32.mrb[0].mxu0 }
  0xdd   :  { %v93_v7 = vadd.f32 %v86_v5, %v23_v4  ;;  %v147_v8 = vpop.f32.mrb[1].mxu0 }
  0xde   :  { %v89_v9 = vpop.f32.mrb[2].mxu0 }
  0xdf   :  { %96 = vst.msk [vmem:[#allocation2] sm:$0xff] %vm19_vm0, %v93_v7  ;;  %v94_v10 = vadd.f32 %v89_v9, %v24_v6  ;;  %v148_v11 = vpop.f32.mrb[3].mxu0 }
  0xe1   :  { %98 = vst.msk [vmem:[#allocation2 + $0x8] sm:$0x3] %vm21_vm3, %v94_v10 }
  0xe6   :  { %v102_v13 = vld [vmem:[#allocation2] sm:$0xff] }
  0xe7   :  { %v111_v14 = vadd.f32 %v133_v12, %v102_v13 }
  0xe8   :  { %v103_v15 = vld [vmem:[#allocation2 + $0x8] sm:$0x3] }
  0xe9   :  { %v136_v16 = vpack.c.bf16 %v111_v14, %v111_v14  ;;  %v112_v17 = vadd.f32 %v133_v12, %v103_v15 }
  0xeb   :  { %122 = vst.msk [vmem:[%s199_s3] sm:$0xf] %vm121_vm4, %v136_v16  ;;  %v137_v18 = vpack.c.bf16 %v112_v17, %v112_v17 }
  0xed   :  { %124 = vst.msk [vmem:[%s199_s3 + $0x4] sm:$0x1] %vm123_vm5, %v137_v18 }

// kernel: _lambda_.41
= control target key start
LH: loop header
LB: loop body
LE: loop exit
PB: predicated region body
PF: predicated region fallthrough
CT: control target
= control target key end

     0   :  { %s868_s12 = smov 0   ;;  %s870_s13 = smov 0   ;;  %s943_s0 = inlined_call_operand.vmem [shape: bf16[8,768], index: 0, kind: input, shape index: {}]   ;;  %s944_s1 = inlined_call_operand.vmem [shape: bf16[768,32], index: 1, kind: input, shape index: {}]   ;;  %s945_s2 = inlined_call_operand.vmem [shape: f32[1,32], index: 2, kind: input, shape index: {}]   ;;  %s946_s3 = inlined_call_operand.vmem [shape: bf16[8,32], index: 3, kind: output, shape index: {}]  }
   0x1   :  { %s872_s14 = smov 0  }
   0x2 LB: > { %s25_s15 = sadd.s32 1, %s839_s13  ;;  %p680_p0 = scmp.ge.s32.totalorder %s843_s14, 1  ;;  %s843_s14 = sphi %s872_s14, %s13_s14   ;;  %s839_s13 = sphi %s870_s13, %s948_s13   ;;  %s835_s12 = sphi %s868_s12, %s947_s12  }
   0x3   : > { %p26_p1 = scmp.ge.s32.totalorder %s25_s15, 2  ;;  %p189_p2 = scmp.lt.s32.totalorder %s843_s14, 3 }
   0x5   : > { %s950_s15 = smov (%p26_p1, %s25_s15), 0  ;;  %p190_p3 = pnand %p680_p0, %p189_p2 }
   0x6   : > { %s230_s16 = smul.u32 (!%p190_p3), 3, %s835_s12  ;;  %p683_p6 = scmp.ne.s32.totalorder (!%p190_p3), %s835_s12, 0 }
   0x7   : > { %193 = sbr.rel (%p190_p3) target bundleno = 289 (0x121), region = 32 }
   0x8   : > { %s240_s17 = smul.u32 (!%p190_p3), 48, %s835_s12  ;;  %p233_p4 = scmp.lt.s32.totalorder (!%p190_p3), %s230_s16, 5 }
   0xa   : > { %p241_p5 = scmp.lt.s32.totalorder (!%p190_p3), %s240_s17, 95 }
   0xe   : > { %s952_s16 = smov (!%p233_p4, %s230_s16), 5  ;;  %s954_s17 = smov (!%p241_p5, %s240_s17), 95 }
   0xf   : > { %s681_s18 = sshll.u32 %s952_s16, 2  ;;  %s682_s22 = sshll.u32 %s954_s17, 2  ;;  %vm264_vm0 = vcmask (!%p683_p6), 261120   ;;  %v845_v0 = vmov (!%p683_p6), 0.0  }
  0x10   : > { %s893_s21 = scalar_lea.vmem %s943_s0, %s681_s18  ;;  %s898_s25 = scalar_lea.vmem %s944_s1, %s682_s22  ;;  %265 = vst.msk [vmem:[#allocation2] sm:$0xff] (!%p683_p6), %vm264_vm0, %v845_v0 }
  0x11   : > { %263 = sbr.rel (%p683_p6) target bundleno = 24 (0x18), region = 36 }
  0x18 PF: > { %v794_v1 = vld [vmem:[%s898_s25 + $0x40] sm:$0xff]   ;;  %v846_v2 = vmov 0.0   ;;  %vm847_vm1 = vmmov 0   ;;  %v797_v5 = vld [vmem:[%s898_s25 + $0x48] sm:$0xff]   ;;  %v800_v8 = vld [vmem:[%s898_s25 + $0x50] sm:$0xff]   ;;  %vm553_vm2 = vcmask 261120  }
  0x19   : > { %747 = vmatprep.subr.bf16.mxu1 %v846_v2  ;;  %v795_v3 = vld [vmem:[%s898_s25] sm:$0xff]   ;;  %716 = vmatprep.subr.bf16.mxu0 %v794_v1  ;;  %v798_v6 = vld [vmem:[%s898_s25 + $0x8] sm:$0xff]   ;;  %v801_v9 = vld [vmem:[%s898_s25 + $0x10] sm:$0xff]   ;;  %p711_p7 = scmp.ne.s32.totalorder %s835_s12, 1 }
  0x1a   : > { %v796_v4 = vld [vmem:[%s898_s25 + $0x80] sm:$0xff]   ;;  %763 = vmatprep.mubr.msk.bf16.mxu1 %vm847_vm1, %v846_v2  ;;  %717 = vmatpush3.bf16.msra.mxu0 %v795_v3  ;;  %v799_v7 = vld [vmem:[%s898_s25 + $0x88] sm:$0xff]   ;;  %v802_v10 = vld [vmem:[%s898_s25 + $0x90] sm:$0xff]   ;;  %vm569_vm3 = vcmask (!%p711_p7), 257024  }
  0x1b   : > { %748 = vmatpush3.bf16.msra.mxu1 %v796_v4  ;;  %718 = vmatprep.subr.bf16.mxu0 %v797_v5  ;;  %v803_v11 = vld [vmem:[%s898_s25 + $0x58] sm:$0xff]   ;;  %v806_v14 = vld [vmem:[%s898_s25 + $0x60] sm:$0xff]   ;;  %v809_v17 = vld [vmem:[%s898_s25 + $0x68] sm:$0xff]  }
  0x1c   : > { %749 = vmatprep.subr.bf16.mxu1 %v846_v2  ;;  %v804_v12 = vld [vmem:[%s898_s25 + $0x18] sm:$0xff]   ;;  %v807_v15 = vld [vmem:[%s898_s25 + $0x20] sm:$0xff]   ;;  %v810_v18 = vld [vmem:[%s898_s25 + $0x28] sm:$0xff]  }
  0x1d   : > { %v805_v13 = vld [vmem:[%s898_s25 + $0x98] sm:$0xff]   ;;  %v808_v16 = vld [vmem:[%s898_s25 + $0xa0] sm:$0xff]   ;;  %v811_v19 = vld [vmem:[%s898_s25 + $0xa8] sm:$0xff]  }
  0x1e   : > { %719 = vmatpush3.bf16.msra.mxu0 %v798_v6  ;;  %v812_v20 = vld [vmem:[%s898_s25 + $0x70] sm:$0xff]   ;;  %v815_v23 = vld [vmem:[%s898_s25 + $0x78] sm:$0xff]   ;;  %v267_v24 = vld [vmem:[%s893_s21] sm:$0xff] }
  0x1f   : > { %750 = vmatpush3.bf16.msra.mxu1 %v799_v7  ;;  %720 = vmatprep.subr.bf16.mxu0 %v800_v8  ;;  %v813_v21 = vld [vmem:[%s898_s25 + $0x30] sm:$0xff]   ;;  %v685_v25 = vcombine.high %v267_v24, %v267_v24  ;;  %v816_v26 = vld [vmem:[%s898_s25 + $0x38] sm:$0xff]   ;;  %v684_v28 = vcombine.low %v267_v24, %v267_v24  ;;  %v820_v29 = vld [vmem:[%s893_s21 + $0x8] ss:$0 sps:$4 sm:$0xff]  }
  0x20   : > { %751 = vmatprep.subr.bf16.mxu1 %v846_v2  ;;  %v814_v22 = vld [vmem:[%s898_s25 + $0xb0] sm:$0xff]   ;;  %v817_v27 = vld [vmem:[%s898_s25 + $0xb8] sm:$0xff]   ;;  %v266_v36 = vld [vmem:[#allocation2] sm:$0xff] }
  0x21   : > { %504 = vmatprep.mubr.bf16.mxu0 %v685_v25  ;;  %v712_v43 = vld [vmem:[%s945_s2] ss:$0 sm:$0xff] (!%p711_p7) }
  0x22   : > { %721 = vmatpush3.bf16.msra.mxu0 %v801_v9 }
  0x23   : > { %752 = vmatpush3.bf16.msra.mxu1 %v802_v10  ;;  %722 = vmatprep.subr.bf16.mxu0 %v803_v11 }
  0x24   : > { %753 = vmatprep.subr.bf16.mxu1 %v846_v2 }
  0x26   : > { %723 = vmatpush3.bf16.msra.mxu0 %v804_v12 }
  0x27   : > { %754 = vmatpush3.bf16.msra.mxu1 %v805_v13  ;;  %724 = vmatprep.subr.bf16.mxu0 %v806_v14 }
  0x28   : > { %755 = vmatprep.subr.bf16.mxu1 %v846_v2 }
  0x2a   : > { %725 = vmatpush3.bf16.msra.mxu0 %v807_v15 }
  0x2b   : > { %756 = vmatpush3.bf16.msra.mxu1 %v808_v16  ;;  %726 = vmatprep.subr.bf16.mxu0 %v809_v17 }
  0x2c   : > { %757 = vmatprep.subr.bf16.mxu1 %v846_v2 }
  0x2e   : > { %727 = vmatpush3.bf16.msra.mxu0 %v810_v18 }
  0x2f   : > { %758 = vmatpush3.bf16.msra.mxu1 %v811_v19  ;;  %728 = vmatprep.subr.bf16.mxu0 %v812_v20 }
  0x30   : > { %759 = vmatprep.subr.bf16.mxu1 %v846_v2 }
  0x32   : > { %729 = vmatpush3.bf16.msra.mxu0 %v813_v21 }
  0x33   : > { %760 = vmatpush3.bf16.msra.mxu1 %v814_v22  ;;  %730 = vmatprep.subr.bf16.mxu0 %v815_v23 }
  0x34   : > { %761 = vmatprep.subr.bf16.mxu1 %v846_v2 }
  0x36   : > { %731 = vmatpush3.bf16.msra.mxu0 %v816_v26 }
  0x37   : > { %762 = vmatpush3.bf16.msra.mxu1 %v817_v27 }
  0x39   : > { %505 = vmatmul.mubr.bf16.vlgmr.msra.gmra.mrb[0].mxu0 %v684_v28 }
  0x3a   : > { %764 = vmatmul.mubr.bf16.vlgmr.msra.gmra.mrb[0].mxu1 %v820_v29 }
 0x10c   : > { %v732_v30 = vpop.f32.mrb[0].mxu0 }
 0x10d   : > { %v546_v31 = vpop.f32.mrb[0].mxu1  ;;  %v733_v32 = vpop.f32.mrb[1].mxu0 }
 0x10e   : > { %v734_v33 = vadd.f32 %v733_v32, %v732_v30  ;;  %v765_v34 = vpop.f32.mrb[1].mxu1  ;;  %v735_v35 = vpop.f32.mrb[2].mxu0  ;;  %558 = sbr.rel (%p711_p7) target bundleno = 289 (0x121), region = 40 }
 0x10f   : > { %v549_v37 = vpop.f32.mrb[2].mxu1  ;;  %v736_v38 = vpop.f32.mrb[3].mxu0 }
 0x110   : > { %v547_v39 = vadd.f32 %v734_v33, %v546_v31  ;;  %v766_v40 = vpop.f32.mrb[3].mxu1 }
 0x112   : > { %v552_v41 = vadd.f32 %v547_v39, %v266_v36 }
 0x114   : > { %554 = vst.msk [vmem:[#allocation2] sm:$0xff] %vm553_vm2, %v552_v41 }
 0x11b   : > { %v559_v42 = vld [vmem:[#allocation2] sm:$0xff] }
 0x11c   : > { %v567_v44 = vadd.f32 %v712_v43, %v559_v42 }
 0x11e   : > { %v568_v45 = vpack.c.bf16 %v567_v44, %v567_v44 }
 0x120   : > { %570 = vst.msk [vmem:[%s946_s3] sm:$0xf] %vm569_vm3, %v568_v45 }
 0x121 PF: > { %s13_s14 = sadd.s32 1, %s843_s14   ;;  %s947_s12 = smov %s839_s13 }
 0x122   : > { %p10_p8 = scmp.ge.s32.totalorder %s13_s14, 4   ;;  %s948_s13 = smov %s950_s15 }
 0x124   :  { %12 = sbr.rel (!%p10_p8) target bundleno = 2 (0x2), region = 76 }

// kernel: _lambda_.44
= control target key start
LH: loop header
LB: loop body
LE: loop exit
PB: predicated region body
PF: predicated region fallthrough
CT: control target
= control target key end

     0   :  { %s915_s12 = smov 0   ;;  %s1012_s0 = inlined_call_operand.vmem [shape: bf16[2,5,32], index: 0, kind: input, shape index: {}]   ;;  %s1013_s1 = inlined_call_operand.vmem [shape: bf16[2,5,32], index: 1, kind: input, shape index: {}]   ;;  %s1014_s2 = inlined_call_operand.vmem [shape: bf16[2,5,32], index: 2, kind: input, shape index: {}]   ;;  %s1015_s3 = inlined_call_operand.vmem [shape: bf16[2,5,32], index: 3, kind: output, shape index: {}]  }
   0x1 LB: > { %s757_s13 = sadd.s32 4294967295, %s884_s12   ;;  %p761_p0 = scmp.ge.s32.totalorder %s884_s12, 1  ;;  %s884_s12 = sphi %s915_s12, %s13_s12  }
   0x2   : > { %p154_p1 = scmp.lt.s32.totalorder %s884_s12, 3 }
   0x4   : > { %p155_p2 = pnand %p761_p0, %p154_p1 }
   0x5   : > { %p184_p3 = scmp.lt.s32.totalorder (!%p155_p2), %s757_s13, 1  ;;  %v886_v0 = vmov (!%p155_p2), 0.0   ;;  %vm887_vm0 = vmmov (!%p155_p2), 0   ;;  %vm206_vm1 = vcmask (!%p155_p2), 64512   ;;  %vm253_vm2 = vcmask (!%p155_p2), 36864   ;;  %s888_s21 = smov (!%p155_p2), 120  }
   0x6   : > { %158 = sbr.rel (%p155_p2) target bundleno = 1474 (0x5c2), region = 32  ;;  %795 = vmatprep.subr.bf16.mxu0 (!%p155_p2), %v886_v0  ;;  %797 = vmatprep.mubr.msk.bf16.mxu0 (!%p155_p2), %vm887_vm0, %v886_v0  ;;  %s889_s22 = smov (!%p155_p2), 112   ;;  %vm270_vm3 = vcmask (!%p155_p2), 1041408   ;;  %vm271_vm4 = vcmask (!%p155_p2), 1042432   ;;  %v891_v18 = vmov (!%p155_p2), 65535   ;;  %vm266_vm5 = vcmask (!%p155_p2), 39936  }
   0x7   : > { %801 = vmatprep.subr.bf16.mxu1 (!%p155_p2), %v886_v0  ;;  %803 = vmatprep.mubr.msk.bf16.mxu1 (!%p155_p2), %vm887_vm0, %v886_v0  ;;  %s890_s23 = smov (!%p155_p2), 104   ;;  %v272_v19 = vsel (!%p155_p2), %vm270_vm3, 4294967295, %v891_v18  ;;  %s892_s27 = smov (!%p155_p2), 8   ;;  %vm669_vm6 = vcmask (!%p155_p2), 130048   ;;  %vm671_vm7 = vcmask (!%p155_p2), 195584   ;;  %vm674_vm8 = vcmask (!%p155_p2), 256000  }
   0x8   : > { %v957_v20 = vsel (!%p155_p2), %vm271_vm4, %v272_v19, 0  ;;  %s893_s28 = smov (!%p155_p2), 16   ;;  %s894_s29 = smov (!%p155_p2), 24   ;;  %vm675_vm9 = vsmask.f32 (!%p155_p2), 2304 }
   0x9   : > { %vm676_vm10 = vmand (!%p155_p2), %vm674_vm8, %vm675_vm9 }
   0xd   : > { %s1017_s13 = smov (!%p184_p3, %s757_s13), 1 }
   0xe   : > { %s929_s14 = sshll.u32 %s1017_s13, 2 }
   0xf   : > { %s191_s17 = scalar_lea.vmem %s1013_s1, %s929_s14  ;;  %s187_s20 = scalar_lea.vmem %s1012_s0, %s929_s14 }
  0x10   : > { %v204_v1 = vld [vmem:[%s191_s17] sm:$0x7]  ;;  %s195_s26 = scalar_lea.vmem %s1014_s2, %s929_s14  ;;  %s199_s5 = scalar_lea.vmem %s1015_s3, %s929_s14 }
  0x11   : > { %v211_v2 = vsel %vm206_vm1, %v204_v1, 0  ;;  %v202_v3 = vld [vmem:[%s187_s20] sm:$0x7]  ;;  %v769_v10 = vcombine.low %v204_v1, %v204_v1 }
  0x12   : > { %796 = vmatpush3.bf16.xpose.msra.mxu0 %v211_v2  ;;  %v203_v4 = vmul.bf16 1052065461, %v202_v3  ;;  %v955_v17 = vld [vmem:[%s195_s26] sm:$0x7] }
  0x13   : > { %813 = vmatprep.subr.bf16.mxu0 %v886_v0  ;;  %325 = vrot.lane.b32.xlu1 %v769_v10, %s888_s21  ;;  %v275_v21 = vand.u32 %v957_v20, %v955_v17  ;;  %v771_v1 = vcombine.low %v955_v17, %v955_v17 }
  0x14   : > { %v768_v11 = vcombine.low %v203_v4, %v203_v4 }
  0x15   : > { %802 = vmatpush3.bf16.msra.mxu1 %v275_v21 }
  0x16   : > { %807 = vmatprep.subr.bf16.mxu1 %v886_v0 }
  0x17   : > { %320 = vrot.lane.b32.xlu1 %v768_v11, %s888_s21 }
  0x19   : > { %798 = vmatmul.mubr.msk.bf16.vlgmr.msra.gmra.mrb[0].mxu0 %vm206_vm1, %v203_v4 }
  0x1a   : > { %815 = vmatprep.mubr.msk.bf16.mxu0 %vm887_vm0, %v886_v0 }
  0x1b   : > { %436 = vrot.lane.b32.xlu1 %v768_v11, %s889_s22 }
  0x1f   : > { %548 = vrot.lane.b32.xlu1 %v769_v10, %s890_s23 }
  0x23   : > { %546 = vrot.lane.b32.xlu1 %v768_v11, %s890_s23 }
  0x85   : > { %v326_v24 = vpop.permute.xlu1 %325 }
  0x86   : > { %v331_v26 = vsel %vm206_vm1, %v326_v24, 0 }
  0x89   : > { %v321_v28 = vpop.permute.xlu1 %320 }
  0x8d   : > { %v437_v30 = vpop.permute.xlu1 %436 }
  0x91   : > { %v549_v32 = vpop.permute.xlu1 %548 }
  0x92   : > { %v554_v33 = vsel %vm206_vm1, %v549_v32, 0 }
  0x95   : > { %v547_v34 = vpop.permute.xlu1 %546 }
  0xec   : > { %v247_v5 = vpop.f32.mrb[0].mxu0 }
  0xed   : > { %v799_v6 = vpop.f32.mrb[1].mxu0  ;;  %v254_v7 = vsel %vm253_vm2, %v247_v5, -inf }
  0xee   : > { %255 = vmax.xlane.f32.xlu0 %v254_v7  ;;  %v250_v8 = vpop.f32.mrb[2].mxu0 }
  0xef   : > { %v800_v9 = vpop.f32.mrb[3].mxu0 }
 0x17b   : > { %v256_v12 = vpop.xlane.xlu0 %255 }
 0x17c   : > { %v257_v13 = vsub.f32 %v247_v5, %v256_v12 }
 0x17e   : > { %v258_v14 = vmul.f32 1.442695, %v257_v13 }
 0x180   : > { %862 = vpow2.f32 %v258_v14 }
 0x18a   : > { %v863_v15 = vpop.eup %862 }
 0x18b   : > { %v260_v16 = vsel %vm253_vm2, %v863_v15, 0.0 }
 0x18c   : > { %261 = vadd.xlane.f32.xlu0 %v260_v16 }
 0x1a2   : > { %438 = vrot.lane.b32.xlu0 %v769_v10, %s889_s22 }
 0x219   : > { %v262_v22 = vpop.xlane.xlu0 %261 }
 0x21a   : > { %864 = vrcp.f32 %v262_v22 }
 0x21d   : > { %v439_v29 = vpop.permute.xlu0 %438 }
 0x21e   : > { %v444_v31 = vsel %vm206_vm1, %v439_v29, 0 }
 0x224   : > { %v865_v23 = vpop.eup %864 }
 0x225   : > { %v264_v25 = vmul.f32 %v865_v23, %v863_v15 }
 0x227   : > { %v265_v27 = vpack.c.bf16 %v264_v25, %v264_v25 }
 0x229   : > { %804 = vmatmul.mubr.msk.bf16.vlgmr.msra.gmra.mrb[0].mxu1 %vm266_vm5, %v265_v27 }
 0x22a   : > { %808 = vmatpush3.bf16.xpose.msra.mxu1 %v331_v26  ;;  %809 = vmatprep.mubr.msk.bf16.mxu1 %vm887_vm0, %v886_v0 }
 0x22b   : > { %819 = vmatprep.subr.bf16.mxu1 %v886_v0 }
 0x231   : > { %810 = vmatmul.mubr.msk.bf16.vlgmr.msra.gmra.mrb[4].mxu1 %vm206_vm1, %v321_v28 }
 0x232   : > { %820 = vmatpush3.bf16.xpose.msra.mxu1 %v444_v31  ;;  %821 = vmatprep.mubr.msk.bf16.mxu1 %vm887_vm0, %v886_v0 }
 0x233   : > { %831 = vmatprep.subr.bf16.mxu1 %v886_v0 }
 0x239   : > { %822 = vmatmul.mubr.msk.bf16.vlgmr.msra.gmra.mrb[8].mxu1 %vm206_vm1, %v437_v30 }
 0x23a   : > { %832 = vmatpush3.bf16.xpose.msra.mxu1 %v554_v33  ;;  %833 = vmatprep.mubr.msk.bf16.mxu1 %vm887_vm0, %v886_v0 }
 0x241   : > { %834 = vmatmul.mubr.msk.bf16.vlgmr.msra.gmra.mrb[12].mxu1 %vm206_vm1, %v547_v34 }
 0x2fc   : > { %v978_v35 = vpop.f32.mrb[0].mxu1 }
 0x2fd   : > { %v805_v36 = vpop.f32.mrb[1].mxu1 }
 0x2fe   : > { %v314_v37 = vpop.f32.mrb[2].mxu1 }
 0x2ff   : > { %v806_v38 = vpop.f32.mrb[3].mxu1 }
 0x304   : > { %v367_v39 = vpop.f32.mrb[4].mxu1 }
 0x305   : > { %v811_v40 = vpop.f32.mrb[5].mxu1  ;;  %v373_v41 = vsel %vm253_vm2, %v367_v39, -inf }
 0x306   : > { %374 = vmax.xlane.f32.xlu1 %v373_v41  ;;  %v370_v42 = vpop.f32.mrb[6].mxu1 }
 0x307   : > { %v812_v43 = vpop.f32.mrb[7].mxu1  ;;  %v677_v42 = vld [vmem:[%s199_s5] sm:$0x7] }
 0x30c   : > { %v480_v44 = vpop.f32.mrb[8].mxu1 }
 0x30d   : > { %v486_v45 = vsel %vm253_vm2, %v480_v44, -inf  ;;  %v823_v46 = vpop.f32.mrb[9].mxu1 }
 0x30e   : > { %487 = vmax.xlane.f32.xlu0 %v486_v45  ;;  %v483_v47 = vpop.f32.mrb[10].mxu1 }
 0x30f   : > { %v824_v48 = vpop.f32.mrb[11].mxu1 }
 0x314   : > { %v590_v49 = vpop.f32.mrb[12].mxu1 }
 0x315   : > { %v596_v50 = vsel %vm253_vm2, %v590_v49, -inf  ;;  %v835_v51 = vpop.f32.mrb[13].mxu1 }
 0x316   : > { %597 = vmax.xlane.f32.xlu1 %v596_v50  ;;  %v593_v52 = vpop.f32.mrb[14].mxu1 }
 0x317   : > { %v836_v53 = vpop.f32.mrb[15].mxu1 }
 0x393   : > { %v375_v54 = vpop.xlane.xlu1 %374 }
 0x394   : > { %v376_v55 = vsub.f32 %v367_v39, %v375_v54 }
 0x396   : > { %v377_v56 = vmul.f32 1.442695, %v376_v55 }
 0x398   : > { %866 = vpow2.f32 %v377_v56 }
 0x39b   : > { %v488_v57 = vpop.xlane.xlu0 %487 }
 0x39c   : > { %v489_v58 = vsub.f32 %v480_v44, %v488_v57 }
 0x39e   : > { %v490_v59 = vmul.f32 1.442695, %v489_v58 }
 0x3a0   : > { %868 = vpow2.f32 %v490_v59 }
 0x3a2   : > { %v867_v60 = vpop.eup %866 }
 0x3a3   : > { %v379_v61 = vsel %vm253_vm2, %v867_v60, 0.0  ;;  %v598_v2 = vpop.xlane.xlu1 %597 }
 0x3a4   : > { %380 = vadd.xlane.f32.xlu1 %v379_v61  ;;  %v599_v3 = vsub.f32 %v590_v49, %v598_v2 }
 0x3a6   : > { %v600_v4 = vmul.f32 1.442695, %v599_v3 }
 0x3a8   : > { %870 = vpow2.f32 %v600_v4 }
 0x3aa   : > { %v869_v62 = vpop.eup %868 }
 0x3ab   : > { %v492_v63 = vsel %vm253_vm2, %v869_v62, 0.0 }
 0x3ac   : > { %493 = vadd.xlane.f32.xlu0 %v492_v63 }
 0x3b2   : > { %v871_v5 = vpop.eup %870 }
 0x3b3   : > { %v602_v6 = vsel %vm253_vm2, %v871_v5, 0.0 }
 0x3b5   : > { %498 = vrot.lane.b32.xlu1 %v771_v1, %s889_s22 }
 0x3c2   : > { %388 = vrot.lane.b32.xlu0 %v771_v1, %s888_s21 }
 0x3d9   : > { %603 = vadd.xlane.f32.xlu1 %v602_v6 }
 0x3ea   : > { %608 = vrot.lane.b32.xlu1 %v771_v1, %s890_s23 }
 0x431   : > { %v381_v7 = vpop.xlane.xlu1 %380 }
 0x432   : > { %872 = vrcp.f32 %v381_v7 }
 0x435   : > { %v499_v13 = vpop.permute.xlu1 %498 }
 0x436   : > { %v504_v15 = vand.u32 %v499_v13, %v957_v20 }
 0x439   : > { %v494_v8 = vpop.xlane.xlu0 %493 }
 0x43a   : > { %874 = vrcp.f32 %v494_v8 }
 0x43c   : > { %v873_v9 = vpop.eup %872 }
 0x43d   : > { %v383_v10 = vmul.f32 %v873_v9, %v867_v60  ;;  %v389_v11 = vpop.permute.xlu0 %388 }
 0x43e   : > { %v394_v12 = vand.u32 %v389_v11, %v957_v20 }
 0x43f   : > { %v384_v14 = vpack.c.bf16 %v383_v10, %v383_v10 }
 0x440   : > { %814 = vmatpush3.bf16.msra.mxu0 %v394_v12 }
 0x441   : > { %825 = vmatprep.subr.bf16.mxu0 %v886_v0 }
 0x443   : > { %816 = vmatmul.mubr.msk.bf16.vlgmr.msra.gmra.mrb[4].mxu0 %vm266_vm5, %v384_v14 }
 0x444   : > { %v875_v16 = vpop.eup %874  ;;  %826 = vmatpush3.bf16.msra.mxu0 %v504_v15  ;;  %827 = vmatprep.mubr.msk.bf16.mxu0 %vm887_vm0, %v886_v0 }
 0x445   : > { %v496_v17 = vmul.f32 %v875_v16, %v869_v62  ;;  %837 = vmatprep.subr.bf16.mxu0 %v886_v0 }
 0x447   : > { %v497_v18 = vpack.c.bf16 %v496_v17, %v496_v17 }
 0x44b   : > { %828 = vmatmul.mubr.msk.bf16.vlgmr.msra.gmra.mrb[8].mxu0 %vm266_vm5, %v497_v18 }
 0x44c   : > { %839 = vmatprep.mubr.msk.bf16.mxu0 %vm887_vm0, %v886_v0 }
 0x466   : > { %v604_v19 = vpop.xlane.xlu1 %603 }
 0x467   : > { %876 = vrcp.f32 %v604_v19 }
 0x46a   : > { %v609_v21 = vpop.permute.xlu1 %608 }
 0x46b   : > { %v614_v22 = vand.u32 %v609_v21, %v957_v20 }
 0x46d   : > { %838 = vmatpush3.bf16.msra.mxu0 %v614_v22 }
 0x471   : > { %v877_v23 = vpop.eup %876 }
 0x472   : > { %v606_v24 = vmul.f32 %v877_v23, %v871_v5 }
 0x474   : > { %v607_v25 = vpack.c.bf16 %v606_v24, %v606_v24 }
 0x476   : > { %840 = vmatmul.mubr.msk.bf16.vlgmr.msra.gmra.mrb[12].mxu0 %vm266_vm5, %v607_v25 }
 0x516   : > { %v430_v26 = vpop.f32.mrb[4].mxu0 }
 0x517   : > { %657 = vrot.lane.b32.xlu0 %v430_v26, %s892_s27  ;;  %v817_v27 = vpop.f32.mrb[5].mxu0 }
 0x518   : > { %v433_v28 = vpop.f32.mrb[6].mxu0 }
 0x519   : > { %v818_v29 = vpop.f32.mrb[7].mxu0 }
 0x51e   : > { %v540_v30 = vpop.f32.mrb[8].mxu0 }
 0x51f   : > { %661 = vrot.lane.b32.xlu1 %v540_v30, %s893_s28  ;;  %v829_v0 = vpop.f32.mrb[9].mxu0 }
 0x520   : > { %v543_v31 = vpop.f32.mrb[10].mxu0 }
 0x521   : > { %v830_v32 = vpop.f32.mrb[11].mxu0 }
 0x549   : > { %v650_v20 = vpop.f32.mrb[12].mxu0 }
 0x54a   : > { %665 = vrot.lane.b32.xlu0 %v650_v20, %s894_s29  ;;  %v841_v33 = vpop.f32.mrb[13].mxu0 }
 0x54b   : > { %v653_v34 = vpop.f32.mrb[14].mxu0 }
 0x54c   : > { %v842_v36 = vpop.f32.mrb[15].mxu0 }
 0x589   : > { %v658_v37 = vpop.permute.xlu0 %657 }
 0x58a   : > { %v668_v39 = vsel %vm206_vm1, %v978_v35, %v658_v37 }
 0x591   : > { %v662_v38 = vpop.permute.xlu1 %661 }
 0x592   : > { %v670_v40 = vsel %vm669_vm6, %v668_v39, %v662_v38 }
 0x5bc   : > { %v666_v41 = vpop.permute.xlu0 %665 }
 0x5bd   : > { %v672_v43 = vsel %vm671_vm7, %v670_v40, %v666_v41 }
 0x5be   : > { %v673_v44 = vpack.c.bf16 %v672_v43, %v672_v43 }
 0x5c0   : > { %v678_v45 = vsel %vm676_vm10, %v673_v44, %v677_v42 }
 0x5c1   : > { %679 = vst [vmem:[%s199_s5] sm:$0x7] %v678_v45 }
 0x5c2 PF: > { %s13_s12 = sadd.s32 1, %s884_s12  }
 0x5c3   : > { %p10_p4 = scmp.ge.s32.totalorder %s13_s12, 4  }
 0x5c5   :  { %12 = sbr.rel (!%p10_p4) target bundleno = 1 (0x1), region = 68 }

// kernel: _lambda_.45
= control target key start
LH: loop header
LB: loop body
LE: loop exit
PB: predicated region body
PF: predicated region fallthrough
CT: control target
= control target key end

     0   :  { %vm22_vm0 = vcmask 261120   ;;  %v162_v0 = vmov 0.0   ;;  %vm163_vm1 = vmmov 0   ;;  %vm24_vm2 = vcmask 254976   ;;  %s216_s1 = inlined_call_operand.vmem [shape: bf16[32,32], index: 1, kind: input, shape index: {}]   ;;  %s217_s0 = inlined_call_operand.vmem [shape: bf16[10,32], index: 0, kind: input, shape index: {}]   ;;  %s218_s3 = inlined_call_operand.vmem [shape: bf16[10,32], index: 3, kind: input, shape index: {}]   ;;  %s219_s2 = inlined_call_operand.vmem [shape: f32[1,32], index: 2, kind: input, shape index: {}]   ;;  %s220_s4 = inlined_call_operand.vmem [shape: bf16[10,32], index: 4, kind: output, shape index: {}]  }
   0x1   :  { %149 = vmatprep.subr.bf16.mxu0 %v162_v0  ;;  %v159_v1 = vld [vmem:[%s216_s1] sm:$0xff]   ;;  %153 = vmatprep.mubr.msk.bf16.mxu0 %vm163_vm1, %v162_v0  ;;  %23 = vst.msk [vmem:[#allocation2] sm:$0xff] %vm22_vm0, %v162_v0  ;;  %v160_v2 = vld [vmem:[%s216_s1 + $0x8] sm:$0xff]   ;;  %vm129_vm3 = vcmask 257024   ;;  %vm131_vm4 = vcmask 253952  }
   0x2   :  { %150 = vmatpush3.bf16.msra.mxu0 %v159_v1  ;;  %v161_v3 = vld [vmem:[%s217_s0] sm:$0x1f]   ;;  %25 = vst.msk [vmem:[#allocation2 + $0x8] sm:$0x3] %vm24_vm2, %v162_v0 }
   0x3   :  { %151 = vmatprep.subr.bf16.mxu0 %v162_v0  ;;  %v115_v12 = vld [vmem:[%s218_s3] sm:$0xf]  ;;  %v116_v14 = vld [vmem:[%s218_s3 + $0x4] sm:$0x1] }
   0x4   :  { %v141_v13 = vld [vmem:[%s219_s2] ss:$0 sm:$0xff]  ;;  %v117_v15 = vunpack.c.l.bf16 %v115_v12  ;;  %v118_v18 = vunpack.c.l.bf16 %v116_v14 }
   0x6   :  { %152 = vmatpush3.bf16.msra.mxu0 %v160_v2 }
   0x8   :  { %v26_v4 = vld [vmem:[#allocation2] sm:$0xff] }
   0x9   :  { %154 = vmatmul.mubr.msk.bf16.vlgmr.msra.gmra.mrb[0].mxu0 %vm22_vm0, %v161_v3  ;;  %v27_v6 = vld [vmem:[#allocation2 + $0x8] sm:$0x3] }
  0xdc   :  { %v89_v5 = vpop.f32.mrb[0].mxu0 }
  0xdd   :  { %v96_v7 = vadd.f32 %v89_v5, %v26_v4  ;;  %v155_v8 = vpop.f32.mrb[1].mxu0 }
  0xde   :  { %v92_v9 = vpop.f32.mrb[2].mxu0 }
  0xdf   :  { %98 = vst.msk [vmem:[#allocation2] sm:$0xff] %vm22_vm0, %v96_v7  ;;  %v97_v10 = vadd.f32 %v92_v9, %v27_v6  ;;  %v156_v11 = vpop.f32.mrb[3].mxu0 }
  0xe1   :  { %100 = vst.msk [vmem:[#allocation2 + $0x8] sm:$0x3] %vm24_vm2, %v97_v10 }
  0xe6   :  { %v104_v16 = vld [vmem:[#allocation2] sm:$0xff] }
  0xe7   :  { %v113_v17 = vadd.f32 %v141_v13, %v104_v16 }
  0xe8   :  { %v105_v19 = vld [vmem:[#allocation2 + $0x8] sm:$0x3] }
  0xe9   :  { %v119_v20 = vadd.f32 %v117_v15, %v113_v17  ;;  %v114_v21 = vadd.f32 %v141_v13, %v105_v19 }
  0xeb   :  { %v144_v22 = vpack.c.bf16 %v119_v20, %v119_v20  ;;  %v120_v23 = vadd.f32 %v118_v18, %v114_v21 }
  0xed   :  { %130 = vst.msk [vmem:[%s220_s4] sm:$0xf] %vm129_vm3, %v144_v22  ;;  %v145_v24 = vpack.c.bf16 %v120_v23, %v120_v23 }
  0xef   :  { %132 = vst.msk [vmem:[%s220_s4 + $0x4] sm:$0x1] %vm131_vm4, %v145_v24 }

// kernel: _lambda_.47
= control target key start
LH: loop header
LB: loop body
LE: loop exit
PB: predicated region body
PF: predicated region fallthrough
CT: control target
= control target key end

     0   :  { %v170_v0 = vmov 0.0   ;;  %vm171_vm0 = vmmov 0   ;;  %vm46_vm1 = vcmask 261120   ;;  %s210_s1 = inlined_call_operand.vmem [shape: bf16[32,128], index: 1, kind: input, shape index: {}]   ;;  %s211_s0 = inlined_call_operand.vmem [shape: bf16[10,32], index: 0, kind: input, shape index: {}]   ;;  %s212_s2 = inlined_call_operand.vmem [shape: f32[1,128], index: 2, kind: input, shape index: {}]   ;;  %s213_s3 = inlined_call_operand.vmem [shape: bf16[10,128], index: 3, kind: output, shape index: {}]  }
   0x1   :  { %153 = vmatprep.subr.bf16.mxu0 %v170_v0  ;;  %20 = vst [vmem:[#allocation2 + $0x8] sm:$0x3] %v170_v0  ;;  %v163_v1 = vld [vmem:[%s210_s1] sm:$0xff]   ;;  %157 = vmatprep.mubr.msk.bf16.mxu0 %vm171_vm0, %v170_v0  ;;  %v164_v2 = vld [vmem:[%s210_s1 + $0x8] sm:$0xff]  }
   0x2   :  { %154 = vmatpush3.bf16.msra.mxu0 %v163_v1  ;;  %v165_v3 = vld [vmem:[%s211_s0] sm:$0x1f]  }
   0x3   :  { %155 = vmatprep.subr.bf16.mxu0 %v170_v0  ;;  %v145_v5 = vld [vmem:[%s212_s2] ss:$0 sm:$0xff] }
   0x6   :  { %156 = vmatpush3.bf16.msra.mxu0 %v164_v2 }
   0x8   :  { %v22_v6 = vld [vmem:[#allocation2 + $0x8] sm:$0x3] }
   0x9   :  { %158 = vmatmul.mubr.msk.bf16.vlgmr.msra.gmra.mrb[0].mxu0 %vm46_vm1, %v165_v3 }
  0xdc   :  { %v84_v4 = vpop.f32.mrb[0].mxu0 }
  0xdd   :  { %v159_v7 = vpop.f32.mrb[1].mxu0  ;;  %v107_v9 = vadd.f32 %v145_v5, %v84_v4 }
  0xde   :  { %v87_v8 = vpop.f32.mrb[2].mxu0 }
  0xdf   :  { %v92_v10 = vadd.f32 %v87_v8, %v22_v6  ;;  %v160_v11 = vpop.f32.mrb[3].mxu0  ;;  %v109_v12 = vmul.f32 %v107_v9, %v107_v9 }
  0xe1   :  { %94 = vst [vmem:[#allocation2 + $0x8] sm:$0x3] %v92_v10  ;;  %v111_v13 = vmul.f32 %v109_v12, %v107_v9 }
  0xe3   :  { %v113_v14 = vmul.f32 0.044715, %v111_v13 }
  0xe5   :  { %v115_v15 = vadd.f32 %v113_v14, %v107_v9 }
  0xe7   :  { %v117_v17 = vmul.f32 0.7978846, %v115_v15 }
  0xe8   :  { %v99_v16 = vld [vmem:[#allocation2 + $0x8] sm:$0x3] }
  0xe9   :  { %v108_v18 = vadd.f32 %v145_v5, %v99_v16  ;;  %166 = vtanh.f32 %v117_v17 }
  0xeb   :  { %v110_v19 = vmul.f32 %v108_v18, %v108_v18 }
  0xed   :  { %v112_v20 = vmul.f32 %v110_v19, %v108_v18 }
  0xef   :  { %v114_v21 = vmul.f32 0.044715, %v112_v20 }
  0xf1   :  { %v116_v22 = vadd.f32 %v114_v21, %v108_v18 }
  0xf3   :  { %v118_v23 = vmul.f32 0.7978846, %v116_v22  ;;  %v167_v24 = vpop.eup %166 }
  0xf4   :  { %v121_v25 = vadd.f32 1.0, %v167_v24 }
  0xf5   :  { %168 = vtanh.f32 %v118_v23 }
  0xf6   :  { %v123_v26 = vmul.f32 0.5, %v121_v25 }
  0xf8   :  { %v125_v27 = vmul.f32 %v123_v26, %v107_v9 }
  0xfa   :  { %v148_v28 = vpack.c.bf16 %v125_v27, %v125_v27 }
  0xfc   :  { %135 = vst [vmem:[%s213_s3] sm:$0xf] %v148_v28 }
  0xff   :  { %v169_v29 = vpop.eup %168 }
 0x100   :  { %v122_v30 = vadd.f32 1.0, %v169_v29 }
 0x102   :  { %v124_v31 = vmul.f32 0.5, %v122_v30 }
 0x104   :  { %v126_v32 = vmul.f32 %v124_v31, %v108_v18 }
 0x106   :  { %v149_v33 = vpack.c.bf16 %v126_v32, %v126_v32 }
 0x108   :  { %136 = vst [vmem:[%s213_s3 + $0x4] sm:$0x1] %v149_v33 }

// kernel: _lambda_.48
= control target key start
LH: loop header
LB: loop body
LE: loop exit
PB: predicated region body
PF: predicated region fallthrough
CT: control target
= control target key end

     0   :  { %vm22_vm0 = vcmask 261120   ;;  %v237_v0 = vmov 0.0   ;;  %vm238_vm1 = vmmov 0   ;;  %vm24_vm2 = vcmask 254976   ;;  %s308_s1 = inlined_call_operand.vmem [shape: bf16[128,32], index: 1, kind: input, shape index: {}]   ;;  %s309_s0 = inlined_call_operand.vmem [shape: bf16[10,128], index: 0, kind: input, shape index: {}]   ;;  %s310_s3 = inlined_call_operand.vmem [shape: bf16[10,32], index: 3, kind: input, shape index: {}]   ;;  %s311_s2 = inlined_call_operand.vmem [shape: f32[1,32], index: 2, kind: input, shape index: {}]   ;;  %s312_s4 = inlined_call_operand.vmem [shape: bf16[10,32], index: 4, kind: output, shape index: {}]  }
   0x1   :  { %206 = vmatprep.subr.bf16.mxu0 %v237_v0  ;;  %v228_v1 = vld [vmem:[%s308_s1] sm:$0xff]   ;;  %222 = vmatprep.mubr.msk.bf16.mxu0 %vm238_vm1, %v237_v0  ;;  %23 = vst.msk [vmem:[#allocation2] sm:$0xff] %vm22_vm0, %v237_v0  ;;  %v229_v2 = vld [vmem:[%s308_s1 + $0x8] sm:$0xff]   ;;  %v230_v3 = vld [vmem:[%s308_s1 + $0x10] sm:$0xff]   ;;  %vm175_vm3 = vcmask 257024   ;;  %vm177_vm4 = vcmask 253952  }
   0x2   :  { %207 = vmatpush3.bf16.msra.mxu0 %v228_v1  ;;  %v231_v4 = vld [vmem:[%s308_s1 + $0x18] sm:$0xff]   ;;  %v232_v5 = vld [vmem:[%s308_s1 + $0x20] sm:$0xff]   ;;  %v233_v6 = vld [vmem:[%s308_s1 + $0x28] sm:$0xff]   ;;  %25 = vst.msk [vmem:[#allocation2 + $0x8] sm:$0x3] %vm24_vm2, %v237_v0 }
   0x3   :  { %208 = vmatprep.subr.bf16.mxu0 %v237_v0  ;;  %v234_v7 = vld [vmem:[%s308_s1 + $0x30] sm:$0xff]   ;;  %v235_v8 = vld [vmem:[%s308_s1 + $0x38] sm:$0xff]   ;;  %v236_v9 = vld [vmem:[%s309_s0] sm:$0x1f]  }
   0x4   :  { %v161_v18 = vld [vmem:[%s310_s3] sm:$0xf]  ;;  %v162_v20 = vld [vmem:[%s310_s3 + $0x4] sm:$0x1] }
   0x5   :  { %v192_v19 = vld [vmem:[%s311_s2] ss:$0 sm:$0xff]  ;;  %v163_v21 = vunpack.c.l.bf16 %v161_v18  ;;  %v164_v24 = vunpack.c.l.bf16 %v162_v20 }
   0x6   :  { %209 = vmatpush3.bf16.msra.mxu0 %v229_v2 }
   0x7   :  { %210 = vmatprep.subr.bf16.mxu0 %v237_v0 }
   0x8   :  { %v26_v10 = vld [vmem:[#allocation2] sm:$0xff] }
   0x9   :  { %v27_v12 = vld [vmem:[#allocation2 + $0x8] sm:$0x3] }
   0xa   :  { %211 = vmatpush3.bf16.msra.mxu0 %v230_v3 }
   0xb   :  { %212 = vmatprep.subr.bf16.mxu0 %v237_v0 }
   0xe   :  { %213 = vmatpush3.bf16.msra.mxu0 %v231_v4 }
   0xf   :  { %214 = vmatprep.subr.bf16.mxu0 %v237_v0 }
  0x12   :  { %215 = vmatpush3.bf16.msra.mxu0 %v232_v5 }
  0x13   :  { %216 = vmatprep.subr.bf16.mxu0 %v237_v0 }
  0x16   :  { %217 = vmatpush3.bf16.msra.mxu0 %v233_v6 }
  0x17   :  { %218 = vmatprep.subr.bf16.mxu0 %v237_v0 }
  0x1a   :  { %219 = vmatpush3.bf16.msra.mxu0 %v234_v7 }
  0x1b   :  { %220 = vmatprep.subr.bf16.mxu0 %v237_v0 }
  0x1e   :  { %221 = vmatpush3.bf16.msra.mxu0 %v235_v8 }
  0x21   :  { %223 = vmatmul.mubr.bf16.vlgmr.msra.gmra.mrb[0].mxu0 %v236_v9 }
  0xf4   :  { %v134_v11 = vpop.f32.mrb[0].mxu0 }
  0xf5   :  { %v141_v13 = vadd.f32 %v134_v11, %v26_v10  ;;  %v224_v14 = vpop.f32.mrb[1].mxu0 }
  0xf6   :  { %v137_v15 = vpop.f32.mrb[2].mxu0 }
  0xf7   :  { %144 = vst.msk [vmem:[#allocation2] sm:$0xff] %vm22_vm0, %v141_v13  ;;  %v142_v16 = vadd.f32 %v137_v15, %v27_v12  ;;  %v225_v17 = vpop.f32.mrb[3].mxu0 }
  0xf9   :  { %146 = vst.msk [vmem:[#allocation2 + $0x8] sm:$0x3] %vm24_vm2, %v142_v16 }
  0xfe   :  { %v150_v22 = vld [vmem:[#allocation2] sm:$0xff] }
  0xff   :  { %v159_v23 = vadd.f32 %v192_v19, %v150_v22 }
 0x100   :  { %v151_v25 = vld [vmem:[#allocation2 + $0x8] sm:$0x3] }
 0x101   :  { %v165_v26 = vadd.f32 %v163_v21, %v159_v23  ;;  %v160_v27 = vadd.f32 %v192_v19, %v151_v25 }
 0x103   :  { %v195_v28 = vpack.c.bf16 %v165_v26, %v165_v26  ;;  %v166_v29 = vadd.f32 %v164_v24, %v160_v27 }
 0x105   :  { %176 = vst.msk [vmem:[%s312_s4] sm:$0xf] %vm175_vm3, %v195_v28  ;;  %v196_v30 = vpack.c.bf16 %v166_v29, %v166_v29 }
 0x107   :  { %178 = vst.msk [vmem:[%s312_s4 + $0x4] sm:$0x1] %vm177_vm4, %v196_v30 }

// kernel: _lambda_.63
= control target key start
LH: loop header
LB: loop body
LE: loop exit
PB: predicated region body
PF: predicated region fallthrough
CT: control target
= control target key end

     0   :  { %vm19_vm0 = vcmask 523264   ;;  %v154_v0 = vmov 0.0   ;;  %vm155_vm1 = vmmov 0   ;;  %vm48_vm2 = vcmask 261120   ;;  %s196_s1 = inlined_call_operand.vmem [shape: bf16[32,64], index: 1, kind: input, shape index: {}]   ;;  %s197_s0 = inlined_call_operand.vmem [shape: bf16[10,32], index: 0, kind: input, shape index: {}]   ;;  %s198_s2 = inlined_call_operand.vmem [shape: f32[1,64], index: 2, kind: input, shape index: {}]   ;;  %s199_s3 = inlined_call_operand.vmem [shape: bf16[10,64], index: 3, kind: output, shape index: {}]  }
   0x1   :  { %141 = vmatprep.subr.bf16.mxu0 %v154_v0  ;;  %v151_v1 = vld [vmem:[%s196_s1] sm:$0xff]   ;;  %145 = vmatprep.mubr.msk.bf16.mxu0 %vm155_vm1, %v154_v0  ;;  %20 = vst.msk [vmem:[#allocation2] sm:$0xff] %vm19_vm0, %v154_v0  ;;  %v152_v2 = vld [vmem:[%s196_s1 + $0x8] sm:$0xff]   ;;  %vm21_vm3 = vcmask 517120   ;;  %vm121_vm4 = vcmask 519168   ;;  %vm123_vm5 = vcmask 516096  }
   0x2   :  { %142 = vmatpush3.bf16.msra.mxu0 %v151_v1  ;;  %v153_v3 = vld [vmem:[%s197_s0] sm:$0x1f]   ;;  %22 = vst.msk [vmem:[#allocation2 + $0x8] sm:$0x3] %vm21_vm3, %v154_v0 }
   0x3   :  { %143 = vmatprep.subr.bf16.mxu0 %v154_v0  ;;  %v133_v12 = vld [vmem:[%s198_s2] ss:$0 sm:$0xff] }
   0x6   :  { %144 = vmatpush3.bf16.msra.mxu0 %v152_v2 }
   0x8   :  { %v23_v4 = vld [vmem:[#allocation2] sm:$0xff] }
   0x9   :  { %146 = vmatmul.mubr.msk.bf16.vlgmr.msra.gmra.mrb[0].mxu0 %vm48_vm2, %v153_v3  ;;  %v24_v6 = vld [vmem:[#allocation2 + $0x8] sm:$0x3] }
  0xdc   :  { %v86_v5 = vpop.f32.mrb[0].mxu0 }
  0xdd   :  { %v93_v7 = vadd.f32 %v86_v5, %v23_v4  ;;  %v147_v8 = vpop.f32.mrb[1].mxu0 }
  0xde   :  { %v89_v9 = vpop.f32.mrb[2].mxu0 }
  0xdf   :  { %96 = vst.msk [vmem:[#allocation2] sm:$0xff] %vm19_vm0, %v93_v7  ;;  %v94_v10 = vadd.f32 %v89_v9, %v24_v6  ;;  %v148_v11 = vpop.f32.mrb[3].mxu0 }
  0xe1   :  { %98 = vst.msk [vmem:[#allocation2 + $0x8] sm:$0x3] %vm21_vm3, %v94_v10 }
  0xe6   :  { %v102_v13 = vld [vmem:[#allocation2] sm:$0xff] }
  0xe7   :  { %v111_v14 = vadd.f32 %v133_v12, %v102_v13 }
  0xe8   :  { %v103_v15 = vld [vmem:[#allocation2 + $0x8] sm:$0x3] }
  0xe9   :  { %v136_v16 = vpack.c.bf16 %v111_v14, %v111_v14  ;;  %v112_v17 = vadd.f32 %v133_v12, %v103_v15 }
  0xeb   :  { %122 = vst.msk [vmem:[%s199_s3] sm:$0xf] %vm121_vm4, %v136_v16  ;;  %v137_v18 = vpack.c.bf16 %v112_v17, %v112_v17 }
  0xed   :  { %124 = vst.msk [vmem:[%s199_s3 + $0x4] sm:$0x1] %vm123_vm5, %v137_v18 }

// kernel: _lambda_.58
= control target key start
LH: loop header
LB: loop body
LE: loop exit
PB: predicated region body
PF: predicated region fallthrough
CT: control target
= control target key end

     0   :  { %vm19_vm0 = vcmask 785408   ;;  %v151_v0 = vmov 0.0   ;;  %vm152_vm1 = vmmov 0   ;;  %vm47_vm2 = vcmask 261120   ;;  %s195_s1 = inlined_call_operand.vmem [shape: bf16[32,96], index: 1, kind: input, shape index: {}]   ;;  %s196_s0 = inlined_call_operand.vmem [shape: bf16[16,32], index: 0, kind: input, shape index: {}]   ;;  %s197_s2 = inlined_call_operand.vmem [shape: f32[1,96], index: 2, kind: input, shape index: {}]   ;;  %s198_s3 = inlined_call_operand.vmem [shape: bf16[16,96], index: 3, kind: output, shape index: {}]  }
   0x1   :  { %138 = vmatprep.subr.bf16.mxu0 %v151_v0  ;;  %v148_v1 = vld [vmem:[%s195_s1] sm:$0xff]   ;;  %142 = vmatprep.mubr.msk.bf16.mxu0 %vm152_vm1, %v151_v0  ;;  %20 = vst.msk [vmem:[#allocation2] sm:$0xff] %vm19_vm0, %v151_v0  ;;  %21 = vst.msk [vmem:[#allocation2 + $0x8] sm:$0xff] %vm19_vm0, %v151_v0  ;;  %v149_v2 = vld [vmem:[%s195_s1 + $0x8] sm:$0xff]   ;;  %vm119_vm3 = vcmask 781312  }
   0x2   :  { %139 = vmatpush3.bf16.msra.mxu0 %v148_v1  ;;  %v150_v3 = vld [vmem:[%s196_s0] sm:$0xff]  }
   0x3   :  { %140 = vmatprep.subr.bf16.mxu0 %v151_v0  ;;  %v130_v12 = vld [vmem:[%s197_s2] ss:$0 sm:$0xff] }
   0x6   :  { %141 = vmatpush3.bf16.msra.mxu0 %v149_v2 }
   0x8   :  { %v22_v4 = vld [vmem:[#allocation2] sm:$0xff]  ;;  %v23_v6 = vld [vmem:[#allocation2 + $0x8] sm:$0xff] }
   0x9   :  { %143 = vmatmul.mubr.msk.bf16.vlgmr.msra.gmra.mrb[0].mxu0 %vm47_vm2, %v150_v3 }
  0xdc   :  { %v85_v5 = vpop.f32.mrb[0].mxu0 }
  0xdd   :  { %v92_v7 = vadd.f32 %v85_v5, %v22_v4  ;;  %v144_v8 = vpop.f32.mrb[1].mxu0 }
  0xde   :  { %v88_v9 = vpop.f32.mrb[2].mxu0 }
  0xdf   :  { %95 = vst.msk [vmem:[#allocation2] sm:$0xff] %vm19_vm0, %v92_v7  ;;  %v93_v10 = vadd.f32 %v88_v9, %v23_v6  ;;  %v145_v11 = vpop.f32.mrb[3].mxu0 }
  0xe1   :  { %96 = vst.msk [vmem:[#allocation2 + $0x8] sm:$0xff] %vm19_vm0, %v93_v10 }
  0xe6   :  { %v100_v13 = vld [vmem:[#allocation2] sm:$0xff] }
  0xe7   :  { %v109_v14 = vadd.f32 %v130_v12, %v100_v13 }
  0xe8   :  { %v101_v15 = vld [vmem:[#allocation2 + $0x8] sm:$0xff] }
  0xe9   :  { %v133_v16 = vpack.c.bf16 %v109_v14, %v109_v14  ;;  %v110_v17 = vadd.f32 %v130_v12, %v101_v15 }
  0xeb   :  { %120 = vst.msk [vmem:[%s198_s3] sm:$0xf] %vm119_vm3, %v133_v16  ;;  %v134_v18 = vpack.c.bf16 %v110_v17, %v110_v17 }
  0xed   :  { %121 = vst.msk [vmem:[%s198_s3 + $0x4] sm:$0xf] %vm119_vm3, %v134_v18 }

// kernel: _lambda_.57
= control target key start
LH: loop header
LB: loop body
LE: loop exit
PB: predicated region body
PF: predicated region fallthrough
CT: control target
= control target key end

     0   :  { %vm18_vm0 = vcmask 261120   ;;  %vm72_vm1 = vcmask 257024   ;;  %s132_s0 = inlined_call_operand.vmem [shape: bf16[16,32], index: 0, kind: input, shape index: {}]   ;;  %s133_s1 = inlined_call_operand.vmem [shape: f32[1,32], index: 1, kind: input, shape index: {}]   ;;  %s134_s2 = inlined_call_operand.vmem [shape: f32[1,32], index: 2, kind: input, shape index: {}]   ;;  %s135_s3 = inlined_call_operand.vmem [shape: bf16[16,32], index: 3, kind: output, shape index: {}]  }
   0x1   :  { %v86_v0 = vld [vmem:[%s132_s0] sm:$0xff]  }
   0x2   :  { %v87_v1 = vunpack.c.l.bf16 %v86_v0  ;;  %v88_v2 = vunpack.c.h.bf16 %v86_v0  ;;  %v79_v22 = vld [vmem:[%s133_s1] ss:$0 sm:$0xff] }
   0x3   :  { %v80_v24 = vld [vmem:[%s134_s2] ss:$0 sm:$0xff] }
   0x4   :  { %v19_v3 = vsel %vm18_vm0, %v87_v1, 0.0  ;;  %v22_v4 = vsel %vm18_vm0, %v88_v2, 0.0 }
   0x5   :  { %20 = vadd.xlane.f32.xlu0 %v19_v3 }
   0x9   :  { %23 = vadd.xlane.f32.xlu0 %v22_v4 }
  0x92   :  { %v21_v5 = vpop.xlane.xlu0 %20 }
  0x93   :  { %v26_v6 = vmul.f32 0.03125, %v21_v5 }
  0x95   :  { %v28_v7 = vsub.f32 %v87_v1, %v26_v6 }
  0x96   :  { %v24_v8 = vpop.xlane.xlu0 %23 }
  0x97   :  { %v27_v9 = vmul.f32 0.03125, %v24_v8  ;;  %v30_v10 = vmul.f32 %v28_v7, %v28_v7 }
  0x99   :  { %v29_v11 = vsub.f32 %v88_v2, %v27_v9  ;;  %v32_v12 = vsel %vm18_vm0, %v30_v10, 0.0 }
  0x9a   :  { %33 = vadd.xlane.f32.xlu1 %v32_v12 }
  0x9b   :  { %v31_v13 = vmul.f32 %v29_v11, %v29_v11 }
  0x9d   :  { %v35_v14 = vsel %vm18_vm0, %v31_v13, 0.0 }
  0x9e   :  { %36 = vadd.xlane.f32.xlu1 %v35_v14 }
 0x127   :  { %v34_v15 = vpop.xlane.xlu1 %33 }
 0x128   :  { %v38_v16 = vmul.f32 0.03125, %v34_v15 }
 0x12a   :  { %v40_v17 = vadd.f32 1e-12, %v38_v16 }
 0x12b   :  { %v37_v18 = vpop.xlane.xlu1 %36 }
 0x12c   :  { %89 = vrsqrt.f32 %v40_v17  ;;  %v39_v19 = vmul.f32 0.03125, %v37_v18 }
 0x12e   :  { %v41_v20 = vadd.f32 1e-12, %v39_v19 }
 0x130   :  { %91 = vrsqrt.f32 %v41_v20 }
 0x136   :  { %v90_v21 = vpop.eup %89 }
 0x137   :  { %v44_v23 = vmul.f32 %v90_v21, %v28_v7 }
 0x139   :  { %v53_v25 = vmul.f32 %v79_v22, %v44_v23 }
 0x13a   :  { %v92_v26 = vpop.eup %91 }
 0x13b   :  { %v62_v27 = vadd.f32 %v80_v24, %v53_v25  ;;  %v45_v28 = vmul.f32 %v92_v26, %v29_v11 }
 0x13d   :  { %v83_v29 = vpack.c.bf16 %v62_v27, %v62_v27  ;;  %v54_v30 = vmul.f32 %v79_v22, %v45_v28 }
 0x13f   :  { %73 = vst.msk [vmem:[%s135_s3] sm:$0xf] %vm72_vm1, %v83_v29  ;;  %v63_v31 = vadd.f32 %v80_v24, %v54_v30 }
 0x141   :  { %v84_v32 = vpack.c.bf16 %v63_v31, %v63_v31 }
 0x143   :  { %74 = vst.msk [vmem:[%s135_s3 + $0x4] sm:$0xf] %vm72_vm1, %v84_v32 }

// kernel: _lambda_.60
= control target key start
LH: loop header
LB: loop body
LE: loop exit
PB: predicated region body
PF: predicated region fallthrough
CT: control target
= control target key end

     0   :  { %vm19_vm0 = vcmask 261120   ;;  %v150_v0 = vmov 0.0   ;;  %vm151_vm1 = vmmov 0   ;;  %vm118_vm2 = vcmask 257024   ;;  %s195_s1 = inlined_call_operand.vmem [shape: bf16[32,32], index: 1, kind: input, shape index: {}]   ;;  %s196_s0 = inlined_call_operand.vmem [shape: bf16[16,32], index: 0, kind: input, shape index: {}]   ;;  %s197_s2 = inlined_call_operand.vmem [shape: f32[1,32], index: 2, kind: input, shape index: {}]   ;;  %s198_s3 = inlined_call_operand.vmem [shape: bf16[16,32], index: 3, kind: output, shape index: {}]  }
   0x1   :  { %137 = vmatprep.subr.bf16.mxu0 %v150_v0  ;;  %v147_v1 = vld [vmem:[%s195_s1] sm:$0xff]   ;;  %141 = vmatprep.mubr.msk.bf16.mxu0 %vm151_vm1, %v150_v0  ;;  %20 = vst.msk [vmem:[#allocation2] sm:$0xff] %vm19_vm0, %v150_v0  ;;  %21 = vst.msk [vmem:[#allocation2 + $0x8] sm:$0xff] %vm19_vm0, %v150_v0  ;;  %v148_v2 = vld [vmem:[%s195_s1 + $0x8] sm:$0xff]  }
   0x2   :  { %138 = vmatpush3.bf16.msra.mxu0 %v147_v1  ;;  %v149_v3 = vld [vmem:[%s196_s0] sm:$0xff]  }
   0x3   :  { %139 = vmatprep.subr.bf16.mxu0 %v150_v0  ;;  %v129_v12 = vld [vmem:[%s197_s2] ss:$0 sm:$0xff] }
   0x6   :  { %140 = vmatpush3.bf16.msra.mxu0 %v148_v2 }
   0x8   :  { %v22_v4 = vld [vmem:[#allocation2] sm:$0xff]  ;;  %v23_v6 = vld [vmem:[#allocation2 + $0x8] sm:$0xff] }
   0x9   :  { %142 = vmatmul.mubr.msk.bf16.vlgmr.msra.gmra.mrb[0].mxu0 %vm19_vm0, %v149_v3 }
  0xdc   :  { %v85_v5 = vpop.f32.mrb[0].mxu0 }
  0xdd   :  { %v92_v7 = vadd.f32 %v85_v5, %v22_v4  ;;  %v143_v8 = vpop.f32.mrb[1].mxu0 }
  0xde   :  { %v88_v9 = vpop.f32.mrb[2].mxu0 }
  0xdf   :  { %94 = vst.msk [vmem:[#allocation2] sm:$0xff] %vm19_vm0, %v92_v7  ;;  %v93_v10 = vadd.f32 %v88_v9, %v23_v6  ;;  %v144_v11 = vpop.f32.mrb[3].mxu0 }
  0xe1   :  { %95 = vst.msk [vmem:[#allocation2 + $0x8] sm:$0xff] %vm19_vm0, %v93_v10 }
  0xe6   :  { %v99_v13 = vld [vmem:[#allocation2] sm:$0xff] }
  0xe7   :  { %v108_v14 = vadd.f32 %v129_v12, %v99_v13 }
  0xe8   :  { %v100_v15 = vld [vmem:[#allocation2 + $0x8] sm:$0xff] }
  0xe9   :  { %v132_v16 = vpack.c.bf16 %v108_v14, %v108_v14  ;;  %v109_v17 = vadd.f32 %v129_v12, %v100_v15 }
  0xeb   :  { %119 = vst.msk [vmem:[%s198_s3] sm:$0xf] %vm118_vm2, %v132_v16  ;;  %v133_v18 = vpack.c.bf16 %v109_v17, %v109_v17 }
  0xed   :  { %120 = vst.msk [vmem:[%s198_s3 + $0x4] sm:$0xf] %vm118_vm2, %v133_v18 }

// kernel: _lambda_.59
= control target key start
LH: loop header
LB: loop body
LE: loop exit
PB: predicated region body
PF: predicated region fallthrough
CT: control target
= control target key end

     0   :  { %s967_s15 = smov 0   ;;  %s1071_s0 = inlined_call_operand.vmem [shape: bf16[2,8,32], index: 0, kind: input, shape index: {}]   ;;  %s1072_s1 = inlined_call_operand.vmem [shape: bf16[2,8,32], index: 1, kind: input, shape index: {}]   ;;  %s1073_s2 = inlined_call_operand.vmem [shape: bf16[2,8,32], index: 2, kind: input, shape index: {}]   ;;  %s1074_s3 = inlined_call_operand.vmem [shape: f32[2,1,8], index: 3, kind: input, shape index: {}]   ;;  %s1075_s4 = inlined_call_operand.vmem [shape: bf16[2,8,32], index: 4, kind: output, shape index: {}]  }
   0x1 LB: > { %s805_s16 = sadd.s32 4294967295, %s932_s15   ;;  %p809_p0 = scmp.ge.s32.totalorder %s932_s15, 1  ;;  %s932_s15 = sphi %s967_s15, %s14_s15  }
   0x2   : > { %p187_p1 = scmp.lt.s32.totalorder %s932_s15, 3 }
   0x4   : > { %p188_p2 = pnand %p809_p0, %p187_p1 }
   0x5   : > { %p222_p3 = scmp.lt.s32.totalorder (!%p188_p2), %s805_s16, 1  ;;  %v934_v0 = vmov (!%p188_p2), 0.0   ;;  %vm935_vm0 = vmmov (!%p188_p2), 0   ;;  %vm254_vm1 = vcmask (!%p188_p2), 64512   ;;  %s936_s27 = smov (!%p188_p2), 120   ;;  %vm316_vm2 = vcmask (!%p188_p2), 1043456  }
   0x6   : > { %191 = sbr.rel (%p188_p2) target bundleno = 1477 (0x5c5), region = 36  ;;  %844 = vmatprep.subr.bf16.mxu0 (!%p188_p2), %v934_v0  ;;  %846 = vmatprep.mubr.msk.bf16.mxu0 (!%p188_p2), %vm935_vm0, %v934_v0  ;;  %s937_s28 = smov (!%p188_p2), 112   ;;  %vm712_vm3 = vcmask (!%p188_p2), 130048   ;;  %vm714_vm4 = vcmask (!%p188_p2), 195584   ;;  %vm717_vm5 = vcmask (!%p188_p2), 257024  }
   0x7   : > { %850 = vmatprep.subr.bf16.mxu1 (!%p188_p2), %v934_v0  ;;  %852 = vmatprep.mubr.msk.bf16.mxu1 (!%p188_p2), %vm935_vm0, %v934_v0  ;;  %s938_s29 = smov (!%p188_p2), 104   ;;  %s939_s7 = smov (!%p188_p2), 8  }
   0x8   : > { %s940_s8 = smov (!%p188_p2), 16   ;;  %s941_s9 = smov (!%p188_p2), 24  }
   0xd   : > { %s1077_s16 = smov (!%p222_p3, %s805_s16), 1 }
   0xe   : > { %s981_s17 = sshll.u32 %s1077_s16, 2  ;;  %s236_s26 = scalar_lea.vmem %s1074_s3, %s1077_s16 }
   0xf   : > { %s229_s20 = scalar_lea.vmem %s1072_s1, %s981_s17  ;;  %s225_s23 = scalar_lea.vmem %s1071_s0, %s981_s17  ;;  %v999_v5 = vld [vmem:[%s236_s26] ss:$0 sm:$0xff] }
  0x10   : > { %v246_v1 = vld [vmem:[%s229_s20] sm:$0xf]  ;;  %s233_s6 = scalar_lea.vmem %s1073_s2, %s981_s17  ;;  %s240_s12 = scalar_lea.vmem %s1075_s4, %s981_s17 }
  0x11   : > { %v259_v2 = vsel %vm254_vm1, %v246_v1, 0  ;;  %v244_v3 = vld [vmem:[%s225_s23] sm:$0xf]  ;;  %v818_v12 = vcombine.low %v246_v1, %v246_v1 }
  0x12   : > { %845 = vmatpush3.bf16.xpose.msra.mxu0 %v259_v2  ;;  %v245_v4 = vmul.bf16 1052065461, %v244_v3  ;;  %v1013_v19 = vld [vmem:[%s233_s6] sm:$0xf] }
  0x13   : > { %862 = vmatprep.subr.bf16.mxu0 %v934_v0  ;;  %368 = vrot.lane.b32.xlu1 %v818_v12, %s936_s27  ;;  %v318_v20 = vsel %vm316_vm2, %v1013_v19, 0  ;;  %v820_v3 = vcombine.low %v1013_v19, %v1013_v19 }
  0x14   : > { %v817_v13 = vcombine.low %v245_v4, %v245_v4  ;;  %851 = vmatpush3.bf16.msra.mxu1 %v318_v20 }
  0x15   : > { %856 = vmatprep.subr.bf16.mxu1 %v934_v0 }
  0x17   : > { %363 = vrot.lane.b32.xlu1 %v817_v13, %s936_s27 }
  0x19   : > { %847 = vmatmul.mubr.msk.bf16.vlgmr.msra.gmra.mrb[0].mxu0 %vm254_vm1, %v245_v4 }
  0x1a   : > { %864 = vmatprep.mubr.msk.bf16.mxu0 %vm935_vm0, %v934_v0 }
  0x1b   : > { %479 = vrot.lane.b32.xlu1 %v817_v13, %s937_s28 }
  0x1f   : > { %591 = vrot.lane.b32.xlu1 %v818_v12, %s938_s29 }
  0x23   : > { %589 = vrot.lane.b32.xlu1 %v817_v13, %s938_s29 }
  0x85   : > { %v369_v23 = vpop.permute.xlu1 %368 }
  0x86   : > { %v374_v25 = vsel %vm254_vm1, %v369_v23, 0 }
  0x89   : > { %v364_v27 = vpop.permute.xlu1 %363 }
  0x8d   : > { %v480_v29 = vpop.permute.xlu1 %479 }
  0x91   : > { %v592_v31 = vpop.permute.xlu1 %591 }
  0x92   : > { %v597_v32 = vsel %vm254_vm1, %v592_v31, 0 }
  0x95   : > { %v590_v33 = vpop.permute.xlu1 %589 }
  0xec   : > { %v295_v6 = vpop.f32.mrb[0].mxu0 }
  0xed   : > { %v296_v7 = vadd.f32 %v999_v5, %v295_v6  ;;  %v848_v8 = vpop.f32.mrb[1].mxu0 }
  0xee   : > { %v298_v9 = vpop.f32.mrb[2].mxu0 }
  0xef   : > { %v849_v10 = vpop.f32.mrb[3].mxu0  ;;  %v301_v11 = vsel %vm254_vm1, %v296_v7, -inf }
  0xf0   : > { %302 = vmax.xlane.f32.xlu0 %v301_v11 }
 0x17d   : > { %v303_v14 = vpop.xlane.xlu0 %302 }
 0x17e   : > { %v304_v15 = vsub.f32 %v296_v7, %v303_v14 }
 0x180   : > { %v305_v16 = vmul.f32 1.442695, %v304_v15 }
 0x182   : > { %910 = vpow2.f32 %v305_v16 }
 0x18c   : > { %v911_v17 = vpop.eup %910 }
 0x18d   : > { %v307_v18 = vsel %vm254_vm1, %v911_v17, 0.0 }
 0x18e   : > { %308 = vadd.xlane.f32.xlu0 %v307_v18 }
 0x1a4   : > { %481 = vrot.lane.b32.xlu0 %v818_v12, %s937_s28 }
 0x21b   : > { %v309_v21 = vpop.xlane.xlu0 %308 }
 0x21c   : > { %912 = vrcp.f32 %v309_v21 }
 0x21f   : > { %v482_v28 = vpop.permute.xlu0 %481 }
 0x220   : > { %v487_v30 = vsel %vm254_vm1, %v482_v28, 0 }
 0x226   : > { %v913_v22 = vpop.eup %912 }
 0x227   : > { %v311_v24 = vmul.f32 %v913_v22, %v911_v17 }
 0x229   : > { %v312_v26 = vpack.c.bf16 %v311_v24, %v311_v24 }
 0x22b   : > { %853 = vmatmul.mubr.msk.bf16.vlgmr.msra.gmra.mrb[0].mxu1 %vm254_vm1, %v312_v26 }
 0x22c   : > { %857 = vmatpush3.bf16.xpose.msra.mxu1 %v374_v25  ;;  %858 = vmatprep.mubr.msk.bf16.mxu1 %vm935_vm0, %v934_v0 }
 0x22d   : > { %868 = vmatprep.subr.bf16.mxu1 %v934_v0 }
 0x233   : > { %859 = vmatmul.mubr.msk.bf16.vlgmr.msra.gmra.mrb[4].mxu1 %vm254_vm1, %v364_v27 }
 0x234   : > { %869 = vmatpush3.bf16.xpose.msra.mxu1 %v487_v30  ;;  %870 = vmatprep.mubr.msk.bf16.mxu1 %vm935_vm0, %v934_v0 }
 0x235   : > { %880 = vmatprep.subr.bf16.mxu1 %v934_v0 }
 0x23b   : > { %871 = vmatmul.mubr.msk.bf16.vlgmr.msra.gmra.mrb[8].mxu1 %vm254_vm1, %v480_v29 }
 0x23c   : > { %881 = vmatpush3.bf16.xpose.msra.mxu1 %v597_v32  ;;  %882 = vmatprep.mubr.msk.bf16.mxu1 %vm935_vm0, %v934_v0 }
 0x243   : > { %883 = vmatmul.mubr.msk.bf16.vlgmr.msra.gmra.mrb[12].mxu1 %vm254_vm1, %v590_v33 }
 0x2fe   : > { %v1034_v34 = vpop.f32.mrb[0].mxu1 }
 0x2ff   : > { %v854_v35 = vpop.f32.mrb[1].mxu1 }
 0x300   : > { %v357_v36 = vpop.f32.mrb[2].mxu1 }
 0x301   : > { %v855_v37 = vpop.f32.mrb[3].mxu1 }
 0x306   : > { %v410_v38 = vpop.f32.mrb[4].mxu1 }
 0x307   : > { %v411_v39 = vadd.f32 %v999_v5, %v410_v38  ;;  %v860_v40 = vpop.f32.mrb[5].mxu1 }
 0x308   : > { %v413_v41 = vpop.f32.mrb[6].mxu1 }
 0x309   : > { %v861_v42 = vpop.f32.mrb[7].mxu1  ;;  %v416_v43 = vsel %vm254_vm1, %v411_v39, -inf }
 0x30a   : > { %417 = vmax.xlane.f32.xlu1 %v416_v43 }
 0x30e   : > { %v523_v44 = vpop.f32.mrb[8].mxu1 }
 0x30f   : > { %v524_v45 = vadd.f32 %v999_v5, %v523_v44  ;;  %v872_v46 = vpop.f32.mrb[9].mxu1 }
 0x310   : > { %v526_v47 = vpop.f32.mrb[10].mxu1 }
 0x311   : > { %v529_v48 = vsel %vm254_vm1, %v524_v45, -inf  ;;  %v873_v49 = vpop.f32.mrb[11].mxu1 }
 0x312   : > { %530 = vmax.xlane.f32.xlu0 %v529_v48 }
 0x316   : > { %v633_v50 = vpop.f32.mrb[12].mxu1 }
 0x317   : > { %v634_v51 = vadd.f32 %v999_v5, %v633_v50  ;;  %v884_v52 = vpop.f32.mrb[13].mxu1 }
 0x318   : > { %v636_v53 = vpop.f32.mrb[14].mxu1 }
 0x319   : > { %v639_v54 = vsel %vm254_vm1, %v634_v51, -inf  ;;  %v885_v55 = vpop.f32.mrb[15].mxu1 }
 0x31a   : > { %640 = vmax.xlane.f32.xlu1 %v639_v54 }
 0x397   : > { %v418_v56 = vpop.xlane.xlu1 %417 }
 0x398   : > { %v419_v57 = vsub.f32 %v411_v39, %v418_v56 }
 0x39a   : > { %v420_v58 = vmul.f32 1.442695, %v419_v57 }
 0x39c   : > { %914 = vpow2.f32 %v420_v58 }
 0x39f   : > { %v531_v59 = vpop.xlane.xlu0 %530 }
 0x3a0   : > { %v532_v60 = vsub.f32 %v524_v45, %v531_v59 }
 0x3a2   : > { %v533_v61 = vmul.f32 1.442695, %v532_v60 }
 0x3a4   : > { %916 = vpow2.f32 %v533_v61 }
 0x3a6   : > { %v915_v62 = vpop.eup %914 }
 0x3a7   : > { %v422_v63 = vsel %vm254_vm1, %v915_v62, 0.0  ;;  %v641_v4 = vpop.xlane.xlu1 %640 }
 0x3a8   : > { %423 = vadd.xlane.f32.xlu1 %v422_v63  ;;  %v642_v5 = vsub.f32 %v634_v51, %v641_v4 }
 0x3aa   : > { %v643_v6 = vmul.f32 1.442695, %v642_v5 }
 0x3ac   : > { %918 = vpow2.f32 %v643_v6 }
 0x3ae   : > { %v917_v1 = vpop.eup %916 }
 0x3af   : > { %v535_v2 = vsel %vm254_vm1, %v917_v1, 0.0 }
 0x3b0   : > { %536 = vadd.xlane.f32.xlu0 %v535_v2 }
 0x3b6   : > { %v919_v7 = vpop.eup %918 }
 0x3b7   : > { %v645_v8 = vsel %vm254_vm1, %v919_v7, 0.0 }
 0x3b9   : > { %541 = vrot.lane.b32.xlu1 %v820_v3, %s937_s28 }
 0x3c6   : > { %431 = vrot.lane.b32.xlu0 %v820_v3, %s936_s27 }
 0x3dd   : > { %646 = vadd.xlane.f32.xlu1 %v645_v8 }
 0x3ee   : > { %651 = vrot.lane.b32.xlu1 %v820_v3, %s938_s29 }
 0x435   : > { %v424_v9 = vpop.xlane.xlu1 %423 }
 0x436   : > { %920 = vrcp.f32 %v424_v9 }
 0x439   : > { %v542_v15 = vpop.permute.xlu1 %541 }
 0x43a   : > { %v547_v17 = vsel %vm316_vm2, %v542_v15, 0 }
 0x43d   : > { %v537_v10 = vpop.xlane.xlu0 %536 }
 0x43e   : > { %922 = vrcp.f32 %v537_v10 }
 0x440   : > { %v921_v11 = vpop.eup %920 }
 0x441   : > { %v426_v12 = vmul.f32 %v921_v11, %v915_v62  ;;  %v432_v13 = vpop.permute.xlu0 %431 }
 0x442   : > { %v437_v14 = vsel %vm316_vm2, %v432_v13, 0 }
 0x443   : > { %863 = vmatpush3.bf16.msra.mxu0 %v437_v14  ;;  %v427_v16 = vpack.c.bf16 %v426_v12, %v426_v12 }
 0x444   : > { %874 = vmatprep.subr.bf16.mxu0 %v934_v0 }
 0x446   : > { %865 = vmatmul.mubr.msk.bf16.vlgmr.msra.gmra.mrb[4].mxu0 %vm254_vm1, %v427_v16 }
 0x447   : > { %875 = vmatpush3.bf16.msra.mxu0 %v547_v17  ;;  %876 = vmatprep.mubr.msk.bf16.mxu0 %vm935_vm0, %v934_v0 }
 0x448   : > { %v923_v18 = vpop.eup %922  ;;  %886 = vmatprep.subr.bf16.mxu0 %v934_v0 }
 0x449   : > { %v539_v19 = vmul.f32 %v923_v18, %v917_v1 }
 0x44b   : > { %v540_v20 = vpack.c.bf16 %v539_v19, %v539_v19 }
 0x44e   : > { %877 = vmatmul.mubr.msk.bf16.vlgmr.msra.gmra.mrb[8].mxu0 %vm254_vm1, %v540_v20 }
 0x44f   : > { %888 = vmatprep.mubr.msk.bf16.mxu0 %vm935_vm0, %v934_v0 }
 0x46a   : > { %v647_v21 = vpop.xlane.xlu1 %646 }
 0x46b   : > { %924 = vrcp.f32 %v647_v21 }
 0x46e   : > { %v652_v22 = vpop.permute.xlu1 %651 }
 0x46f   : > { %v657_v23 = vsel %vm316_vm2, %v652_v22, 0 }
 0x470   : > { %887 = vmatpush3.bf16.msra.mxu0 %v657_v23 }
 0x475   : > { %v925_v24 = vpop.eup %924 }
 0x476   : > { %v649_v25 = vmul.f32 %v925_v24, %v919_v7 }
 0x478   : > { %v650_v26 = vpack.c.bf16 %v649_v25, %v649_v25 }
 0x47a   : > { %889 = vmatmul.mubr.msk.bf16.vlgmr.msra.gmra.mrb[12].mxu0 %vm254_vm1, %v650_v26 }
 0x519   : > { %v473_v27 = vpop.f32.mrb[4].mxu0 }
 0x51a   : > { %700 = vrot.lane.b32.xlu0 %v473_v27, %s939_s7  ;;  %v866_v28 = vpop.f32.mrb[5].mxu0 }
 0x51b   : > { %v476_v29 = vpop.f32.mrb[6].mxu0 }
 0x51c   : > { %v867_v30 = vpop.f32.mrb[7].mxu0 }
 0x521   : > { %v583_v31 = vpop.f32.mrb[8].mxu0 }
 0x522   : > { %704 = vrot.lane.b32.xlu1 %v583_v31, %s940_s8  ;;  %v878_v0 = vpop.f32.mrb[9].mxu0 }
 0x523   : > { %v586_v32 = vpop.f32.mrb[10].mxu0 }
 0x524   : > { %v879_v33 = vpop.f32.mrb[11].mxu0 }
 0x54d   : > { %v693_v35 = vpop.f32.mrb[12].mxu0 }
 0x54e   : > { %708 = vrot.lane.b32.xlu0 %v693_v35, %s941_s9  ;;  %v890_v36 = vpop.f32.mrb[13].mxu0 }
 0x54f   : > { %v696_v37 = vpop.f32.mrb[14].mxu0 }
 0x550   : > { %v891_v38 = vpop.f32.mrb[15].mxu0 }
 0x58c   : > { %v701_v39 = vpop.permute.xlu0 %700 }
 0x58d   : > { %v711_v41 = vsel %vm254_vm1, %v1034_v34, %v701_v39 }
 0x594   : > { %v705_v40 = vpop.permute.xlu1 %704 }
 0x595   : > { %v713_v42 = vsel %vm712_vm3, %v711_v41, %v705_v40 }
 0x5c0   : > { %v709_v43 = vpop.permute.xlu0 %708 }
 0x5c1   : > { %v715_v44 = vsel %vm714_vm4, %v713_v42, %v709_v43 }
 0x5c2   : > { %v716_v45 = vpack.c.bf16 %v715_v44, %v715_v44 }
 0x5c4   : > { %718 = vst.msk [vmem:[%s240_s12] sm:$0xf] %vm717_vm5, %v716_v45 }
 0x5c5 PF: > { %s14_s15 = sadd.s32 1, %s932_s15  }
 0x5c6   : > { %p11_p4 = scmp.ge.s32.totalorder %s14_s15, 4  }
 0x5c8   :  { %13 = sbr.rel (!%p11_p4) target bundleno = 1 (0x1), region = 75 }

// kernel: _lambda_.61
= control target key start
LH: loop header
LB: loop body
LE: loop exit
PB: predicated region body
PF: predicated region fallthrough
CT: control target
= control target key end

     0   :  { %vm27_vm0 = vcmask 261120   ;;  %vm81_vm1 = vcmask 257024   ;;  %s153_s0 = inlined_call_operand.vmem [shape: bf16[16,32], index: 0, kind: input, shape index: {}]   ;;  %s154_s1 = inlined_call_operand.vmem [shape: bf16[16,32], index: 1, kind: input, shape index: {}]   ;;  %s155_s2 = inlined_call_operand.vmem [shape: f32[1,32], index: 2, kind: input, shape index: {}]   ;;  %s156_s3 = inlined_call_operand.vmem [shape: f32[1,32], index: 3, kind: input, shape index: {}]   ;;  %s157_s4 = inlined_call_operand.vmem [shape: bf16[16,32], index: 4, kind: output, shape index: {}]  }
   0x1   :  { %v95_v0 = vld [vmem:[%s153_s0] sm:$0xff]  }
   0x2   :  { %v99_v1 = vld [vmem:[%s154_s1] sm:$0xff]   ;;  %v96_v2 = vunpack.c.l.bf16 %v95_v0  ;;  %v97_v4 = vunpack.c.h.bf16 %v95_v0 }
   0x3   :  { %v100_v3 = vunpack.c.l.bf16 %v99_v1  ;;  %v101_v5 = vunpack.c.h.bf16 %v99_v1  ;;  %v88_v27 = vld [vmem:[%s155_s2] ss:$0 sm:$0xff] }
   0x4   :  { %v89_v29 = vld [vmem:[%s156_s3] ss:$0 sm:$0xff] }
   0x5   :  { %v25_v6 = vadd.f32 %v100_v3, %v96_v2  ;;  %v26_v7 = vadd.f32 %v101_v5, %v97_v4 }
   0x7   :  { %v28_v8 = vsel %vm27_vm0, %v25_v6, 0.0  ;;  %v31_v9 = vsel %vm27_vm0, %v26_v7, 0.0 }
   0x8   :  { %29 = vadd.xlane.f32.xlu0 %v28_v8 }
   0xc   :  { %32 = vadd.xlane.f32.xlu0 %v31_v9 }
  0x95   :  { %v30_v10 = vpop.xlane.xlu0 %29 }
  0x96   :  { %v35_v11 = vmul.f32 0.03125, %v30_v10 }
  0x98   :  { %v37_v12 = vsub.f32 %v25_v6, %v35_v11 }
  0x99   :  { %v33_v13 = vpop.xlane.xlu0 %32 }
  0x9a   :  { %v36_v14 = vmul.f32 0.03125, %v33_v13  ;;  %v39_v15 = vmul.f32 %v37_v12, %v37_v12 }
  0x9c   :  { %v38_v16 = vsub.f32 %v26_v7, %v36_v14  ;;  %v41_v17 = vsel %vm27_vm0, %v39_v15, 0.0 }
  0x9d   :  { %42 = vadd.xlane.f32.xlu1 %v41_v17 }
  0x9e   :  { %v40_v18 = vmul.f32 %v38_v16, %v38_v16 }
  0xa0   :  { %v44_v19 = vsel %vm27_vm0, %v40_v18, 0.0 }
  0xa1   :  { %45 = vadd.xlane.f32.xlu1 %v44_v19 }
 0x12a   :  { %v43_v20 = vpop.xlane.xlu1 %42 }
 0x12b   :  { %v47_v21 = vmul.f32 0.03125, %v43_v20 }
 0x12d   :  { %v49_v22 = vadd.f32 1e-12, %v47_v21 }
 0x12e   :  { %v46_v23 = vpop.xlane.xlu1 %45 }
 0x12f   :  { %102 = vrsqrt.f32 %v49_v22  ;;  %v48_v24 = vmul.f32 0.03125, %v46_v23 }
 0x131   :  { %v50_v25 = vadd.f32 1e-12, %v48_v24 }
 0x133   :  { %104 = vrsqrt.f32 %v50_v25 }
 0x139   :  { %v103_v26 = vpop.eup %102 }
 0x13a   :  { %v53_v28 = vmul.f32 %v103_v26, %v37_v12 }
 0x13c   :  { %v62_v30 = vmul.f32 %v88_v27, %v53_v28 }
 0x13d   :  { %v105_v31 = vpop.eup %104 }
 0x13e   :  { %v71_v32 = vadd.f32 %v89_v29, %v62_v30  ;;  %v54_v33 = vmul.f32 %v105_v31, %v38_v16 }
 0x140   :  { %v92_v34 = vpack.c.bf16 %v71_v32, %v71_v32  ;;  %v63_v35 = vmul.f32 %v88_v27, %v54_v33 }
 0x142   :  { %82 = vst.msk [vmem:[%s157_s4] sm:$0xf] %vm81_vm1, %v92_v34  ;;  %v72_v36 = vadd.f32 %v89_v29, %v63_v35 }
 0x144   :  { %v93_v37 = vpack.c.bf16 %v72_v36, %v72_v36 }
 0x146   :  { %83 = vst.msk [vmem:[%s157_s4 + $0x4] sm:$0xf] %vm81_vm1, %v93_v37 }

// kernel: _lambda_.67
= control target key start
LH: loop header
LB: loop body
LE: loop exit
PB: predicated region body
PF: predicated region fallthrough
CT: control target
= control target key end

     0   :  { %v175_v0 = vmov 0.0   ;;  %vm176_vm0 = vmmov 0   ;;  %vm46_vm1 = vcmask 261120   ;;  %s212_s1 = inlined_call_operand.vmem [shape: bf16[32,128], index: 1, kind: input, shape index: {}]   ;;  %s213_s0 = inlined_call_operand.vmem [shape: bf16[16,32], index: 0, kind: input, shape index: {}]   ;;  %s214_s2 = inlined_call_operand.vmem [shape: f32[1,128], index: 2, kind: input, shape index: {}]   ;;  %s215_s3 = inlined_call_operand.vmem [shape: bf16[16,128], index: 3, kind: output, shape index: {}]  }
   0x1   :  { %158 = vmatprep.subr.bf16.mxu0 %v175_v0  ;;  %v168_v1 = vld [vmem:[%s212_s1] sm:$0xff]   ;;  %162 = vmatprep.mubr.msk.bf16.mxu0 %vm176_vm0, %v175_v0  ;;  %v169_v2 = vld [vmem:[%s212_s1 + $0x8] sm:$0xff]  }
   0x2   :  { %159 = vmatpush3.bf16.msra.mxu0 %v168_v1  ;;  %v170_v3 = vld [vmem:[%s213_s0] sm:$0xff]  }
   0x3   :  { %160 = vmatprep.subr.bf16.mxu0 %v175_v0  ;;  %v145_v4 = vld [vmem:[%s214_s2] ss:$0 sm:$0xff] }
   0x6   :  { %161 = vmatpush3.bf16.msra.mxu0 %v169_v2 }
   0x9   :  { %163 = vmatmul.mubr.msk.bf16.vlgmr.msra.gmra.mrb[0].mxu0 %vm46_vm1, %v170_v3 }
  0xdc   :  { %v84_v5 = vpop.f32.mrb[0].mxu0 }
  0xdd   :  { %v107_v6 = vadd.f32 %v145_v4, %v84_v5  ;;  %v164_v7 = vpop.f32.mrb[1].mxu0 }
  0xde   :  { %v87_v8 = vpop.f32.mrb[2].mxu0 }
  0xdf   :  { %v109_v9 = vmul.f32 %v107_v6, %v107_v6  ;;  %v108_v10 = vadd.f32 %v145_v4, %v87_v8  ;;  %v165_v11 = vpop.f32.mrb[3].mxu0 }
  0xe1   :  { %v111_v12 = vmul.f32 %v109_v9, %v107_v6  ;;  %v110_v13 = vmul.f32 %v108_v10, %v108_v10 }
  0xe3   :  { %v113_v14 = vmul.f32 0.044715, %v111_v12  ;;  %v112_v15 = vmul.f32 %v110_v13, %v108_v10 }
  0xe5   :  { %v115_v16 = vadd.f32 %v113_v14, %v107_v6  ;;  %v114_v17 = vmul.f32 0.044715, %v112_v15 }
  0xe7   :  { %v117_v18 = vmul.f32 0.7978846, %v115_v16  ;;  %v116_v19 = vadd.f32 %v114_v17, %v108_v10 }
  0xe9   :  { %171 = vtanh.f32 %v117_v18  ;;  %v118_v20 = vmul.f32 0.7978846, %v116_v19 }
  0xeb   :  { %173 = vtanh.f32 %v118_v20 }
  0xf3   :  { %v172_v21 = vpop.eup %171 }
  0xf4   :  { %v121_v22 = vadd.f32 1.0, %v172_v21 }
  0xf5   :  { %v174_v23 = vpop.eup %173 }
  0xf6   :  { %v123_v24 = vmul.f32 0.5, %v121_v22  ;;  %v122_v25 = vadd.f32 1.0, %v174_v23 }
  0xf8   :  { %v124_v26 = vmul.f32 0.5, %v122_v25  ;;  %v125_v27 = vmul.f32 %v123_v24, %v107_v6 }
  0xfa   :  { %v126_v28 = vmul.f32 %v124_v26, %v108_v10 }
  0xfc   :  { %v153_v29 = vpack.c.bf16 %v126_v28, %v125_v27 }
  0xfe   :  { %154 = vst [vmem:[%s215_s3] sm:$0xff] %v153_v29  }

// kernel: _lambda_.64
= control target key start
LH: loop header
LB: loop body
LE: loop exit
PB: predicated region body
PF: predicated region fallthrough
CT: control target
= control target key end

     0   :  { %s910_s12 = smov 0   ;;  %s1007_s0 = inlined_call_operand.vmem [shape: bf16[2,8,32], index: 0, kind: input, shape index: {}]   ;;  %s1008_s1 = inlined_call_operand.vmem [shape: bf16[2,5,32], index: 1, kind: input, shape index: {}]   ;;  %s1009_s2 = inlined_call_operand.vmem [shape: bf16[2,5,32], index: 2, kind: input, shape index: {}]   ;;  %s1010_s3 = inlined_call_operand.vmem [shape: bf16[2,8,32], index: 3, kind: output, shape index: {}]  }
   0x1 LB: > { %s752_s13 = sadd.s32 4294967295, %s879_s12   ;;  %p756_p0 = scmp.ge.s32.totalorder %s879_s12, 1  ;;  %s879_s12 = sphi %s910_s12, %s13_s12  }
   0x2   : > { %p154_p1 = scmp.lt.s32.totalorder %s879_s12, 3 }
   0x4   : > { %p155_p2 = pnand %p756_p0, %p154_p1 }
   0x5   : > { %p184_p3 = scmp.lt.s32.totalorder (!%p155_p2), %s752_s13, 1  ;;  %v881_v0 = vmov (!%p155_p2), 0.0   ;;  %vm882_vm0 = vmmov (!%p155_p2), 0   ;;  %vm206_vm1 = vcmask (!%p155_p2), 64512   ;;  %vm253_vm2 = vcmask (!%p155_p2), 39936   ;;  %s883_s21 = smov (!%p155_p2), 120  }
   0x6   : > { %158 = sbr.rel (%p155_p2) target bundleno = 1473 (0x5c1), region = 32  ;;  %790 = vmatprep.subr.bf16.mxu0 (!%p155_p2), %v881_v0  ;;  %792 = vmatprep.mubr.msk.bf16.mxu0 (!%p155_p2), %vm882_vm0, %v881_v0  ;;  %s884_s22 = smov (!%p155_p2), 112   ;;  %vm269_vm3 = vcmask (!%p155_p2), 1041408   ;;  %vm270_vm4 = vcmask (!%p155_p2), 1042432   ;;  %v886_v18 = vmov (!%p155_p2), 65535   ;;  %vm668_vm5 = vcmask (!%p155_p2), 130048  }
   0x7   : > { %796 = vmatprep.subr.bf16.mxu1 (!%p155_p2), %v881_v0  ;;  %798 = vmatprep.mubr.msk.bf16.mxu1 (!%p155_p2), %vm882_vm0, %v881_v0  ;;  %s885_s23 = smov (!%p155_p2), 104   ;;  %v271_v19 = vsel (!%p155_p2), %vm269_vm3, 4294967295, %v886_v18  ;;  %s887_s27 = smov (!%p155_p2), 8   ;;  %vm670_vm6 = vcmask (!%p155_p2), 195584   ;;  %vm673_vm7 = vcmask (!%p155_p2), 257024  }
   0x8   : > { %v952_v20 = vsel (!%p155_p2), %vm270_vm4, %v271_v19, 0  ;;  %s888_s28 = smov (!%p155_p2), 16   ;;  %s889_s29 = smov (!%p155_p2), 24  }
   0xd   : > { %s1012_s13 = smov (!%p184_p3, %s752_s13), 1 }
   0xe   : > { %s924_s14 = sshll.u32 %s1012_s13, 2 }
   0xf   : > { %s191_s17 = scalar_lea.vmem %s1008_s1, %s924_s14  ;;  %s187_s20 = scalar_lea.vmem %s1007_s0, %s924_s14 }
  0x10   : > { %v204_v1 = vld [vmem:[%s191_s17] sm:$0x7]  ;;  %s195_s26 = scalar_lea.vmem %s1009_s2, %s924_s14  ;;  %s199_s5 = scalar_lea.vmem %s1010_s3, %s924_s14 }
  0x11   : > { %v211_v2 = vsel %vm206_vm1, %v204_v1, 0  ;;  %v202_v3 = vld [vmem:[%s187_s20] sm:$0xf]  ;;  %v764_v10 = vcombine.low %v204_v1, %v204_v1 }
  0x12   : > { %791 = vmatpush3.bf16.xpose.msra.mxu0 %v211_v2  ;;  %v203_v4 = vmul.bf16 1052065461, %v202_v3  ;;  %v950_v17 = vld [vmem:[%s195_s26] sm:$0x7] }
  0x13   : > { %808 = vmatprep.subr.bf16.mxu0 %v881_v0  ;;  %324 = vrot.lane.b32.xlu1 %v764_v10, %s883_s21  ;;  %v274_v21 = vand.u32 %v952_v20, %v950_v17  ;;  %v766_v1 = vcombine.low %v950_v17, %v950_v17 }
  0x14   : > { %v763_v11 = vcombine.low %v203_v4, %v203_v4 }
  0x15   : > { %797 = vmatpush3.bf16.msra.mxu1 %v274_v21 }
  0x16   : > { %802 = vmatprep.subr.bf16.mxu1 %v881_v0 }
  0x17   : > { %319 = vrot.lane.b32.xlu1 %v763_v11, %s883_s21 }
  0x19   : > { %793 = vmatmul.mubr.msk.bf16.vlgmr.msra.gmra.mrb[0].mxu0 %vm206_vm1, %v203_v4 }
  0x1a   : > { %810 = vmatprep.mubr.msk.bf16.mxu0 %vm882_vm0, %v881_v0 }
  0x1b   : > { %435 = vrot.lane.b32.xlu1 %v763_v11, %s884_s22 }
  0x1f   : > { %547 = vrot.lane.b32.xlu1 %v764_v10, %s885_s23 }
  0x23   : > { %545 = vrot.lane.b32.xlu1 %v763_v11, %s885_s23 }
  0x85   : > { %v325_v24 = vpop.permute.xlu1 %324 }
  0x86   : > { %v330_v26 = vsel %vm206_vm1, %v325_v24, 0 }
  0x89   : > { %v320_v28 = vpop.permute.xlu1 %319 }
  0x8d   : > { %v436_v30 = vpop.permute.xlu1 %435 }
  0x91   : > { %v548_v32 = vpop.permute.xlu1 %547 }
  0x92   : > { %v553_v33 = vsel %vm206_vm1, %v548_v32, 0 }
  0x95   : > { %v546_v34 = vpop.permute.xlu1 %545 }
  0xec   : > { %v247_v5 = vpop.f32.mrb[0].mxu0 }
  0xed   : > { %v794_v6 = vpop.f32.mrb[1].mxu0  ;;  %v254_v7 = vsel %vm253_vm2, %v247_v5, -inf }
  0xee   : > { %255 = vmax.xlane.f32.xlu0 %v254_v7  ;;  %v250_v8 = vpop.f32.mrb[2].mxu0 }
  0xef   : > { %v795_v9 = vpop.f32.mrb[3].mxu0 }
 0x17b   : > { %v256_v12 = vpop.xlane.xlu0 %255 }
 0x17c   : > { %v257_v13 = vsub.f32 %v247_v5, %v256_v12 }
 0x17e   : > { %v258_v14 = vmul.f32 1.442695, %v257_v13 }
 0x180   : > { %857 = vpow2.f32 %v258_v14 }
 0x18a   : > { %v858_v15 = vpop.eup %857 }
 0x18b   : > { %v260_v16 = vsel %vm253_vm2, %v858_v15, 0.0 }
 0x18c   : > { %261 = vadd.xlane.f32.xlu0 %v260_v16 }
 0x1a2   : > { %437 = vrot.lane.b32.xlu0 %v764_v10, %s884_s22 }
 0x219   : > { %v262_v22 = vpop.xlane.xlu0 %261 }
 0x21a   : > { %859 = vrcp.f32 %v262_v22 }
 0x21d   : > { %v438_v29 = vpop.permute.xlu0 %437 }
 0x21e   : > { %v443_v31 = vsel %vm206_vm1, %v438_v29, 0 }
 0x224   : > { %v860_v23 = vpop.eup %859 }
 0x225   : > { %v264_v25 = vmul.f32 %v860_v23, %v858_v15 }
 0x227   : > { %v265_v27 = vpack.c.bf16 %v264_v25, %v264_v25 }
 0x229   : > { %799 = vmatmul.mubr.msk.bf16.vlgmr.msra.gmra.mrb[0].mxu1 %vm253_vm2, %v265_v27 }
 0x22a   : > { %803 = vmatpush3.bf16.xpose.msra.mxu1 %v330_v26  ;;  %804 = vmatprep.mubr.msk.bf16.mxu1 %vm882_vm0, %v881_v0 }
 0x22b   : > { %814 = vmatprep.subr.bf16.mxu1 %v881_v0 }
 0x231   : > { %805 = vmatmul.mubr.msk.bf16.vlgmr.msra.gmra.mrb[4].mxu1 %vm206_vm1, %v320_v28 }
 0x232   : > { %815 = vmatpush3.bf16.xpose.msra.mxu1 %v443_v31  ;;  %816 = vmatprep.mubr.msk.bf16.mxu1 %vm882_vm0, %v881_v0 }
 0x233   : > { %826 = vmatprep.subr.bf16.mxu1 %v881_v0 }
 0x239   : > { %817 = vmatmul.mubr.msk.bf16.vlgmr.msra.gmra.mrb[8].mxu1 %vm206_vm1, %v436_v30 }
 0x23a   : > { %827 = vmatpush3.bf16.xpose.msra.mxu1 %v553_v33  ;;  %828 = vmatprep.mubr.msk.bf16.mxu1 %vm882_vm0, %v881_v0 }
 0x241   : > { %829 = vmatmul.mubr.msk.bf16.vlgmr.msra.gmra.mrb[12].mxu1 %vm206_vm1, %v546_v34 }
 0x2fc   : > { %v973_v35 = vpop.f32.mrb[0].mxu1 }
 0x2fd   : > { %v800_v36 = vpop.f32.mrb[1].mxu1 }
 0x2fe   : > { %v313_v37 = vpop.f32.mrb[2].mxu1 }
 0x2ff   : > { %v801_v38 = vpop.f32.mrb[3].mxu1 }
 0x304   : > { %v366_v39 = vpop.f32.mrb[4].mxu1 }
 0x305   : > { %v806_v40 = vpop.f32.mrb[5].mxu1  ;;  %v372_v41 = vsel %vm253_vm2, %v366_v39, -inf }
 0x306   : > { %373 = vmax.xlane.f32.xlu1 %v372_v41  ;;  %v369_v42 = vpop.f32.mrb[6].mxu1 }
 0x307   : > { %v807_v43 = vpop.f32.mrb[7].mxu1 }
 0x30c   : > { %v479_v44 = vpop.f32.mrb[8].mxu1 }
 0x30d   : > { %v485_v45 = vsel %vm253_vm2, %v479_v44, -inf  ;;  %v818_v46 = vpop.f32.mrb[9].mxu1 }
 0x30e   : > { %486 = vmax.xlane.f32.xlu0 %v485_v45  ;;  %v482_v47 = vpop.f32.mrb[10].mxu1 }
 0x30f   : > { %v819_v48 = vpop.f32.mrb[11].mxu1 }
 0x314   : > { %v589_v49 = vpop.f32.mrb[12].mxu1 }
 0x315   : > { %v595_v50 = vsel %vm253_vm2, %v589_v49, -inf  ;;  %v830_v51 = vpop.f32.mrb[13].mxu1 }
 0x316   : > { %596 = vmax.xlane.f32.xlu1 %v595_v50  ;;  %v592_v52 = vpop.f32.mrb[14].mxu1 }
 0x317   : > { %v831_v53 = vpop.f32.mrb[15].mxu1 }
 0x393   : > { %v374_v54 = vpop.xlane.xlu1 %373 }
 0x394   : > { %v375_v55 = vsub.f32 %v366_v39, %v374_v54 }
 0x396   : > { %v376_v56 = vmul.f32 1.442695, %v375_v55 }
 0x398   : > { %861 = vpow2.f32 %v376_v56 }
 0x39b   : > { %v487_v57 = vpop.xlane.xlu0 %486 }
 0x39c   : > { %v488_v58 = vsub.f32 %v479_v44, %v487_v57 }
 0x39e   : > { %v489_v59 = vmul.f32 1.442695, %v488_v58 }
 0x3a0   : > { %863 = vpow2.f32 %v489_v59 }
 0x3a2   : > { %v862_v60 = vpop.eup %861 }
 0x3a3   : > { %v378_v61 = vsel %vm253_vm2, %v862_v60, 0.0  ;;  %v597_v2 = vpop.xlane.xlu1 %596 }
 0x3a4   : > { %379 = vadd.xlane.f32.xlu1 %v378_v61  ;;  %v598_v3 = vsub.f32 %v589_v49, %v597_v2 }
 0x3a6   : > { %v599_v4 = vmul.f32 1.442695, %v598_v3 }
 0x3a8   : > { %865 = vpow2.f32 %v599_v4 }
 0x3aa   : > { %v864_v62 = vpop.eup %863 }
 0x3ab   : > { %v491_v63 = vsel %vm253_vm2, %v864_v62, 0.0 }
 0x3ac   : > { %492 = vadd.xlane.f32.xlu0 %v491_v63 }
 0x3b2   : > { %v866_v5 = vpop.eup %865 }
 0x3b3   : > { %v601_v6 = vsel %vm253_vm2, %v866_v5, 0.0 }
 0x3b5   : > { %497 = vrot.lane.b32.xlu1 %v766_v1, %s884_s22 }
 0x3c2   : > { %387 = vrot.lane.b32.xlu0 %v766_v1, %s883_s21 }
 0x3d9   : > { %602 = vadd.xlane.f32.xlu1 %v601_v6 }
 0x3ea   : > { %607 = vrot.lane.b32.xlu1 %v766_v1, %s885_s23 }
 0x431   : > { %v380_v7 = vpop.xlane.xlu1 %379 }
 0x432   : > { %867 = vrcp.f32 %v380_v7 }
 0x435   : > { %v498_v13 = vpop.permute.xlu1 %497 }
 0x436   : > { %v503_v15 = vand.u32 %v498_v13, %v952_v20 }
 0x439   : > { %v493_v8 = vpop.xlane.xlu0 %492 }
 0x43a   : > { %869 = vrcp.f32 %v493_v8 }
 0x43c   : > { %v868_v9 = vpop.eup %867 }
 0x43d   : > { %v382_v10 = vmul.f32 %v868_v9, %v862_v60  ;;  %v388_v11 = vpop.permute.xlu0 %387 }
 0x43e   : > { %v393_v12 = vand.u32 %v388_v11, %v952_v20 }
 0x43f   : > { %v383_v14 = vpack.c.bf16 %v382_v10, %v382_v10 }
 0x440   : > { %809 = vmatpush3.bf16.msra.mxu0 %v393_v12 }
 0x441   : > { %820 = vmatprep.subr.bf16.mxu0 %v881_v0 }
 0x443   : > { %811 = vmatmul.mubr.msk.bf16.vlgmr.msra.gmra.mrb[4].mxu0 %vm253_vm2, %v383_v14 }
 0x444   : > { %v870_v16 = vpop.eup %869  ;;  %821 = vmatpush3.bf16.msra.mxu0 %v503_v15  ;;  %822 = vmatprep.mubr.msk.bf16.mxu0 %vm882_vm0, %v881_v0 }
 0x445   : > { %v495_v17 = vmul.f32 %v870_v16, %v864_v62  ;;  %832 = vmatprep.subr.bf16.mxu0 %v881_v0 }
 0x447   : > { %v496_v18 = vpack.c.bf16 %v495_v17, %v495_v17 }
 0x44b   : > { %823 = vmatmul.mubr.msk.bf16.vlgmr.msra.gmra.mrb[8].mxu0 %vm253_vm2, %v496_v18 }
 0x44c   : > { %834 = vmatprep.mubr.msk.bf16.mxu0 %vm882_vm0, %v881_v0 }
 0x466   : > { %v603_v19 = vpop.xlane.xlu1 %602 }
 0x467   : > { %871 = vrcp.f32 %v603_v19 }
 0x46a   : > { %v608_v21 = vpop.permute.xlu1 %607 }
 0x46b   : > { %v613_v22 = vand.u32 %v608_v21, %v952_v20 }
 0x46d   : > { %833 = vmatpush3.bf16.msra.mxu0 %v613_v22 }
 0x471   : > { %v872_v23 = vpop.eup %871 }
 0x472   : > { %v605_v24 = vmul.f32 %v872_v23, %v866_v5 }
 0x474   : > { %v606_v25 = vpack.c.bf16 %v605_v24, %v605_v24 }
 0x476   : > { %835 = vmatmul.mubr.msk.bf16.vlgmr.msra.gmra.mrb[12].mxu0 %vm253_vm2, %v606_v25 }
 0x516   : > { %v429_v26 = vpop.f32.mrb[4].mxu0 }
 0x517   : > { %656 = vrot.lane.b32.xlu0 %v429_v26, %s887_s27  ;;  %v812_v27 = vpop.f32.mrb[5].mxu0 }
 0x518   : > { %v432_v28 = vpop.f32.mrb[6].mxu0 }
 0x519   : > { %v813_v29 = vpop.f32.mrb[7].mxu0 }
 0x51e   : > { %v539_v30 = vpop.f32.mrb[8].mxu0 }
 0x51f   : > { %660 = vrot.lane.b32.xlu1 %v539_v30, %s888_s28  ;;  %v824_v0 = vpop.f32.mrb[9].mxu0 }
 0x520   : > { %v542_v31 = vpop.f32.mrb[10].mxu0 }
 0x521   : > { %v825_v32 = vpop.f32.mrb[11].mxu0 }
 0x549   : > { %v649_v20 = vpop.f32.mrb[12].mxu0 }
 0x54a   : > { %664 = vrot.lane.b32.xlu0 %v649_v20, %s889_s29  ;;  %v836_v33 = vpop.f32.mrb[13].mxu0 }
 0x54b   : > { %v652_v34 = vpop.f32.mrb[14].mxu0 }
 0x54c   : > { %v837_v36 = vpop.f32.mrb[15].mxu0 }
 0x589   : > { %v657_v37 = vpop.permute.xlu0 %656 }
 0x58a   : > { %v667_v39 = vsel %vm206_vm1, %v973_v35, %v657_v37 }
 0x591   : > { %v661_v38 = vpop.permute.xlu1 %660 }
 0x592   : > { %v669_v40 = vsel %vm668_vm5, %v667_v39, %v661_v38 }
 0x5bc   : > { %v665_v41 = vpop.permute.xlu0 %664 }
 0x5bd   : > { %v671_v42 = vsel %vm670_vm6, %v669_v40, %v665_v41 }
 0x5be   : > { %v672_v43 = vpack.c.bf16 %v671_v42, %v671_v42 }
 0x5c0   : > { %674 = vst.msk [vmem:[%s199_s5] sm:$0xf] %vm673_vm7, %v672_v43 }
 0x5c1 PF: > { %s13_s12 = sadd.s32 1, %s879_s12  }
 0x5c2   : > { %p10_p4 = scmp.ge.s32.totalorder %s13_s12, 4  }
 0x5c4   :  { %12 = sbr.rel (!%p10_p4) target bundleno = 1 (0x1), region = 68 }

// kernel: _lambda_.68
= control target key start
LH: loop header
LB: loop body
LE: loop exit
PB: predicated region body
PF: predicated region fallthrough
CT: control target
= control target key end

     0   :  { %vm19_vm0 = vcmask 261120   ;;  %v225_v0 = vmov 0.0   ;;  %vm226_vm1 = vmmov 0   ;;  %vm164_vm2 = vcmask 257024   ;;  %s287_s1 = inlined_call_operand.vmem [shape: bf16[128,32], index: 1, kind: input, shape index: {}]   ;;  %s288_s0 = inlined_call_operand.vmem [shape: bf16[16,128], index: 0, kind: input, shape index: {}]   ;;  %s289_s2 = inlined_call_operand.vmem [shape: f32[1,32], index: 2, kind: input, shape index: {}]   ;;  %s290_s3 = inlined_call_operand.vmem [shape: bf16[16,32], index: 3, kind: output, shape index: {}]  }
   0x1   :  { %194 = vmatprep.subr.bf16.mxu0 %v225_v0  ;;  %v216_v1 = vld [vmem:[%s287_s1] sm:$0xff]   ;;  %210 = vmatprep.mubr.msk.bf16.mxu0 %vm226_vm1, %v225_v0  ;;  %20 = vst.msk [vmem:[#allocation2] sm:$0xff] %vm19_vm0, %v225_v0  ;;  %21 = vst.msk [vmem:[#allocation2 + $0x8] sm:$0xff] %vm19_vm0, %v225_v0  ;;  %v217_v2 = vld [vmem:[%s287_s1 + $0x8] sm:$0xff]  }
   0x2   :  { %195 = vmatpush3.bf16.msra.mxu0 %v216_v1  ;;  %v218_v3 = vld [vmem:[%s287_s1 + $0x10] sm:$0xff]   ;;  %v219_v4 = vld [vmem:[%s287_s1 + $0x18] sm:$0xff]   ;;  %v220_v5 = vld [vmem:[%s287_s1 + $0x20] sm:$0xff]  }
   0x3   :  { %196 = vmatprep.subr.bf16.mxu0 %v225_v0  ;;  %v221_v6 = vld [vmem:[%s287_s1 + $0x28] sm:$0xff]   ;;  %v222_v7 = vld [vmem:[%s287_s1 + $0x30] sm:$0xff]   ;;  %v223_v8 = vld [vmem:[%s287_s1 + $0x38] sm:$0xff]  }
   0x4   :  { %v224_v9 = vld [vmem:[%s288_s0] sm:$0xff]  }
   0x5   :  { %v180_v18 = vld [vmem:[%s289_s2] ss:$0 sm:$0xff] }
   0x6   :  { %197 = vmatpush3.bf16.msra.mxu0 %v217_v2 }
   0x7   :  { %198 = vmatprep.subr.bf16.mxu0 %v225_v0 }
   0x8   :  { %v22_v10 = vld [vmem:[#allocation2] sm:$0xff]  ;;  %v23_v12 = vld [vmem:[#allocation2 + $0x8] sm:$0xff] }
   0xa   :  { %199 = vmatpush3.bf16.msra.mxu0 %v218_v3 }
   0xb   :  { %200 = vmatprep.subr.bf16.mxu0 %v225_v0 }
   0xe   :  { %201 = vmatpush3.bf16.msra.mxu0 %v219_v4 }
   0xf   :  { %202 = vmatprep.subr.bf16.mxu0 %v225_v0 }
  0x12   :  { %203 = vmatpush3.bf16.msra.mxu0 %v220_v5 }
  0x13   :  { %204 = vmatprep.subr.bf16.mxu0 %v225_v0 }
  0x16   :  { %205 = vmatpush3.bf16.msra.mxu0 %v221_v6 }
  0x17   :  { %206 = vmatprep.subr.bf16.mxu0 %v225_v0 }
  0x1a   :  { %207 = vmatpush3.bf16.msra.mxu0 %v222_v7 }
  0x1b   :  { %208 = vmatprep.subr.bf16.mxu0 %v225_v0 }
  0x1e   :  { %209 = vmatpush3.bf16.msra.mxu0 %v223_v8 }
  0x21   :  { %211 = vmatmul.mubr.bf16.vlgmr.msra.gmra.mrb[0].mxu0 %v224_v9 }
  0xf4   :  { %v130_v11 = vpop.f32.mrb[0].mxu0 }
  0xf5   :  { %v137_v13 = vadd.f32 %v130_v11, %v22_v10  ;;  %v212_v14 = vpop.f32.mrb[1].mxu0 }
  0xf6   :  { %v133_v15 = vpop.f32.mrb[2].mxu0 }
  0xf7   :  { %140 = vst.msk [vmem:[#allocation2] sm:$0xff] %vm19_vm0, %v137_v13  ;;  %v138_v16 = vadd.f32 %v133_v15, %v23_v12  ;;  %v213_v17 = vpop.f32.mrb[3].mxu0 }
  0xf9   :  { %141 = vst.msk [vmem:[#allocation2 + $0x8] sm:$0xff] %vm19_vm0, %v138_v16 }
  0xfe   :  { %v145_v19 = vld [vmem:[#allocation2] sm:$0xff] }
  0xff   :  { %v154_v20 = vadd.f32 %v180_v18, %v145_v19 }
 0x100   :  { %v146_v21 = vld [vmem:[#allocation2 + $0x8] sm:$0xff] }
 0x101   :  { %v183_v22 = vpack.c.bf16 %v154_v20, %v154_v20  ;;  %v155_v23 = vadd.f32 %v180_v18, %v146_v21 }
 0x103   :  { %165 = vst.msk [vmem:[%s290_s3] sm:$0xf] %vm164_vm2, %v183_v22  ;;  %v184_v24 = vpack.c.bf16 %v155_v23, %v155_v23 }
 0x105   :  { %166 = vst.msk [vmem:[%s290_s3 + $0x4] sm:$0xf] %vm164_vm2, %v184_v24 }

</bundles_post_ra>
